<compile_context>
chip_gen: v5e
topology: v5e:2x2
jax: 0.10.0
libtpu: 0.0.40
codegen_flags: <defaults>
</compile_context>

<pallas_src>
import functools

import jax
import jax.numpy as jnp
from jax.experimental import pallas as pl
from jax.experimental.pallas import tpu as pltpu

IN_DIM = 28 * 28          # 784
HID = 1000                # logical hidden size (PyTorch)
HID_PAD = 1024            # lane-aligned hidden size
OUT = 10                  # logical #classes
OUT_PAD = 128             # lane-aligned output width
NEG = -1e30               # "minus infinity" for padded logits


def _round_up(n, m):
    return (n + m - 1) // m * m


def net_kernel(x_ref, w1_ref, b1_ref, w2_ref, b2_ref, o_ref):
    # fc1: bf16 MXU matmul with f32 accumulation; bias + ReLU in f32.
    h = jnp.dot(x_ref[...], w1_ref[...], preferred_element_type=jnp.float32)
    h = jnp.maximum(h + b1_ref[...], 0.0)
    # fc2: bf16 MXU matmul, f32 accumulation.  Padded b2 lanes carry NEG so
    # exp(logit - max) underflows to 0 there and the normalizer is exact.
    logits = jnp.dot(h.astype(jnp.bfloat16), w2_ref[...],
                     preferred_element_type=jnp.float32) + b2_ref[...]
    # log_softmax over last dim (F.log_softmax defaults to dim=1 for 2-D).
    m = jnp.max(logits, axis=-1, keepdims=True)
    s = logits - m
    lse = jnp.log(jnp.sum(jnp.exp(s), axis=-1, keepdims=True))
    o_ref[...] = (s - lse).astype(o_ref.dtype)


def prepare_params(w1, b1, w2, b2):
    """Pad to lane-aligned shapes and cast matrices to bf16.

    Weights are stored as (in_features, out_features), i.e. the transpose of
    PyTorch's nn.Linear weight layout.
    """
    b1 = b1.reshape(1, -1)
    b2 = b2.reshape(1, -1)
    # fc1: zero-pad hidden columns 1000 -> 1024 (ReLU(0 + 0) = 0, harmless).
    w1p = jnp.pad(w1.astype(jnp.float32), ((0, 0), (0, HID_PAD - HID)))
    b1p = jnp.pad(b1.astype(jnp.float32), ((0, 0), (0, HID_PAD - HID)))
    # fc2: zero-pad padded-hidden rows; zero-pad output columns 10 -> 128.
    w2p = jnp.pad(w2.astype(jnp.float32),
                  ((0, HID_PAD - HID), (0, OUT_PAD - OUT)))
    # Padded output lanes get NEG in the bias so softmax ignores them.
    b2p = jnp.pad(b2.astype(jnp.float32), ((0, 0), (0, OUT_PAD - OUT)),
                  constant_values=NEG)
    return w1p.astype(jnp.bfloat16), b1p, w2p.astype(jnp.bfloat16), b2p


@functools.partial(jax.jit, static_argnames=("block_b",))
def net_forward(x, w1, b1, w2, b2, *, block_b=512):
    """x: (B, 1, 28, 28) or (B, 784). Returns (B, 10) log-probabilities."""
    x2d = x.reshape(-1, IN_DIM).astype(jnp.float32)
    B = x2d.shape[0]

    # One-time weight prep (pad + bf16 cast); negligible vs. the matmuls and
    # constant-folded when params are compile-time constants.
    w1p, b1p, w2p, b2p = prepare_params(w1, b1, w2, b2)

    # Batch tile: block_b rows, capped at the 8-aligned batch for tiny inputs.
    tb = min(block_b, _round_up(B, 8))
    b_pad = _round_up(B, tb)
    if b_pad != B:
        x2d = jnp.pad(x2d, ((0, b_pad - B), (0, 0)))
    x_bf16 = x2d.astype(jnp.bfloat16)

    grid = (b_pad // tb,)

    cost = pl.CostEstimate(
        flops=2 * b_pad * (IN_DIM * HID_PAD + HID_PAD * OUT_PAD),
        transcendentals=b_pad * (OUT_PAD + 1),          # exp + log per row
        bytes_accessed=(x_bf16.size * 2 + w1p.size * 2 + w2p.size * 2
                        + b1p.size * 4 + b2p.size * 4 + b_pad * OUT_PAD * 4),
    )

    out = pl.pallas_call(
        net_kernel,
        out_shape=jax.ShapeDtypeStruct((b_pad, OUT_PAD), jnp.float32),
        grid=grid,
        in_specs=[
            pl.BlockSpec((tb, IN_DIM), lambda i: (i, 0)),        # streamed x
            pl.BlockSpec((IN_DIM, HID_PAD), lambda i: (0, 0)),   # resident w1
            pl.BlockSpec((1, HID_PAD), lambda i: (0, 0)),        # resident b1
            pl.BlockSpec((HID_PAD, OUT_PAD), lambda i: (0, 0)),  # resident w2
            pl.BlockSpec((1, OUT_PAD), lambda i: (0, 0)),        # resident b2
        ],
        out_specs=pl.BlockSpec((tb, OUT_PAD), lambda i: (i, 0)),
        compiler_params=pltpu.CompilerParams(
            dimension_semantics=("parallel",)),
        cost_estimate=cost,
    )(x_bf16, w1p, b1p, w2p, b2p)

    return out[:B, :OUT]


def init_params(key):
    """Deterministic parameter init (shapes from Net.__init__)."""
    k1, k2, k3, k4 = jax.random.split(key, 4)
    # Stored as (in, out): transpose of torch's (out, in).
    w1 = jax.random.normal(k1, (IN_DIM, HID), jnp.float32) * 0.02
    b1 = jax.random.normal(k2, (1, HID), jnp.float32) * 0.02
    w2 = jax.random.normal(k3, (HID, OUT), jnp.float32) * 0.02
    b2 = jax.random.normal(k4, (1, OUT), jnp.float32) * 0.02
    return w1, b1, w2, b2


def net_forward_ref(x, w1, b1, w2, b2):
    x2d = x.reshape(-1, IN_DIM).astype(jnp.float32)
    h = jnp.maximum(x2d @ w1 + b1, 0.0)
    logits = h @ w2 + b2
    return jax.nn.log_softmax(logits, axis=-1)


if __name__ == "__main__":
    key = jax.random.PRNGKey(0)
    kx, kp = jax.random.split(key)
    # Small batch, MNIST-like NCHW input implied by the 28*28 view.
    x = jax.random.normal(kx, (2, 1, 28, 28), jnp.float32)
    w1, b1, w2, b2 = init_params(kp)

    out = net_forward(x, w1, b1, w2, b2)
    out = jax.block_until_ready(out)

    ref = net_forward_ref(x, w1, b1, w2, b2)
    assert out.shape == (2, 10)
    # bf16 matmuls (f32 accumulation) -> looser tolerance than pure f32.
    assert jnp.allclose(out, ref, atol=2e-2, rtol=2e-2), (
        float(jnp.max(jnp.abs(out - ref))))
    print("KERNEL_OK")
</pallas_src>

<mosaic_0001>
module attributes {stable_mosaic.version = 11 : i64} {
  func.func @net_kernel(%arg0: i32, %arg1: memref<8x784xbf16, #tpu.memory_space<vmem>>, %arg2: memref<784x1024xbf16, #tpu.memory_space<vmem>>, %arg3: memref<1x1024xf32, #tpu.memory_space<vmem>>, %arg4: memref<1024x128xbf16, #tpu.memory_space<vmem>>, %arg5: memref<1x128xf32, #tpu.memory_space<vmem>>, %arg6: memref<8x128xf32, #tpu.memory_space<vmem>>) attributes {dimension_semantics = [#tpu.dimension_semantics<parallel>], iteration_bounds = array<i64: 1>, scalar_prefetch = 0 : i64, scratch_operands = 0 : i64, tpu.core_type = #tpu.core_type<tc>, window_params = [{transform_indices = @transform_0, window_bounds = array<i64: 8, 784>}, {pipeline_mode = #tpu.pipeline_mode<synchronous>, transform_indices = @transform_1, window_bounds = array<i64: 784, 1024>}, {pipeline_mode = #tpu.pipeline_mode<synchronous>, transform_indices = @transform_2, window_bounds = array<i64: 1, 1024>}, {pipeline_mode = #tpu.pipeline_mode<synchronous>, transform_indices = @transform_3, window_bounds = array<i64: 1024, 128>}, {pipeline_mode = #tpu.pipeline_mode<synchronous>, transform_indices = @transform_4, window_bounds = array<i64: 1, 128>}, {transform_indices = @transform_5, window_bounds = array<i64: 8, 128>}]} {
    %c0 = arith.constant 0 : index
    %c0_0 = arith.constant 0 : index
    %0 = vector.load %arg1[%c0, %c0_0] : memref<8x784xbf16, #tpu.memory_space<vmem>>, vector<8x784xbf16>
    %c0_1 = arith.constant 0 : index
    %c0_2 = arith.constant 0 : index
    %1 = vector.load %arg2[%c0_1, %c0_2] : memref<784x1024xbf16, #tpu.memory_space<vmem>>, vector<784x1024xbf16>
    %cst = arith.constant dense<0.000000e+00> : vector<8x1024xf32>
    %2 = tpu.matmul %0, %1, %cst {dimension_numbers = #tpu.dot_dimension_numbers<[1], [0], [0], [1], [0, 0, 1, 1], [], []>} : vector<8x784xbf16>, vector<784x1024xbf16>, vector<8x1024xf32> -> vector<8x1024xf32>
    %c0_3 = arith.constant 0 : index
    %c0_4 = arith.constant 0 : index
    %3 = vector.load %arg3[%c0_3, %c0_4] : memref<1x1024xf32, #tpu.memory_space<vmem>>, vector<1x1024xf32>
    %4 = vector.broadcast %3 : vector<1x1024xf32> to vector<8x1024xf32>
    %5 = arith.addf %2, %4 : vector<8x1024xf32>
    %cst_5 = arith.constant 0.000000e+00 : f32
    %6 = vector.broadcast %cst_5 : f32 to vector<8x1024xf32>
    %7 = arith.maximumf %5, %6 : vector<8x1024xf32>
    %8 = arith.truncf %7 : vector<8x1024xf32> to vector<8x1024xbf16>
    %c0_6 = arith.constant 0 : index
    %c0_7 = arith.constant 0 : index
    %9 = vector.load %arg4[%c0_6, %c0_7] : memref<1024x128xbf16, #tpu.memory_space<vmem>>, vector<1024x128xbf16>
    %cst_8 = arith.constant dense<0.000000e+00> : vector<8x128xf32>
    %10 = tpu.matmul %8, %9, %cst_8 {dimension_numbers = #tpu.dot_dimension_numbers<[1], [0], [0], [1], [0, 0, 1, 1], [], []>} : vector<8x1024xbf16>, vector<1024x128xbf16>, vector<8x128xf32> -> vector<8x128xf32>
    %c0_9 = arith.constant 0 : index
    %c0_10 = arith.constant 0 : index
    %11 = vector.load %arg5[%c0_9, %c0_10] : memref<1x128xf32, #tpu.memory_space<vmem>>, vector<1x128xf32>
    %12 = vector.broadcast %11 : vector<1x128xf32> to vector<8x128xf32>
    %13 = arith.addf %10, %12 : vector<8x128xf32>
    %cst_11 = arith.constant dense<0xFF800000> : vector<8xf32>
    %14 = vector.multi_reduction <maximumf>, %13, %cst_11 [1] : vector<8x128xf32> to vector<8xf32>
    %15 = vector.shape_cast %14 : vector<8xf32> to vector<8x1xf32>
    %16 = vector.broadcast %15 : vector<8x1xf32> to vector<8x128xf32>
    %17 = arith.subf %13, %16 : vector<8x128xf32>
    %18 = math.exp %17 : vector<8x128xf32>
    %cst_12 = arith.constant dense<0.000000e+00> : vector<8xf32>
    %19 = vector.multi_reduction <add>, %18, %cst_12 [1] : vector<8x128xf32> to vector<8xf32>
    %20 = vector.shape_cast %19 : vector<8xf32> to vector<8x1xf32>
    %21 = math.log %20 : vector<8x1xf32>
    %22 = vector.broadcast %21 : vector<8x1xf32> to vector<8x128xf32>
    %23 = arith.subf %17, %22 : vector<8x128xf32>
    %c0_13 = arith.constant 0 : index
    %c0_14 = arith.constant 0 : index
    %24 = vector.load %arg6[%c0_13, %c0_14] : memref<8x128xf32, #tpu.memory_space<vmem>>, vector<8x128xf32>
    tpu.vector_store %arg6[%c0_13, %c0_14], %23 {strides = array<i32>} : memref<8x128xf32, #tpu.memory_space<vmem>>, vector<8x128xf32>,
    return
  }
  func.func @transform_0(%arg0: i32) -> (i32, i32) {
    %c0_i32 = arith.constant 0 : i32
    %c0_i32_0 = arith.constant 0 : i32
    return %arg0, %c0_i32 : i32, i32
  }
  func.func @transform_1(%arg0: i32) -> (i32, i32) {
    %c0_i32 = arith.constant 0 : i32
    %c0_i32_0 = arith.constant 0 : i32
    %c0_i32_1 = arith.constant 0 : i32
    return %c0_i32, %c0_i32_0 : i32, i32
  }
  func.func @transform_2(%arg0: i32) -> (i32, i32) {
    %c0_i32 = arith.constant 0 : i32
    %c0_i32_0 = arith.constant 0 : i32
    %c0_i32_1 = arith.constant 0 : i32
    return %c0_i32, %c0_i32_0 : i32, i32
  }
  func.func @transform_3(%arg0: i32) -> (i32, i32) {
    %c0_i32 = arith.constant 0 : i32
    %c0_i32_0 = arith.constant 0 : i32
    %c0_i32_1 = arith.constant 0 : i32
    return %c0_i32, %c0_i32_0 : i32, i32
  }
  func.func @transform_4(%arg0: i32) -> (i32, i32) {
    %c0_i32 = arith.constant 0 : i32
    %c0_i32_0 = arith.constant 0 : i32
    %c0_i32_1 = arith.constant 0 : i32
    return %c0_i32, %c0_i32_0 : i32, i32
  }
  func.func @transform_5(%arg0: i32) -> (i32, i32) {
    %c0_i32 = arith.constant 0 : i32
    %c0_i32_0 = arith.constant 0 : i32
    return %arg0, %c0_i32 : i32, i32
  }
}

</mosaic_0001>

<bundles_post_ra>
// kernel: net_forward.1
= control target key start
LH: loop header
LB: loop body
LE: loop exit
PB: predicated region body
PF: predicated region fallthrough
CT: control target
= control target key end

     0   :  { %vm2419_vm0 = vcmask 130048   ;;  %s8834_s1 = inlined_call_operand.vmem [shape: bf16[784,1024], index: 1, kind: input, shape index: {}]   ;;  %s8835_s0 = inlined_call_operand.vmem [shape: bf16[8,784], index: 0, kind: input, shape index: {}]   ;;  %s8836_s2 = inlined_call_operand.vmem [shape: f32[1,1024], index: 2, kind: input, shape index: {}]   ;;  %s8837_s3 = inlined_call_operand.vmem [shape: bf16[1024,128], index: 3, kind: input, shape index: {}]   ;;  %s8838_s4 = inlined_call_operand.vmem [shape: f32[1,128], index: 4, kind: input, shape index: {}]   ;;  %s8839_s5 = inlined_call_operand.vmem [shape: f32[8,128], index: 5, kind: output, shape index: {}]  }
   0x1   :  { %v4028_v0 = vld [vmem:[%s8834_s1 + $0x1c0] sm:$0xf] }
   0x2   :  { %v5694_v1 = vld [vmem:[%s8834_s1 + $0x1dc] sm:$0xf0] }
   0x3   :  { %v4284_v2 = vld [vmem:[%s8834_s1 + $0x3c0] sm:$0xf]  ;;  %v4029_v3 = vor.u32 %v5694_v1, %v4028_v0 }
   0x4   :  { %v5758_v4 = vld [vmem:[%s8834_s1 + $0x3dc] sm:$0xf0] }
   0x5   :  { %v4540_v5 = vld [vmem:[%s8834_s1 + $0x5c0] sm:$0xf]  ;;  %v4285_v7 = vor.u32 %v5758_v4, %v4284_v2  ;;  %2423 = vmatpush.bf16.msra.mxu0 %v4029_v3 }
   0x6   :  { %v5822_v6 = vld [vmem:[%s8834_s1 + $0x5dc] sm:$0xf0] }
   0x7   :  { %v4541_v8 = vor.u32 %v5822_v6, %v4540_v5  ;;  %v4796_v9 = vld [vmem:[%s8834_s1 + $0x7c0] sm:$0xf]  ;;  %2436 = vmatpush.bf16.msra.mxu1 %v4285_v7 }
   0x8   :  { %v5886_v10 = vld [vmem:[%s8834_s1 + $0x7dc] sm:$0xf0] }
   0x9   :  { %v3996_v11 = vld [vmem:[%s8834_s1 + $0x180] sm:$0xf]  ;;  %v4797_v12 = vor.u32 %v5886_v10, %v4796_v9  ;;  %2449 = vmatpush.bf16.msra.mxu2 %v4541_v8 }
   0xa   :  { %v5686_v13 = vld [vmem:[%s8834_s1 + $0x19c] sm:$0xf0] }
   0xb   :  { %v4252_v14 = vld [vmem:[%s8834_s1 + $0x380] sm:$0xf]  ;;  %v3997_v16 = vor.u32 %v5686_v13, %v3996_v11  ;;  %2462 = vmatpush.bf16.msra.mxu3 %v4797_v12 }
   0xc   :  { %v5750_v15 = vld [vmem:[%s8834_s1 + $0x39c] sm:$0xf0] }
   0xd   :  { %v4253_v17 = vor.u32 %v5750_v15, %v4252_v14  ;;  %v4508_v18 = vld [vmem:[%s8834_s1 + $0x580] sm:$0xf]  ;;  %2424 = vmatpush.bf16.msra.mxu0 %v3997_v16 }
   0xe   :  { %v5814_v19 = vld [vmem:[%s8834_s1 + $0x59c] sm:$0xf0] }
   0xf   :  { %v4764_v20 = vld [vmem:[%s8834_s1 + $0x780] sm:$0xf]  ;;  %v4509_v21 = vor.u32 %v5814_v19, %v4508_v18  ;;  %2437 = vmatpush.bf16.msra.mxu1 %v4253_v17 }
  0x10   :  { %v5878_v22 = vld [vmem:[%s8834_s1 + $0x79c] sm:$0xf0] }
  0x11   :  { %v3964_v23 = vld [vmem:[%s8834_s1 + $0x140] sm:$0xf]  ;;  %v4765_v25 = vor.u32 %v5878_v22, %v4764_v20  ;;  %2450 = vmatpush.bf16.msra.mxu2 %v4509_v21 }
  0x12   :  { %v5678_v24 = vld [vmem:[%s8834_s1 + $0x15c] sm:$0xf0] }
  0x13   :  { %v4220_v26 = vld [vmem:[%s8834_s1 + $0x340] sm:$0xf]  ;;  %v3965_v29 = vor.u32 %v5678_v24, %v3964_v23  ;;  %2463 = vmatpush.bf16.msra.mxu3 %v4765_v25  ;;  %v22_v25 = vld [vmem:[%s8835_s0 + $0x8] sm:$0xff] }
  0x14   :  { %v5742_v27 = vld [vmem:[%s8834_s1 + $0x35c] sm:$0xf0] }
  0x15   :  { %v4476_v28 = vld [vmem:[%s8834_s1 + $0x540] sm:$0xf]  ;;  %v4221_v33 = vor.u32 %v5742_v27, %v4220_v26  ;;  %2425 = vmatpush.bf16.msra.mxu0 %v3965_v29 }
  0x16   :  { %v5806_v30 = vld [vmem:[%s8834_s1 + $0x55c] sm:$0xf0] }
  0x17   :  { %v4732_v31 = vld [vmem:[%s8834_s1 + $0x740] sm:$0xf]  ;;  %v4477_v34 = vor.u32 %v5806_v30, %v4476_v28  ;;  %2438 = vmatpush.bf16.msra.mxu1 %v4221_v33 }
  0x18   :  { %v5870_v32 = vld [vmem:[%s8834_s1 + $0x75c] sm:$0xf0] }
  0x19   :  { %v3932_v35 = vld [vmem:[%s8834_s1 + $0x100] sm:$0xf]  ;;  %v4733_v38 = vor.u32 %v5870_v32, %v4732_v31  ;;  %2451 = vmatpush.bf16.msra.mxu2 %v4477_v34  ;;  %v5690_v34 = vld [vmem:[%s8834_s1 + $0x1c4] sm:$0xf] }
  0x1a   :  { %v5670_v36 = vld [vmem:[%s8834_s1 + $0x11c] sm:$0xf0] }
  0x1b   :  { %v4188_v37 = vld [vmem:[%s8834_s1 + $0x300] sm:$0xf]  ;;  %v3933_v44 = vor.u32 %v5670_v36, %v3932_v35  ;;  %2464 = vmatpush.bf16.msra.mxu3 %v4733_v38  ;;  %v4030_v35 = vld [vmem:[%s8834_s1 + $0x1e0] sm:$0xf0]  ;;  %v441_v36 = vunpack.c.l.b16 %v22_v25 }
  0x1c   :  { %v5734_v39 = vld [vmem:[%s8834_s1 + $0x31c] sm:$0xf0] }
  0x1d   :  { %v4444_v40 = vld [vmem:[%s8834_s1 + $0x500] sm:$0xf]  ;;  %v4189_v45 = vor.u32 %v5734_v39, %v4188_v37  ;;  %2426 = vmatpush.bf16.msra.mxu0 %v3933_v44 }
  0x1e   :  { %v5798_v41 = vld [vmem:[%s8834_s1 + $0x51c] sm:$0xf0] }
  0x1f   :  { %v4700_v42 = vld [vmem:[%s8834_s1 + $0x700] sm:$0xf]  ;;  %v4445_v46 = vor.u32 %v5798_v41, %v4444_v40  ;;  %2439 = vmatpush.bf16.msra.mxu1 %v4189_v45 }
  0x20   :  { %v5862_v43 = vld [vmem:[%s8834_s1 + $0x71c] sm:$0xf0] }
  0x21   :  { %v3900_v47 = vld [vmem:[%s8834_s1 + $0xc0] sm:$0xf]  ;;  %v4701_v50 = vor.u32 %v5862_v43, %v4700_v42  ;;  %2452 = vmatpush.bf16.msra.mxu2 %v4445_v46  ;;  %v442_v42 = vunpack.c.h.b16 %v22_v25  ;;  %v5754_v46 = vld [vmem:[%s8834_s1 + $0x3c4] sm:$0xf] }
  0x22   :  { %v5662_v48 = vld [vmem:[%s8834_s1 + $0xdc] sm:$0xf0]  ;;  %v5730_v25 = vld [vmem:[%s8834_s1 + $0x304] sm:$0xf] }
  0x23   :  { %v4156_v49 = vld [vmem:[%s8834_s1 + $0x2c0] sm:$0xf]  ;;  %v3901_v56 = vor.u32 %v5662_v48, %v3900_v47  ;;  %2465 = vmatpush.bf16.msra.mxu3 %v4701_v50  ;;  %v4286_v47 = vld [vmem:[%s8834_s1 + $0x3e0] sm:$0xf0] }
  0x24   :  { %v5726_v51 = vld [vmem:[%s8834_s1 + $0x2dc] sm:$0xf0] }
  0x25   :  { %v4412_v52 = vld [vmem:[%s8834_s1 + $0x4c0] sm:$0xf]  ;;  %v4157_v57 = vor.u32 %v5726_v51, %v4156_v49  ;;  %2427 = vmatpush.bf16.msra.mxu0 %v3901_v56  ;;  %v4033_v49 = vor.u32 %v5690_v34, %v4030_v35  ;;  %v3998_v56 = vld [vmem:[%s8834_s1 + $0x1a0] sm:$0xf0] }
  0x26   :  { %v5790_v53 = vld [vmem:[%s8834_s1 + $0x4dc] sm:$0xf0]  ;;  %v3902_v34 = vld [vmem:[%s8834_s1 + $0xe0] sm:$0xf0] }
  0x27   :  { %v4668_v54 = vld [vmem:[%s8834_s1 + $0x6c0] sm:$0xf]  ;;  %v4413_v58 = vor.u32 %v5790_v53, %v4412_v52  ;;  %2440 = vmatpush.bf16.msra.mxu1 %v4157_v57  ;;  %v6364_v53 = vpack.c.b16 %v441_v36, %v441_v36 }
  0x28   :  { %v5854_v55 = vld [vmem:[%s8834_s1 + $0x6dc] sm:$0xf0] }
  0x29   :  { %v3868_v59 = vld [vmem:[%s8834_s1 + $0x80] sm:$0xf]  ;;  %v4669_v62 = vor.u32 %v5854_v55, %v4668_v54  ;;  %2453 = vmatpush.bf16.msra.mxu2 %v4413_v58  ;;  %v5682_v55 = vld [vmem:[%s8834_s1 + $0x184] sm:$0xf] }
  0x2a   :  { %v5654_v60 = vld [vmem:[%s8834_s1 + $0x9c] sm:$0xf0] }
  0x2b   :  { %v4124_v61 = vld [vmem:[%s8834_s1 + $0x280] sm:$0xf]  ;;  %v3869_v4 = vor.u32 %v5654_v60, %v3868_v59  ;;  %2466 = vmatpush.bf16.msra.mxu3 %v4669_v62  ;;  %v6377_v60 = vpack.c.b16 %v442_v42, %v442_v42 }
  0x2c   :  { %v5718_v63 = vld [vmem:[%s8834_s1 + $0x29c] sm:$0xf0] }
  0x2d   :  { %v4380_v0 = vld [vmem:[%s8834_s1 + $0x480] sm:$0xf]  ;;  %v4125_v5 = vor.u32 %v5718_v63, %v4124_v61  ;;  %2428 = vmatpush.bf16.msra.mxu0 %v3869_v4  ;;  %v4289_v61 = vor.u32 %v5754_v46, %v4286_v47  ;;  %v5746_v63 = vld [vmem:[%s8834_s1 + $0x384] sm:$0xf] }
  0x2e   :  { %v5782_v1 = vld [vmem:[%s8834_s1 + $0x49c] sm:$0xf0]  ;;  %v5650_v46 = vld [vmem:[%s8834_s1 + $0x84] sm:$0xf] }
  0x2f   :  { %v4636_v2 = vld [vmem:[%s8834_s1 + $0x680] sm:$0xf]  ;;  %v4381_v6 = vor.u32 %v5782_v1, %v4380_v0  ;;  %2441 = vmatpush.bf16.msra.mxu1 %v4125_v5  ;;  %v4254_v0 = vld [vmem:[%s8834_s1 + $0x3a0] sm:$0xf0] }
  0x30   :  { %v5846_v3 = vld [vmem:[%s8834_s1 + $0x69c] sm:$0xf0]  ;;  %v3870_v47 = vld [vmem:[%s8834_s1 + $0xa0] sm:$0xf0] }
  0x31   :  { %v3836_v7 = vld [vmem:[%s8834_s1 + $0x40] sm:$0xf]  ;;  %v4637_v10 = vor.u32 %v5846_v3, %v4636_v2  ;;  %2454 = vmatpush.bf16.msra.mxu2 %v4381_v6  ;;  %v4001_v2 = vor.u32 %v5682_v55, %v3998_v56  ;;  %v3873_v55 = vor.u32 %v5650_v46, %v3870_v47  ;;  %v5278_v46 = vld [vmem:[%s8834_s1 + $0xba0] sm:$0xf0] }
  0x32   :  { %v5646_v8 = vld [vmem:[%s8834_s1 + $0x5c] sm:$0xf0]  ;;  %v5802_v47 = vld [vmem:[%s8834_s1 + $0x544] sm:$0xf] }
  0x33   :  { %v4092_v9 = vld [vmem:[%s8834_s1 + $0x240] sm:$0xf]  ;;  %v3837_v17 = vor.u32 %v5646_v8, %v3836_v7  ;;  %2467 = vmatpush.bf16.msra.mxu3 %v4637_v10  ;;  %v5674_v7 = vld [vmem:[%s8834_s1 + $0x144] sm:$0xf]  ;;  %v4257_v10 = vor.u32 %v5746_v63, %v4254_v0 }
  0x34   :  { %v5710_v11 = vld [vmem:[%s8834_s1 + $0x25c] sm:$0xf0]  ;;  %v3966_v8 = vld [vmem:[%s8834_s1 + $0x160] sm:$0xf0] }
  0x35   :  { %v4348_v12 = vld [vmem:[%s8834_s1 + $0x440] sm:$0xf]  ;;  %v4093_v21 = vor.u32 %v5710_v11, %v4092_v9  ;;  %2429 = vmatpush.bf16.msra.mxu0 %v3837_v17  ;;  %v3838_v63 = vld [vmem:[%s8834_s1 + $0x60] sm:$0xf0] }
  0x36   :  { %v5774_v13 = vld [vmem:[%s8834_s1 + $0x45c] sm:$0xf0]  ;;  %v5706_v0 = vld [vmem:[%s8834_s1 + $0x244] sm:$0xf] }
  0x37   :  { %v4604_v14 = vld [vmem:[%s8834_s1 + $0x640] sm:$0xf]  ;;  %v4349_v22 = vor.u32 %v5774_v13, %v4348_v12  ;;  %2442 = vmatpush.bf16.msra.mxu1 %v4093_v21  ;;  %v5738_v12 = vld [vmem:[%s8834_s1 + $0x344] sm:$0xf] }
  0x38   :  { %v5838_v15 = vld [vmem:[%s8834_s1 + $0x65c] sm:$0xf0]  ;;  %v4222_v13 = vld [vmem:[%s8834_s1 + $0x360] sm:$0xf0] }
  0x39   :  { %v3804_v16 = vld [vmem:[%s8834_s1] sm:$0xf]  ;;  %v4605_v26 = vor.u32 %v5838_v15, %v4604_v14  ;;  %2455 = vmatpush.bf16.msra.mxu2 %v4349_v22  ;;  %v3969_v15 = vor.u32 %v5674_v7, %v3966_v8  ;;  %v3934_v21 = vld [vmem:[%s8834_s1 + $0x120] sm:$0xf0]  ;;  %v24_v22 = vld [vmem:[%s8835_s0 + $0x18] sm:$0xf] }
  0x3a   :  { %v5638_v18 = vld [vmem:[%s8834_s1 + $0x1c] sm:$0xf0]  ;;  %v445_v35 = vunpack.c.l.b16 %v24_v22  ;;  %v5054_v22 = vld [vmem:[%s8834_s1 + $0x9e0] sm:$0xf0] }
  0x3b   :  { %v4060_v19 = vld [vmem:[%s8834_s1 + $0x200] sm:$0xf]  ;;  %v3805_v33 = vor.u32 %v5638_v18, %v3804_v16  ;;  %2468 = vmatpush.bf16.msra.mxu3 %v4605_v26  ;;  %v4190_v26 = vld [vmem:[%s8834_s1 + $0x320] sm:$0xf0] }
  0x3c   :  { %v5702_v20 = vld [vmem:[%s8834_s1 + $0x21c] sm:$0xf0]  ;;  %v4193_v36 = vor.u32 %v5730_v25, %v4190_v26  ;;  %v5698_v26 = vld [vmem:[%s8834_s1 + $0x204] sm:$0xf] }
  0x3d   :  { %v4316_v23 = vld [vmem:[%s8834_s1 + $0x400] sm:$0xf]  ;;  %v4061_v38 = vor.u32 %v5702_v20, %v4060_v19  ;;  %2430 = vmatpush.bf16.msra.mxu0 %v3805_v33  ;;  %v5666_v20 = vld [vmem:[%s8834_s1 + $0x104] sm:$0xf] }
  0x3e   :  { %v5766_v24 = vld [vmem:[%s8834_s1 + $0x41c] sm:$0xf0]  ;;  %v5658_v33 = vld [vmem:[%s8834_s1 + $0xc4] sm:$0xf] }
  0x3f   :  { %v4572_v27 = vld [vmem:[%s8834_s1 + $0x600] sm:$0xf]  ;;  %v4317_v39 = vor.u32 %v5766_v24, %v4316_v23  ;;  %2443 = vmatpush.bf16.msra.mxu1 %v4061_v38  ;;  %v4225_v23 = vor.u32 %v5738_v12, %v4222_v13  ;;  %v5722_v38 = vld [vmem:[%s8834_s1 + $0x2c4] sm:$0xf] }
  0x40   :  { %v5830_v28 = vld [vmem:[%s8834_s1 + $0x61c] sm:$0xf0]  ;;  %v5634_v12 = vld [vmem:[%s8834_s1 + $0x4] sm:$0xf] }
  0x41   :  { %v5052_v29 = vld [vmem:[%s8834_s1 + $0x9c0] sm:$0xf]  ;;  %v4573_v43 = vor.u32 %v5830_v28, %v4572_v27  ;;  %2456 = vmatpush.bf16.msra.mxu2 %v4317_v39  ;;  %v3937_v28 = vor.u32 %v5666_v20, %v3934_v21  ;;  %v4158_v39 = vld [vmem:[%s8834_s1 + $0x2e0] sm:$0xf0] }
  0x42   :  { %v5950_v30 = vld [vmem:[%s8834_s1 + $0x9dc] sm:$0xf0]  ;;  %v3806_v13 = vld [vmem:[%s8834_s1 + $0x20] sm:$0xf0] }
  0x43   :  { %v5308_v31 = vld [vmem:[%s8834_s1 + $0xbc0] sm:$0xf]  ;;  %v5053_v44 = vor.u32 %v5950_v30, %v5052_v29  ;;  %2469 = vmatpush.bf16.msra.mxu3 %v4573_v43  ;;  %v5946_v21 = vld [vmem:[%s8834_s1 + $0x9c4] sm:$0xf]  ;;  %v3809_v25 = vor.u32 %v5634_v12, %v3806_v13 }
  0x44   :  { %v6014_v32 = vld [vmem:[%s8834_s1 + $0xbdc] sm:$0xf0]  ;;  %2457 = vmatmul.bf16.vlgmr.msra.gmra.mxu2 %v6364_v53  ;;  %v5786_v12 = vld [vmem:[%s8834_s1 + $0x4c4] sm:$0xf] }
  0x45   :  { %v21_v37 = vld [vmem:[%s8835_s0] sm:$0xff]  ;;  %v5309_v48 = vor.u32 %v6014_v32, %v5308_v31  ;;  %2475 = vmatpush.bf16.msrb.mxu0 %v5053_v44 }
  0x46   :  { %v5340_v40 = vld [vmem:[%s8834_s1 + $0xc00] sm:$0xf]  ;;  %v439_v41 = vunpack.c.l.b16 %v21_v37  ;;  %v440_v58 = vunpack.c.h.b16 %v21_v37  ;;  %2470 = vmatmul.bf16.vlgmr.msra.gmra.mxu3 %v6377_v60 }
  0x47   :  { %v6022_v45 = vld [vmem:[%s8834_s1 + $0xc1c] sm:$0xf0]  ;;  %2488 = vmatpush.bf16.msrb.mxu1 %v5309_v48  ;;  %2514 = vmatpush.bf16.msrb.mxu3 %v4033_v49  ;;  %v6484_v48 = vpack.c.b16 %v445_v35, %v445_v35  ;;  %v4161_v49 = vor.u32 %v5722_v38, %v4158_v39  ;;  %v4510_v35 = vld [vmem:[%s8834_s1 + $0x5a0] sm:$0xf0] }
  0x48   :  { %v5020_v50 = vld [vmem:[%s8834_s1 + $0x980] sm:$0xf]  ;;  %v6375_v57 = vpack.c.b16 %v439_v41, %v439_v41  ;;  %v5341_v59 = vor.u32 %v6022_v45, %v5340_v40  ;;  %v6405_v9 = vpack.c.b16 %v440_v58, %v440_v58  ;;  %v3905_v41 = vor.u32 %v5658_v33, %v3902_v34 }
  0x49   :  { %v5942_v51 = vld [vmem:[%s8834_s1 + $0x99c] sm:$0xf0]  ;;  %v5057_v33 = vor.u32 %v5946_v21, %v5054_v22  ;;  %v5978_v22 = vld [vmem:[%s8834_s1 + $0xac4] sm:$0xf] }
  0x4a   :  { %v5276_v52 = vld [vmem:[%s8834_s1 + $0xb80] sm:$0xf]  ;;  %v5021_v62 = vor.u32 %v5942_v51, %v5020_v50  ;;  %2431 = vmatmul.bf16.vlgmr.msra.gmra.mxu0 %v6375_v57  ;;  %2508 = vmatpush.bf16.msrb.mxu2 %v5341_v59  ;;  %v5714_v51 = vld [vmem:[%s8834_s1 + $0x284] sm:$0xf] }
  0x4b   :  { %v6006_v54 = vld [vmem:[%s8834_s1 + $0xb9c] sm:$0xf0]  ;;  %2515 = vmatpush.bf16.msrb.mxu3 %v4001_v2  ;;  %2444 = vmatmul.bf16.vlgmr.msra.gmra.mxu1 %v6405_v9 }
  0x4c   :  { %v5277_v1 = vor.u32 %v6006_v54, %v5276_v52  ;;  %v4988_v3 = vld [vmem:[%s8834_s1 + $0x940] sm:$0xf]  ;;  %2476 = vmatpush.bf16.msrb.mxu0 %v5021_v62  ;;  %v4126_v52 = vld [vmem:[%s8834_s1 + $0x2a0] sm:$0xf0] }
  0x4d   :  { %v5934_v4 = vld [vmem:[%s8834_s1 + $0x95c] sm:$0xf0]  ;;  %v5642_v62 = vld [vmem:[%s8834_s1 + $0x44] sm:$0xf] }
  0x4e   :  { %v5244_v5 = vld [vmem:[%s8834_s1 + $0xb40] sm:$0xf]  ;;  %2527 = vmatpush.bf16.msra.mxu2 %v4289_v61  ;;  %v4989_v11 = vor.u32 %v5934_v4, %v4988_v3  ;;  %2489 = vmatpush.bf16.msrb.mxu1 %v5277_v1  ;;  %v4129_v1 = vor.u32 %v5714_v51, %v4126_v52  ;;  %v4094_v3 = vld [vmem:[%s8834_s1 + $0x260] sm:$0xf0]  ;;  %v3841_v7 = vor.u32 %v5642_v62, %v3838_v63 }
  0x4f   :  { %v5998_v6 = vld [vmem:[%s8834_s1 + $0xb5c] sm:$0xf0]  ;;  %2516 = vmatpush.bf16.msrb.mxu3 %v3969_v15  ;;  %v4542_v15 = vld [vmem:[%s8834_s1 + $0x5e0] sm:$0xf0] }
  0x50   :  { %v5245_v14 = vor.u32 %v5998_v6, %v5244_v5  ;;  %v4956_v16 = vld [vmem:[%s8834_s1 + $0x900] sm:$0xf]  ;;  %2477 = vmatpush.bf16.msrb.mxu0 %v4989_v11  ;;  %v23_v5 = vld [vmem:[%s8835_s0 + $0x10] sm:$0xff]  ;;  %v5866_v51 = vld [vmem:[%s8834_s1 + $0x744] sm:$0xf] }
  0x51   :  { %v5926_v17 = vld [vmem:[%s8834_s1 + $0x91c] sm:$0xf0]  ;;  %v4734_v52 = vld [vmem:[%s8834_s1 + $0x760] sm:$0xf0] }
  0x52   :  { %v5212_v18 = vld [vmem:[%s8834_s1 + $0xb00] sm:$0xf]  ;;  %2528 = vmatpush.bf16.msra.mxu2 %v4257_v10  ;;  %v4957_v24 = vor.u32 %v5926_v17, %v4956_v16  ;;  %2490 = vmatpush.bf16.msrb.mxu1 %v5245_v14  ;;  %v5818_v14 = vld [vmem:[%s8834_s1 + $0x5c4] sm:$0xf] }
  0x53   :  { %v5990_v19 = vld [vmem:[%s8834_s1 + $0xb1c] sm:$0xf0]  ;;  %2517 = vmatpush.bf16.msrb.mxu3 %v3937_v28  ;;  %v5882_v16 = vld [vmem:[%s8834_s1 + $0x7c4] sm:$0xf]  ;;  %v4545_v28 = vor.u32 %v5818_v14, %v4542_v15 }
  0x54   :  { %v5213_v27 = vor.u32 %v5990_v19, %v5212_v18  ;;  %v4924_v29 = vld [vmem:[%s8834_s1 + $0x8c0] sm:$0xf]  ;;  %2478 = vmatpush.bf16.msrb.mxu0 %v4957_v24  ;;  %5370 = vmatmul.msk.bf16.vlgmr.msrb.gmra.mxu2 %vm2419_vm0, %v6484_v48  ;;  %v4798_v17 = vld [vmem:[%s8834_s1 + $0x7e0] sm:$0xf0]  ;;  %v443_v18 = vunpack.c.l.b16 %v23_v5  ;;  %v4097_v19 = vor.u32 %v5706_v0, %v4094_v3 }
  0x55   :  { %v5918_v30 = vld [vmem:[%s8834_s1 + $0x8dc] sm:$0xf0]  ;;  %v5246_v62 = vld [vmem:[%s8834_s1 + $0xb60] sm:$0xf0] }
  0x56   :  { %v5180_v31 = vld [vmem:[%s8834_s1 + $0xac0] sm:$0xf]  ;;  %2529 = vmatpush.bf16.msra.mxu2 %v4225_v23  ;;  %v4925_v37 = vor.u32 %v5918_v30, %v4924_v29  ;;  %2491 = vmatpush.bf16.msrb.mxu1 %v5213_v27  ;;  %v444_v23 = vunpack.c.h.b16 %v23_v5  ;;  %v4062_v27 = vld [vmem:[%s8834_s1 + $0x220] sm:$0xf0]  ;;  %v4801_v29 = vor.u32 %v5882_v16, %v4798_v17  ;;  %v6572_v34 = vpack.c.b16 %v443_v18, %v443_v18 }
  0x57   :  { %v5982_v32 = vld [vmem:[%s8834_s1 + $0xadc] sm:$0xf0]  ;;  %2518 = vmatpush.bf16.msrb.mxu3 %v3905_v41  ;;  %v6010_v30 = vld [vmem:[%s8834_s1 + $0xbc4] sm:$0xf]  ;;  %v4065_v38 = vor.u32 %v5698_v26, %v4062_v27 }
  0x58   :  { %v5181_v40 = vor.u32 %v5982_v32, %v5180_v31  ;;  %v4892_v42 = vld [vmem:[%s8834_s1 + $0x880] sm:$0xf]  ;;  %2479 = vmatpush.bf16.msrb.mxu0 %v4925_v37  ;;  %v5310_v31 = vld [vmem:[%s8834_s1 + $0xbe0] sm:$0xf0]  ;;  %v6583_v39 = vpack.c.b16 %v444_v23, %v444_v23 }
  0x59   :  { %v5910_v43 = vld [vmem:[%s8834_s1 + $0x89c] sm:$0xf0]  ;;  %v5810_v32 = vld [vmem:[%s8834_s1 + $0x584] sm:$0xf] }
  0x5a   :  { %v5148_v44 = vld [vmem:[%s8834_s1 + $0xa80] sm:$0xf]  ;;  %2530 = vmatpush.bf16.msra.mxu2 %v4193_v36  ;;  %v4893_v50 = vor.u32 %v5910_v43, %v4892_v42  ;;  %2492 = vmatpush.bf16.msrb.mxu1 %v5181_v40  ;;  %v5874_v36 = vld [vmem:[%s8834_s1 + $0x784] sm:$0xf]  ;;  %v5313_v42 = vor.u32 %v6010_v30, %v5310_v31  ;;  %v4513_v43 = vor.u32 %v5810_v32, %v4510_v35 }
  0x5b   :  { %v5974_v45 = vld [vmem:[%s8834_s1 + $0xa9c] sm:$0xf0]  ;;  %2519 = vmatpush.bf16.msrb.mxu3 %v3873_v55  ;;  %v4766_v37 = vld [vmem:[%s8834_s1 + $0x7a0] sm:$0xf0] }
  0x5c   :  { %v5149_v54 = vor.u32 %v5974_v45, %v5148_v44  ;;  %v4860_v56 = vld [vmem:[%s8834_s1 + $0x840] sm:$0xf]  ;;  %2480 = vmatpush.bf16.msrb.mxu0 %v4893_v50  ;;  %v5938_v40 = vld [vmem:[%s8834_s1 + $0x984] sm:$0xf]  ;;  %v4769_v44 = vor.u32 %v5874_v36, %v4766_v37 }
  0x5d   :  { %v5902_v58 = vld [vmem:[%s8834_s1 + $0x85c] sm:$0xf0]  ;;  %v5022_v41 = vld [vmem:[%s8834_s1 + $0x9a0] sm:$0xf0] }
  0x5e   :  { %v5116_v59 = vld [vmem:[%s8834_s1 + $0xa40] sm:$0xf]  ;;  %2531 = vmatpush.bf16.msra.mxu2 %v4161_v49  ;;  %v4861_v2 = vor.u32 %v5902_v58, %v4860_v56  ;;  %2493 = vmatpush.bf16.msrb.mxu1 %v5149_v54  ;;  %v6002_v45 = vld [vmem:[%s8834_s1 + $0xb84] sm:$0xf]  ;;  %v5025_v49 = vor.u32 %v5938_v40, %v5022_v41 }
  0x5f   :  { %v5966_v61 = vld [vmem:[%s8834_s1 + $0xa5c] sm:$0xf0]  ;;  %2520 = vmatpush.bf16.msrb.mxu3 %v3841_v7  ;;  %v4478_v50 = vld [vmem:[%s8834_s1 + $0x560] sm:$0xf0]  ;;  %v5281_v56 = vor.u32 %v6002_v45, %v5278_v46 }
  0x60   :  { %v4828_v4 = vld [vmem:[%s8834_s1 + $0x800] sm:$0xf]  ;;  %v5117_v6 = vor.u32 %v5966_v61, %v5116_v59  ;;  %2481 = vmatpush.bf16.msrb.mxu0 %v4861_v2  ;;  %v5930_v54 = vld [vmem:[%s8834_s1 + $0x944] sm:$0xf]  ;;  %v4481_v58 = vor.u32 %v5802_v47, %v4478_v50  ;;  %v4737_v59 = vor.u32 %v5866_v51, %v4734_v52 }
  0x61   :  { %v5894_v8 = vld [vmem:[%s8834_s1 + $0x81c] sm:$0xf0]  ;;  %v4990_v55 = vld [vmem:[%s8834_s1 + $0x960] sm:$0xf0] }
  0x62   :  { %v5084_v10 = vld [vmem:[%s8834_s1 + $0xa00] sm:$0xf]  ;;  %2532 = vmatpush.bf16.msra.mxu2 %v4129_v1  ;;  %v4829_v20 = vor.u32 %v5894_v8, %v4828_v4  ;;  %2494 = vmatpush.bf16.msrb.mxu1 %v5117_v6  ;;  %v5994_v61 = vld [vmem:[%s8834_s1 + $0xb44] sm:$0xf]  ;;  %v4993_v0 = vor.u32 %v5930_v54, %v4990_v55 }
  0x63   :  { %v5958_v11 = vld [vmem:[%s8834_s1 + $0xa1c] sm:$0xf0]  ;;  %2521 = vmatpush.bf16.msrb.mxu3 %v3809_v25  ;;  %v5794_v63 = vld [vmem:[%s8834_s1 + $0x504] sm:$0xf]  ;;  %v5249_v6 = vor.u32 %v5994_v61, %v5246_v62  ;;  %v4036_v61 = vld [vmem:[%s8834_s1 + $0x1c8] sm:$0xf] }
  0x64   :  { %v5085_v24 = vor.u32 %v5958_v11, %v5084_v10  ;;  %2482 = vmatpush.bf16.msrb.mxu0 %v4829_v20  ;;  %v4446_v1 = vld [vmem:[%s8834_s1 + $0x520] sm:$0xf0]  ;;  %v5695_v62 = vld [vmem:[%s8834_s1 + $0x1e4] sm:$0xf0] }
  0x65   :  { %v5858_v2 = vld [vmem:[%s8834_s1 + $0x704] sm:$0xf]  ;;  %v4449_v7 = vor.u32 %v5794_v63, %v4446_v1  ;;  %v4548_v63 = vld [vmem:[%s8834_s1 + $0x5c8] sm:$0xf] }
  0x66   :  { %2533 = vmatpush.bf16.msra.mxu2 %v4097_v19  ;;  %2495 = vmatpush.bf16.msrb.mxu1 %v5085_v24  ;;  %v4702_v3 = vld [vmem:[%s8834_s1 + $0x720] sm:$0xf0]  ;;  %v5823_v1 = vld [vmem:[%s8834_s1 + $0x5e4] sm:$0xf0] }
  0x67   :  { %2566 = vmatpush.bf16.msra.mxu3 %v5057_v33  ;;  %2483 = vmatmul.bf16.vlgmr.msrb.gmra.mxu0 %v6572_v34  ;;  %v5922_v4 = vld [vmem:[%s8834_s1 + $0x904] sm:$0xf]  ;;  %v4705_v8 = vor.u32 %v5858_v2, %v4702_v3 }
  0x68   :  { %2540 = vmatpush.bf16.msra.mxu0 %v4545_v28  ;;  %2522 = vmatmul.bf16.vlgmr.msrb.gmra.mxu3 %v6375_v57  ;;  %v4958_v5 = vld [vmem:[%s8834_s1 + $0x920] sm:$0xf0] }
  0x69   :  { %2496 = vmatmul.bf16.vlgmr.msrb.gmra.mxu1 %v6583_v39  ;;  %v5986_v10 = vld [vmem:[%s8834_s1 + $0xb04] sm:$0xf]  ;;  %v4961_v13 = vor.u32 %v5922_v4, %v4958_v5 }
  0x6a   :  { %2553 = vmatpush.bf16.msra.mxu1 %v4801_v29  ;;  %2534 = vmatpush.bf16.msra.mxu2 %v4065_v38  ;;  %v5214_v11 = vld [vmem:[%s8834_s1 + $0xb20] sm:$0xf0] }
  0x6b   :  { %2567 = vmatpush.bf16.msra.mxu3 %v5025_v49  ;;  %v4414_v14 = vld [vmem:[%s8834_s1 + $0x4e0] sm:$0xf0]  ;;  %v5217_v19 = vor.u32 %v5986_v10, %v5214_v11  ;;  %v4037_v10 = vor.u32 %v5695_v62, %v4036_v61  ;;  %v4804_v11 = vld [vmem:[%s8834_s1 + $0x7c8] sm:$0xf] }
  0x6c   :  { %2541 = vmatpush.bf16.msra.mxu0 %v4513_v43  ;;  %v5850_v15 = vld [vmem:[%s8834_s1 + $0x6c4] sm:$0xf]  ;;  %v4417_v20 = vor.u32 %v5786_v12, %v4414_v14  ;;  %v5887_v12 = vld [vmem:[%s8834_s1 + $0x7e4] sm:$0xf0] }
  0x6d   :  { %2535 = vmatmul.bf16.vlgmr.msra.gmra.mxu2 %v6405_v9  ;;  %v4670_v16 = vld [vmem:[%s8834_s1 + $0x6e0] sm:$0xf0]  ;;  %v5663_v61 = vld [vmem:[%s8834_s1 + $0xe4] sm:$0xf0] }
  0x6e   :  { %2579 = vmatpush.bf16.msrb.mxu2 %v5313_v42  ;;  %2554 = vmatpush.bf16.msra.mxu1 %v4769_v44  ;;  %v5914_v17 = vld [vmem:[%s8834_s1 + $0x8c4] sm:$0xf]  ;;  %v4673_v21 = vor.u32 %v5850_v15, %v4670_v16  ;;  %v4292_v15 = vld [vmem:[%s8834_s1 + $0x3c8] sm:$0xf] }
  0x6f   :  { %2568 = vmatpush.bf16.msra.mxu3 %v4993_v0  ;;  %v4926_v18 = vld [vmem:[%s8834_s1 + $0x8e0] sm:$0xf0]  ;;  %v5759_v16 = vld [vmem:[%s8834_s1 + $0x3e4] sm:$0xf0] }
  0x70   :  { %2542 = vmatpush.bf16.msra.mxu0 %v4481_v58  ;;  %v5182_v23 = vld [vmem:[%s8834_s1 + $0xae0] sm:$0xf0]  ;;  %v4929_v25 = vor.u32 %v5914_v17, %v4926_v18  ;;  %v4004_v17 = vld [vmem:[%s8834_s1 + $0x188] sm:$0xf] }
  0x71   :  { %v5778_v24 = vld [vmem:[%s8834_s1 + $0x484] sm:$0xf]  ;;  %v5185_v31 = vor.u32 %v5978_v22, %v5182_v23  ;;  %v4805_v22 = vor.u32 %v5887_v12, %v4804_v11  ;;  %v4293_v23 = vor.u32 %v5759_v16, %v4292_v15  ;;  %v4420_v62 = vld [vmem:[%s8834_s1 + $0x4c8] sm:$0xf] }
  0x72   :  { %2580 = vmatpush.bf16.msrb.mxu2 %v5281_v56  ;;  %2555 = vmatpush.bf16.msra.mxu1 %v4737_v59  ;;  %v4382_v26 = vld [vmem:[%s8834_s1 + $0x4a0] sm:$0xf0]  ;;  %v4388_v11 = vld [vmem:[%s8834_s1 + $0x488] sm:$0xf] }
  0x73   :  { %2569 = vmatpush.bf16.msra.mxu3 %v4961_v13  ;;  %v5842_v27 = vld [vmem:[%s8834_s1 + $0x684] sm:$0xf]  ;;  %v4385_v32 = vor.u32 %v5778_v24, %v4382_v26  ;;  %v4549_v13 = vor.u32 %v5823_v1, %v4548_v63  ;;  %v4772_v24 = vld [vmem:[%s8834_s1 + $0x788] sm:$0xf] }
  0x74   :  { %2543 = vmatpush.bf16.msra.mxu0 %v4449_v7  ;;  %v4638_v28 = vld [vmem:[%s8834_s1 + $0x6a0] sm:$0xf0]  ;;  %v5791_v63 = vld [vmem:[%s8834_s1 + $0x4e4] sm:$0xf0] }
  0x75   :  { %v5906_v29 = vld [vmem:[%s8834_s1 + $0x884] sm:$0xf]  ;;  %v4641_v33 = vor.u32 %v5842_v27, %v4638_v28  ;;  %v4260_v28 = vld [vmem:[%s8834_s1 + $0x388] sm:$0xf] }
  0x76   :  { %2581 = vmatpush.bf16.msrb.mxu2 %v5249_v6  ;;  %2556 = vmatpush.bf16.msra.mxu1 %v4705_v8  ;;  %v4894_v30 = vld [vmem:[%s8834_s1 + $0x8a0] sm:$0xf0]  ;;  %v5783_v12 = vld [vmem:[%s8834_s1 + $0x4a4] sm:$0xf0] }
  0x77   :  { %v5970_v35 = vld [vmem:[%s8834_s1 + $0xa84] sm:$0xf]  ;;  %2570 = vmatpush.bf16.msra.mxu3 %v4929_v25  ;;  %v4897_v38 = vor.u32 %v5906_v29, %v4894_v30  ;;  %v5879_v25 = vld [vmem:[%s8834_s1 + $0x7a4] sm:$0xf0] }
  0x78   :  { %2544 = vmatpush.bf16.msra.mxu0 %v4417_v20  ;;  %v5150_v36 = vld [vmem:[%s8834_s1 + $0xaa0] sm:$0xf0]  ;;  %v4516_v20 = vld [vmem:[%s8834_s1 + $0x588] sm:$0xf] }
  0x79   :  { %v5770_v37 = vld [vmem:[%s8834_s1 + $0x444] sm:$0xf]  ;;  %v5153_v45 = vor.u32 %v5970_v35, %v5150_v36  ;;  %v5751_v29 = vld [vmem:[%s8834_s1 + $0x3a4] sm:$0xf0]  ;;  %v4773_v35 = vor.u32 %v5879_v25, %v4772_v24 }
  0x7a   :  { %2582 = vmatpush.bf16.msrb.mxu2 %v5217_v19  ;;  %2557 = vmatpush.bf16.msra.mxu1 %v4673_v21  ;;  %v4350_v40 = vld [vmem:[%s8834_s1 + $0x460] sm:$0xf0]  ;;  %v5687_v19 = vld [vmem:[%s8834_s1 + $0x1a4] sm:$0xf0]  ;;  %v4261_v36 = vor.u32 %v5751_v29, %v4260_v28 }
  0x7b   :  { %v5834_v41 = vld [vmem:[%s8834_s1 + $0x644] sm:$0xf]  ;;  %v4353_v49 = vor.u32 %v5770_v37, %v4350_v40  ;;  %2571 = vmatpush.bf16.msra.mxu3 %v4897_v38  ;;  %v5815_v21 = vld [vmem:[%s8834_s1 + $0x5a4] sm:$0xf0]  ;;  %v4005_v26 = vor.u32 %v5687_v19, %v4004_v17 }
  0x7c   :  { %v4606_v42 = vld [vmem:[%s8834_s1 + $0x660] sm:$0xf0]  ;;  %2545 = vmatpush.bf16.msra.mxu0 %v4385_v32  ;;  %v4517_v27 = vor.u32 %v5815_v21, %v4516_v20  ;;  %v3972_v30 = vld [vmem:[%s8834_s1 + $0x148] sm:$0xf] }
  0x7d   :  { %v5898_v43 = vld [vmem:[%s8834_s1 + $0x844] sm:$0xf]  ;;  %v4609_v50 = vor.u32 %v5834_v41, %v4606_v42  ;;  %v4484_v32 = vld [vmem:[%s8834_s1 + $0x548] sm:$0xf] }
  0x7e   :  { %v4862_v44 = vld [vmem:[%s8834_s1 + $0x860] sm:$0xf0]  ;;  %2583 = vmatpush.bf16.msrb.mxu2 %v5185_v31  ;;  %2558 = vmatpush.bf16.msra.mxu1 %v4641_v33  ;;  %v5679_v31 = vld [vmem:[%s8834_s1 + $0x164] sm:$0xf0] }
  0x7f   :  { %v5962_v46 = vld [vmem:[%s8834_s1 + $0xa44] sm:$0xf]  ;;  %v4865_v55 = vor.u32 %v5898_v43, %v4862_v44  ;;  %v5807_v33 = vld [vmem:[%s8834_s1 + $0x564] sm:$0xf0]  ;;  %v3973_v40 = vor.u32 %v5679_v31, %v3972_v30 }
  0x80   :  { %v5118_v47 = vld [vmem:[%s8834_s1 + $0xa60] sm:$0xf0]  ;;  %2546 = vmatpush.bf16.msra.mxu0 %v4353_v49  ;;  %v4740_v37 = vld [vmem:[%s8834_s1 + $0x748] sm:$0xf]  ;;  %v4485_v41 = vor.u32 %v5807_v33, %v4484_v32 }
  0x81   :  { %v5762_v51 = vld [vmem:[%s8834_s1 + $0x404] sm:$0xf]  ;;  %v5121_v0 = vor.u32 %v5962_v46, %v5118_v47  ;;  %2572 = vmatpush.bf16.msra.mxu3 %v4865_v55  ;;  %v5871_v38 = vld [vmem:[%s8834_s1 + $0x764] sm:$0xf0] }
  0x82   :  { %v4318_v52 = vld [vmem:[%s8834_s1 + $0x420] sm:$0xf0]  ;;  %2584 = vmatpush.bf16.msrb.mxu2 %v5153_v45  ;;  %2559 = vmatpush.bf16.msra.mxu1 %v4609_v50  ;;  %v4228_v42 = vld [vmem:[%s8834_s1 + $0x348] sm:$0xf]  ;;  %v4741_v49 = vor.u32 %v5871_v38, %v4740_v37 }
  0x83   :  { %v5826_v54 = vld [vmem:[%s8834_s1 + $0x604] sm:$0xf]  ;;  %v4321_v4 = vor.u32 %v5762_v51, %v4318_v52  ;;  %v5743_v43 = vld [vmem:[%s8834_s1 + $0x364] sm:$0xf0] }
  0x84   :  { %v4574_v56 = vld [vmem:[%s8834_s1 + $0x620] sm:$0xf0]  ;;  %v3940_v44 = vld [vmem:[%s8834_s1 + $0x108] sm:$0xf]  ;;  %v4229_v50 = vor.u32 %v5743_v43, %v4228_v42 }
  0x85   :  { %v5890_v58 = vld [vmem:[%s8834_s1 + $0x804] sm:$0xf]  ;;  %v4577_v5 = vor.u32 %v5826_v54, %v4574_v56  ;;  %2547 = vmatpush.bf16.msra.mxu0 %v4321_v4  ;;  %v5671_v45 = vld [vmem:[%s8834_s1 + $0x124] sm:$0xf0] }
  0x86   :  { %v4830_v59 = vld [vmem:[%s8834_s1 + $0x820] sm:$0xf0]  ;;  %2585 = vmatpush.bf16.msrb.mxu2 %v5121_v0  ;;  %v4452_v46 = vld [vmem:[%s8834_s1 + $0x508] sm:$0xf]  ;;  %v3941_v54 = vor.u32 %v5671_v45, %v3940_v44 }
  0x87   :  { %v6018_v2 = vld [vmem:[%s8834_s1 + $0xc04] sm:$0xf]  ;;  %v4833_v8 = vor.u32 %v5890_v58, %v4830_v59  ;;  %2560 = vmatpush.bf16.msra.mxu1 %v4577_v5  ;;  %v5799_v47 = vld [vmem:[%s8834_s1 + $0x524] sm:$0xf0]  ;;  %v4421_v5 = vor.u32 %v5791_v63, %v4420_v62  ;;  %v4294_v63 = vld [vmem:[%s8834_s1 + $0x3e8] sm:$0xf0] }
  0x88   :  { %v5342_v3 = vld [vmem:[%s8834_s1 + $0xc20] sm:$0xf0]  ;;  %2548 = vmatmul.bf16.vlgmr.msra.gmra.mxu0 %v6364_v53  ;;  %v4708_v51 = vld [vmem:[%s8834_s1 + $0x708] sm:$0xf]  ;;  %v4453_v55 = vor.u32 %v5799_v47, %v4452_v46 }
  0x89   :  { %v5954_v6 = vld [vmem:[%s8834_s1 + $0xa04] sm:$0xf]  ;;  %v5345_v14 = vor.u32 %v6018_v2, %v5342_v3  ;;  %2573 = vmatpush.bf16.msra.mxu3 %v4833_v8  ;;  %2631 = vmatpush.bf16.msrb.mxu0 %v4549_v13  ;;  %v5863_v52 = vld [vmem:[%s8834_s1 + $0x724] sm:$0xf0] }
  0x8a   :  { %v5086_v7 = vld [vmem:[%s8834_s1 + $0xa20] sm:$0xf0]  ;;  %2561 = vmatmul.bf16.vlgmr.msra.gmra.mxu1 %v6377_v60  ;;  %v4196_v56 = vld [vmem:[%s8834_s1 + $0x308] sm:$0xf]  ;;  %v4709_v0 = vor.u32 %v5863_v52, %v4708_v51 }
  0x8b   :  { %v5089_v18 = vor.u32 %v5954_v6, %v5086_v7  ;;  %2605 = vmatpush.bf16.msrb.mxu1 %v4037_v10  ;;  %v5735_v58 = vld [vmem:[%s8834_s1 + $0x324] sm:$0xf0] }
  0x8c   :  { %2574 = vmatmul.bf16.vlgmr.msra.gmra.mxu3 %v6572_v34  ;;  %v3908_v59 = vld [vmem:[%s8834_s1 + $0xc8] sm:$0xf]  ;;  %v4197_v1 = vor.u32 %v5735_v58, %v4196_v56  ;;  %v5691_v58 = vld [vmem:[%s8834_s1 + $0x1cc] sm:$0xf] }
  0x8d   :  { %2599 = vmatpush.bf16.msrb.mxu3 %v5345_v14  ;;  %2586 = vmatpush.bf16.msrb.mxu2 %v5089_v18  ;;  %v4676_v2 = vld [vmem:[%s8834_s1 + $0x6c8] sm:$0xf]  ;;  %v3909_v4 = vor.u32 %v5663_v61, %v3908_v59  ;;  %v4389_v18 = vor.u32 %v5783_v12, %v4388_v11  ;;  %v4038_v59 = vld [vmem:[%s8834_s1 + $0x1e8] sm:$0xf0] }
  0x8e   :  { %2632 = vmatpush.bf16.msrb.mxu0 %v4517_v27  ;;  %v5855_v3 = vld [vmem:[%s8834_s1 + $0x6e4] sm:$0xf0]  ;;  %v5755_v61 = vld [vmem:[%s8834_s1 + $0x3cc] sm:$0xf] }
  0x8f   :  { %2606 = vmatpush.bf16.msrb.mxu1 %v4005_v26  ;;  %v4164_v6 = vld [vmem:[%s8834_s1 + $0x2c8] sm:$0xf]  ;;  %v4677_v13 = vor.u32 %v5855_v3, %v4676_v2  ;;  %v4006_v11 = vld [vmem:[%s8834_s1 + $0x1a8] sm:$0xf0] }
  0x90   :  { %2587 = vmatmul.bf16.vlgmr.msrb.gmra.mxu2 %v6583_v39  ;;  %v5727_v7 = vld [vmem:[%s8834_s1 + $0x2e4] sm:$0xf0]  ;;  %v5747_v12 = vld [vmem:[%s8834_s1 + $0x38c] sm:$0xf] }
  0x91   :  { %2644 = vmatpush.bf16.msra.mxu2 %v4805_v22  ;;  %2618 = vmatpush.bf16.msra.mxu3 %v4293_v23  ;;  %v3876_v8 = vld [vmem:[%s8834_s1 + $0x88] sm:$0xf]  ;;  %v4165_v14 = vor.u32 %v5727_v7, %v4164_v6  ;;  %v4297_v7 = vor.u32 %v5755_v61, %v4294_v63 }
  0x92   :  { %2633 = vmatpush.bf16.msrb.mxu0 %v4485_v41  ;;  %v5655_v10 = vld [vmem:[%s8834_s1 + $0xa4] sm:$0xf0] }
  0x93   :  { %2607 = vmatpush.bf16.msrb.mxu1 %v3973_v40  ;;  %v4644_v15 = vld [vmem:[%s8834_s1 + $0x688] sm:$0xf]  ;;  %v3877_v17 = vor.u32 %v5655_v10, %v3876_v8  ;;  %v5683_v10 = vld [vmem:[%s8834_s1 + $0x18c] sm:$0xf] }
  0x94   :  { %v5847_v16 = vld [vmem:[%s8834_s1 + $0x6a4] sm:$0xf0] }
  0x95   :  { %2645 = vmatpush.bf16.msra.mxu2 %v4773_v35  ;;  %2619 = vmatpush.bf16.msra.mxu3 %v4261_v36  ;;  %v4132_v19 = vld [vmem:[%s8834_s1 + $0x288] sm:$0xf]  ;;  %v4645_v25 = vor.u32 %v5847_v16, %v4644_v15 }
  0x96   :  { %2634 = vmatpush.bf16.msrb.mxu0 %v4453_v55  ;;  %v5719_v20 = vld [vmem:[%s8834_s1 + $0x2a4] sm:$0xf0] }
  0x97   :  { %2608 = vmatpush.bf16.msrb.mxu1 %v3941_v54  ;;  %v3844_v21 = vld [vmem:[%s8834_s1 + $0x48] sm:$0xf]  ;;  %v4133_v26 = vor.u32 %v5719_v20, %v4132_v19 }
  0x98   :  { %v5647_v22 = vld [vmem:[%s8834_s1 + $0x64] sm:$0xf0] }
  0x99   :  { %2646 = vmatpush.bf16.msra.mxu2 %v4741_v49  ;;  %2620 = vmatpush.bf16.msra.mxu3 %v4229_v50  ;;  %v4356_v23 = vld [vmem:[%s8834_s1 + $0x448] sm:$0xf]  ;;  %v3845_v30 = vor.u32 %v5647_v22, %v3844_v21  ;;  %v5675_v22 = vld [vmem:[%s8834_s1 + $0x14c] sm:$0xf] }
  0x9a   :  { %2635 = vmatpush.bf16.msrb.mxu0 %v4421_v5  ;;  %v5775_v24 = vld [vmem:[%s8834_s1 + $0x464] sm:$0xf0] }
  0x9b   :  { %2609 = vmatpush.bf16.msrb.mxu1 %v3909_v4  ;;  %v4100_v27 = vld [vmem:[%s8834_s1 + $0x248] sm:$0xf]  ;;  %v4357_v31 = vor.u32 %v5775_v24, %v4356_v23  ;;  %v4041_v4 = vor.u32 %v5691_v58, %v4038_v59  ;;  %v3974_v23 = vld [vmem:[%s8834_s1 + $0x168] sm:$0xf0] }
  0x9c   :  { %5371 = vmatmul.msk.bf16.vlgmr.msrb.gmra.mxu3 %vm2419_vm0, %v6484_v48  ;;  %v4612_v28 = vld [vmem:[%s8834_s1 + $0x648] sm:$0xf]  ;;  %v5739_v24 = vld [vmem:[%s8834_s1 + $0x34c] sm:$0xf] }
  0x9d   :  { %2647 = vmatpush.bf16.msra.mxu2 %v4709_v0  ;;  %2621 = vmatpush.bf16.msra.mxu3 %v4197_v1  ;;  %v5839_v29 = vld [vmem:[%s8834_s1 + $0x664] sm:$0xf0] }
  0x9e   :  { %2636 = vmatpush.bf16.msrb.mxu0 %v4389_v18  ;;  %v5711_v32 = vld [vmem:[%s8834_s1 + $0x264] sm:$0xf0]  ;;  %v4613_v40 = vor.u32 %v5839_v29, %v4612_v28  ;;  %v3977_v29 = vor.u32 %v5675_v22, %v3974_v23 }
  0x9f   :  { %2610 = vmatpush.bf16.msrb.mxu1 %v3877_v17  ;;  %v3812_v33 = vld [vmem:[%s8834_s1 + $0x8] sm:$0xf]  ;;  %v4101_v44 = vor.u32 %v5711_v32, %v4100_v27  ;;  %v4009_v17 = vor.u32 %v5683_v10, %v4006_v11 }
  0xa0   :  { %v5639_v35 = vld [vmem:[%s8834_s1 + $0x24] sm:$0xf0] }
  0xa1   :  { %2648 = vmatpush.bf16.msra.mxu2 %v4677_v13  ;;  %2622 = vmatpush.bf16.msra.mxu3 %v4165_v14  ;;  %v4324_v36 = vld [vmem:[%s8834_s1 + $0x408] sm:$0xf]  ;;  %v3813_v49 = vor.u32 %v5639_v35, %v3812_v33  ;;  %v4262_v13 = vld [vmem:[%s8834_s1 + $0x3a8] sm:$0xf0] }
  0xa2   :  { %v5767_v37 = vld [vmem:[%s8834_s1 + $0x424] sm:$0xf0]  ;;  %2637 = vmatpush.bf16.msrb.mxu0 %v4357_v31  ;;  %v4265_v20 = vor.u32 %v5747_v12, %v4262_v13  ;;  %v5667_v35 = vld [vmem:[%s8834_s1 + $0x10c] sm:$0xf] }
  0xa3   :  { %v5060_v38 = vld [vmem:[%s8834_s1 + $0x9c8] sm:$0xf]  ;;  %2611 = vmatpush.bf16.msrb.mxu1 %v3845_v30  ;;  %v4325_v50 = vor.u32 %v5767_v37, %v4324_v36  ;;  %v3942_v36 = vld [vmem:[%s8834_s1 + $0x128] sm:$0xf0] }
  0xa4   :  { %v5951_v41 = vld [vmem:[%s8834_s1 + $0x9e4] sm:$0xf0]  ;;  %v5731_v37 = vld [vmem:[%s8834_s1 + $0x30c] sm:$0xf] }
  0xa5   :  { %2649 = vmatpush.bf16.msra.mxu2 %v4645_v25  ;;  %v5348_v42 = vld [vmem:[%s8834_s1 + $0xc08] sm:$0xf]  ;;  %2623 = vmatpush.bf16.msra.mxu3 %v4133_v26  ;;  %v5061_v55 = vor.u32 %v5951_v41, %v5060_v38  ;;  %v4230_v25 = vld [vmem:[%s8834_s1 + $0x368] sm:$0xf0] }
  0xa6   :  { %v6023_v43 = vld [vmem:[%s8834_s1 + $0xc24] sm:$0xf0]  ;;  %2638 = vmatpush.bf16.msrb.mxu0 %v4325_v50  ;;  %v4233_v32 = vor.u32 %v5739_v24, %v4230_v25  ;;  %v4198_v38 = vld [vmem:[%s8834_s1 + $0x328] sm:$0xf0] }
  0xa7   :  { %v4068_v45 = vld [vmem:[%s8834_s1 + $0x208] sm:$0xf]  ;;  %v5349_v56 = vor.u32 %v6023_v43, %v5348_v42  ;;  %2612 = vmatpush.bf16.msrb.mxu1 %v3813_v49  ;;  %v3945_v43 = vor.u32 %v5667_v35, %v3942_v36  ;;  %v5659_v49 = vld [vmem:[%s8834_s1 + $0xcc] sm:$0xf] }
  0xa8   :  { %v4580_v46 = vld [vmem:[%s8834_s1 + $0x608] sm:$0xf]  ;;  %v3910_v50 = vld [vmem:[%s8834_s1 + $0xe8] sm:$0xf0] }
  0xa9   :  { %v5831_v47 = vld [vmem:[%s8834_s1 + $0x624] sm:$0xf0]  ;;  %2650 = vmatpush.bf16.msra.mxu2 %v4613_v40  ;;  %2624 = vmatpush.bf16.msra.mxu3 %v4101_v44  ;;  %v3913_v58 = vor.u32 %v5659_v49, %v3910_v50  ;;  %v5643_v13 = vld [vmem:[%s8834_s1 + $0x4c] sm:$0xf] }
  0xaa   :  { %v5703_v51 = vld [vmem:[%s8834_s1 + $0x224] sm:$0xf0]  ;;  %v4581_v62 = vor.u32 %v5831_v47, %v4580_v46  ;;  %2690 = vmatpush.bf16.msra.mxu0 %v5349_v56  ;;  %2613 = vmatmul.bf16.vlgmr.msrb.gmra.mxu1 %v6375_v57  ;;  %v4201_v46 = vor.u32 %v5731_v37, %v4198_v38  ;;  %v5947_v35 = vld [vmem:[%s8834_s1 + $0x9cc] sm:$0xf] }
  0xab   :  { %v5316_v52 = vld [vmem:[%s8834_s1 + $0xbc8] sm:$0xf]  ;;  %v4069_v2 = vor.u32 %v5703_v51, %v4068_v45  ;;  %2657 = vmatpush.bf16.msra.mxu1 %v5061_v55  ;;  %2639 = vmatmul.bf16.vlgmr.msrb.gmra.mxu0 %v6364_v53  ;;  %v5723_v51 = vld [vmem:[%s8834_s1 + $0x2cc] sm:$0xf] }
  0xac   :  { %v6015_v54 = vld [vmem:[%s8834_s1 + $0xbe4] sm:$0xf0]  ;;  %v5062_v36 = vld [vmem:[%s8834_s1 + $0x9e8] sm:$0xf0] }
  0xad   :  { %v5028_v0 = vld [vmem:[%s8834_s1 + $0x988] sm:$0xf]  ;;  %v5317_v3 = vor.u32 %v6015_v54, %v5316_v52  ;;  %2651 = vmatpush.bf16.msra.mxu2 %v4581_v62  ;;  %2625 = vmatpush.bf16.msra.mxu3 %v4069_v2  ;;  %v4166_v52 = vld [vmem:[%s8834_s1 + $0x2e8] sm:$0xf0] }
  0xae   :  { %v5943_v1 = vld [vmem:[%s8834_s1 + $0x9a4] sm:$0xf0]  ;;  %2709 = vmatpush.bf16.msrb.mxu0 %v4297_v7  ;;  %v4169_v62 = vor.u32 %v5723_v51, %v4166_v52  ;;  %v5715_v2 = vld [vmem:[%s8834_s1 + $0x28c] sm:$0xf] }
  0xaf   :  { %v5284_v5 = vld [vmem:[%s8834_s1 + $0xb88] sm:$0xf]  ;;  %v5029_v8 = vor.u32 %v5943_v1, %v5028_v0  ;;  %v5651_v0 = vld [vmem:[%s8834_s1 + $0x8c] sm:$0xf] }
  0xb0   :  { %v6007_v6 = vld [vmem:[%s8834_s1 + $0xba4] sm:$0xf0]  ;;  %2626 = vmatmul.bf16.vlgmr.msra.gmra.mxu3 %v6405_v9  ;;  %2652 = vmatmul.bf16.vlgmr.msra.gmra.mxu2 %v6377_v60  ;;  %v3878_v1 = vld [vmem:[%s8834_s1 + $0xa8] sm:$0xf0] }
  0xb1   :  { %v4996_v14 = vld [vmem:[%s8834_s1 + $0x948] sm:$0xf]  ;;  %2670 = vmatpush.bf16.msrb.mxu3 %v5317_v3  ;;  %2696 = vmatpush.bf16.msrb.mxu2 %v4041_v4  ;;  %v5285_v16 = vor.u32 %v6007_v6, %v5284_v5  ;;  %v4134_v3 = vld [vmem:[%s8834_s1 + $0x2a8] sm:$0xf0]  ;;  %v3881_v7 = vor.u32 %v5651_v0, %v3878_v1 }
  0xb2   :  { %v5935_v15 = vld [vmem:[%s8834_s1 + $0x964] sm:$0xf0]  ;;  %2658 = vmatpush.bf16.msra.mxu1 %v5029_v8  ;;  %2710 = vmatpush.bf16.msrb.mxu0 %v4265_v20  ;;  %v4137_v11 = vor.u32 %v5715_v2, %v4134_v3  ;;  %v4550_v20 = vld [vmem:[%s8834_s1 + $0x5e8] sm:$0xf0] }
  0xb3   :  { %v5252_v18 = vld [vmem:[%s8834_s1 + $0xb48] sm:$0xf]  ;;  %v4997_v21 = vor.u32 %v5935_v15, %v4996_v14  ;;  %v3846_v14 = vld [vmem:[%s8834_s1 + $0x68] sm:$0xf0] }
  0xb4   :  { %v5999_v19 = vld [vmem:[%s8834_s1 + $0xb64] sm:$0xf0]  ;;  %v5707_v15 = vld [vmem:[%s8834_s1 + $0x24c] sm:$0xf]  ;;  %v3849_v22 = vor.u32 %v5643_v13, %v3846_v14 }
  0xb5   :  { %v4964_v26 = vld [vmem:[%s8834_s1 + $0x908] sm:$0xf]  ;;  %2671 = vmatpush.bf16.msrb.mxu3 %v5285_v16  ;;  %2697 = vmatpush.bf16.msrb.mxu2 %v4009_v17  ;;  %v5253_v28 = vor.u32 %v5999_v19, %v5252_v18  ;;  %v4102_v16 = vld [vmem:[%s8834_s1 + $0x268] sm:$0xf0] }
  0xb6   :  { %v5927_v27 = vld [vmem:[%s8834_s1 + $0x924] sm:$0xf0]  ;;  %2659 = vmatpush.bf16.msra.mxu1 %v4997_v21  ;;  %2711 = vmatpush.bf16.msrb.mxu0 %v4233_v32  ;;  %v5819_v19 = vld [vmem:[%s8834_s1 + $0x5cc] sm:$0xf]  ;;  %v4105_v25 = vor.u32 %v5707_v15, %v4102_v16 }
  0xb7   :  { %v5220_v30 = vld [vmem:[%s8834_s1 + $0xb08] sm:$0xf]  ;;  %v4965_v33 = vor.u32 %v5927_v27, %v4964_v26  ;;  %v5635_v27 = vld [vmem:[%s8834_s1 + $0xc] sm:$0xf] }
  0xb8   :  { %v5991_v31 = vld [vmem:[%s8834_s1 + $0xb24] sm:$0xf0]  ;;  %v5883_v32 = vld [vmem:[%s8834_s1 + $0x7cc] sm:$0xf] }
  0xb9   :  { %v4932_v40 = vld [vmem:[%s8834_s1 + $0x8c8] sm:$0xf]  ;;  %2672 = vmatpush.bf16.msrb.mxu3 %v5253_v28  ;;  %2698 = vmatpush.bf16.msrb.mxu2 %v3977_v29  ;;  %v5221_v42 = vor.u32 %v5991_v31, %v5220_v30  ;;  %v3814_v28 = vld [vmem:[%s8834_s1 + $0x28] sm:$0xf0]  ;;  %v4553_v30 = vor.u32 %v5819_v19, %v4550_v20 }
  0xba   :  { %v5919_v41 = vld [vmem:[%s8834_s1 + $0x8e4] sm:$0xf0]  ;;  %2660 = vmatpush.bf16.msra.mxu1 %v4965_v33  ;;  %2712 = vmatpush.bf16.msrb.mxu0 %v4201_v46  ;;  %v5699_v29 = vld [vmem:[%s8834_s1 + $0x20c] sm:$0xf]  ;;  %v5065_v46 = vor.u32 %v5947_v35, %v5062_v36 }
  0xbb   :  { %v5188_v44 = vld [vmem:[%s8834_s1 + $0xac8] sm:$0xf]  ;;  %v4933_v47 = vor.u32 %v5919_v41, %v4932_v40  ;;  %5372 = vmatmul.msk.bf16.vlgmr.msra.gmra.mxu0 %vm2419_vm0, %v6484_v48  ;;  %v4070_v31 = vld [vmem:[%s8834_s1 + $0x228] sm:$0xf0] }
  0xbc   :  { %v5983_v45 = vld [vmem:[%s8834_s1 + $0xae4] sm:$0xf0]  ;;  %v4806_v33 = vld [vmem:[%s8834_s1 + $0x7e8] sm:$0xf0] }
  0xbd   :  { %v4900_v54 = vld [vmem:[%s8834_s1 + $0x888] sm:$0xf]  ;;  %2673 = vmatpush.bf16.msrb.mxu3 %v5221_v42  ;;  %2699 = vmatpush.bf16.msrb.mxu2 %v3945_v43  ;;  %v5189_v56 = vor.u32 %v5983_v45, %v5188_v44  ;;  %v6011_v37 = vld [vmem:[%s8834_s1 + $0xbcc] sm:$0xf]  ;;  %v3817_v43 = vor.u32 %v5635_v27, %v3814_v28  ;;  %v4073_v44 = vor.u32 %v5699_v29, %v4070_v31 }
  0xbe   :  { %v5911_v55 = vld [vmem:[%s8834_s1 + $0x8a4] sm:$0xf0]  ;;  %2661 = vmatpush.bf16.msra.mxu1 %v4933_v47  ;;  %2713 = vmatpush.bf16.msrb.mxu0 %v4169_v62  ;;  %v5318_v40 = vld [vmem:[%s8834_s1 + $0xbe8] sm:$0xf0]  ;;  %v4809_v45 = vor.u32 %v5883_v32, %v4806_v33 }
  0xbf   :  { %v5156_v59 = vld [vmem:[%s8834_s1 + $0xa88] sm:$0xf]  ;;  %v4901_v63 = vor.u32 %v5911_v55, %v4900_v54  ;;  %v5811_v41 = vld [vmem:[%s8834_s1 + $0x58c] sm:$0xf]  ;;  %v5321_v50 = vor.u32 %v6011_v37, %v5318_v40 }
  0xc0   :  { %v5975_v61 = vld [vmem:[%s8834_s1 + $0xaa4] sm:$0xf0]  ;;  %v4518_v42 = vld [vmem:[%s8834_s1 + $0x5a8] sm:$0xf0] }
  0xc1   :  { %v4868_v4 = vld [vmem:[%s8834_s1 + $0x848] sm:$0xf]  ;;  %2674 = vmatpush.bf16.msrb.mxu3 %v5189_v56  ;;  %2700 = vmatpush.bf16.msrb.mxu2 %v3913_v58  ;;  %v5157_v6 = vor.u32 %v5975_v61, %v5156_v59  ;;  %v5875_v47 = vld [vmem:[%s8834_s1 + $0x78c] sm:$0xf]  ;;  %v4521_v51 = vor.u32 %v5811_v41, %v4518_v42  ;;  %v7211_v61 = vld [vmem:[%s8836_s2] sm:$0xff] }
  0xc2   :  { %v5903_v5 = vld [vmem:[%s8834_s1 + $0x864] sm:$0xf0]  ;;  %2662 = vmatpush.bf16.msra.mxu1 %v4901_v63  ;;  %2714 = vmatpush.bf16.msrb.mxu0 %v4137_v11  ;;  %v4774_v49 = vld [vmem:[%s8834_s1 + $0x7a8] sm:$0xf0]  ;;  %v419_v11 = vperm.slane %v7211_v61, 0 }
  0xc3   :  { %v5124_v8 = vld [vmem:[%s8834_s1 + $0xa48] sm:$0xf]  ;;  %v4869_v12 = vor.u32 %v5903_v5, %v4868_v4  ;;  %v5939_v52 = vld [vmem:[%s8834_s1 + $0x98c] sm:$0xf]  ;;  %v4777_v62 = vor.u32 %v5875_v47, %v4774_v49 }
  0xc4   :  { %v5967_v10 = vld [vmem:[%s8834_s1 + $0xa64] sm:$0xf0]  ;;  %v5030_v54 = vld [vmem:[%s8834_s1 + $0x9a8] sm:$0xf0] }
  0xc5   :  { %v4836_v17 = vld [vmem:[%s8834_s1 + $0x808] sm:$0xf]  ;;  %2675 = vmatpush.bf16.msrb.mxu3 %v5157_v6  ;;  %2701 = vmatpush.bf16.msrb.mxu2 %v3881_v7  ;;  %v5125_v21 = vor.u32 %v5967_v10, %v5124_v8  ;;  %v6003_v55 = vld [vmem:[%s8834_s1 + $0xb8c] sm:$0xf]  ;;  %v5033_v63 = vor.u32 %v5939_v52, %v5030_v54 }
  0xc6   :  { %v5895_v18 = vld [vmem:[%s8834_s1 + $0x824] sm:$0xf0]  ;;  %2663 = vmatpush.bf16.msra.mxu1 %v4869_v12  ;;  %2715 = vmatpush.bf16.msrb.mxu0 %v4105_v25  ;;  %v5286_v56 = vld [vmem:[%s8834_s1 + $0xba8] sm:$0xf0] }
  0xc7   :  { %v5092_v23 = vld [vmem:[%s8834_s1 + $0xa08] sm:$0xf]  ;;  %v4837_v26 = vor.u32 %v5895_v18, %v4836_v17  ;;  %v5803_v58 = vld [vmem:[%s8834_s1 + $0x54c] sm:$0xf]  ;;  %v5289_v3 = vor.u32 %v6003_v55, %v5286_v56  ;;  %v2458_v42 = vpop.f32.mrf.mxu2 }
  0xc8   :  { %v5959_v24 = vld [vmem:[%s8834_s1 + $0xa24] sm:$0xf0]  ;;  %v4486_v59 = vld [vmem:[%s8834_s1 + $0x568] sm:$0xf0]  ;;  %v2445_v32 = vpop.f32.mrf.mxu1 }
  0xc9   :  { %2676 = vmatpush.bf16.msrb.mxu3 %v5125_v21  ;;  %2702 = vmatpush.bf16.msrb.mxu2 %v3849_v22  ;;  %v5093_v38 = vor.u32 %v5959_v24, %v5092_v23  ;;  %v5867_v0 = vld [vmem:[%s8834_s1 + $0x74c] sm:$0xf]  ;;  %v4489_v4 = vor.u32 %v5803_v58, %v4486_v59  ;;  %v2432_v21 = vpop.f32.mrf.mxu0 }
  0xca   :  { %2664 = vmatpush.bf16.msra.mxu1 %v4837_v26  ;;  %2716 = vmatpush.bf16.msrb.mxu0 %v4073_v44  ;;  %v4742_v1 = vld [vmem:[%s8834_s1 + $0x768] sm:$0xf0]  ;;  %v2433_v25 = vadd.f32 %v2432_v21, %v419_v11 }
  0xcb   :  { %v5931_v2 = vld [vmem:[%s8834_s1 + $0x94c] sm:$0xf]  ;;  %v4745_v12 = vor.u32 %v5867_v0, %v4742_v1 }
  0xcc   :  { %v4998_v5 = vld [vmem:[%s8834_s1 + $0x968] sm:$0xf0]  ;;  %v2446_v37 = vadd.f32 %v2445_v32, %v2433_v25  ;;  %v5760_v32 = vld [vmem:[%s8834_s1 + $0x3ec] sm:$0xf0] }
  0xcd   :  { %2665 = vmatmul.bf16.vlgmr.msra.gmra.mxu1 %v6572_v34  ;;  %2677 = vmatpush.bf16.msrb.mxu3 %v5093_v38  ;;  %v5995_v6 = vld [vmem:[%s8834_s1 + $0xb4c] sm:$0xf]  ;;  %v5001_v13 = vor.u32 %v5931_v2, %v4998_v5 }
  0xce   :  { %2722 = vmatpush.bf16.msrb.mxu1 %v4553_v30  ;;  %2703 = vmatpush.bf16.msrb.mxu2 %v3817_v43  ;;  %v5254_v7 = vld [vmem:[%s8834_s1 + $0xb68] sm:$0xf0] }
  0xcf   :  { %2761 = vmatpush.bf16.msra.mxu0 %v5321_v50  ;;  %v5795_v8 = vld [vmem:[%s8834_s1 + $0x50c] sm:$0xf]  ;;  %v5257_v16 = vor.u32 %v5995_v6, %v5254_v7 }
  0xd0   :  { %2678 = vmatmul.bf16.vlgmr.msrb.gmra.mxu3 %v6583_v39  ;;  %v4454_v10 = vld [vmem:[%s8834_s1 + $0x528] sm:$0xf0]  ;;  %2717 = vmatmul.bf16.vlgmr.msrb.gmra.mxu0 %v6405_v9 }
  0xd1   :  { %2735 = vmatpush.bf16.msra.mxu3 %v4809_v45  ;;  %2704 = vmatmul.bf16.vlgmr.msrb.gmra.mxu2 %v6375_v57  ;;  %v5859_v14 = vld [vmem:[%s8834_s1 + $0x70c] sm:$0xf]  ;;  %v4457_v17 = vor.u32 %v5795_v8, %v4454_v10  ;;  %v2459_v45 = vadd.f32 %v2458_v42, %v2446_v37  ;;  %v2434_v56 = vpop.f32.mrf.mxu0  ;;  %v2447_v10 = vpop.f32.mrf.mxu1  ;;  %v4812_v37 = vld [vmem:[%s8834_s1 + $0x7d0] sm:$0xf] }
  0xd2   :  { %2748 = vmatpush.bf16.msra.mxu2 %v5065_v46  ;;  %2723 = vmatpush.bf16.msrb.mxu1 %v4521_v51  ;;  %v4710_v15 = vld [vmem:[%s8834_s1 + $0x728] sm:$0xf0]  ;;  %v2471_v46 = vpop.f32.mrf.mxu3  ;;  %v5880_v56 = vld [vmem:[%s8834_s1 + $0x7ac] sm:$0xf0] }
  0xd3   :  { %2762 = vmatpush.bf16.msra.mxu0 %v5289_v3  ;;  %v5923_v18 = vld [vmem:[%s8834_s1 + $0x90c] sm:$0xf]  ;;  %v4713_v26 = vor.u32 %v5859_v14, %v4710_v15  ;;  %v7304_v58 = vadd.f32 %v2471_v46, %v2459_v45  ;;  %v2460_v14 = vpop.f32.mrf.mxu2  ;;  %v5688_v45 = vld [vmem:[%s8834_s1 + $0x1ac] sm:$0xf0] }
  0xd4   :  { %v4966_v19 = vld [vmem:[%s8834_s1 + $0x928] sm:$0xf0]  ;;  %v5672_v14 = vld [vmem:[%s8834_s1 + $0x12c] sm:$0xf0] }
  0xd5   :  { %2736 = vmatpush.bf16.msra.mxu3 %v4777_v62  ;;  %v5987_v20 = vld [vmem:[%s8834_s1 + $0xb0c] sm:$0xf]  ;;  %v4969_v27 = vor.u32 %v5923_v18, %v4966_v19 }
  0xd6   :  { %2749 = vmatpush.bf16.msra.mxu2 %v5033_v63  ;;  %2724 = vmatpush.bf16.msrb.mxu1 %v4489_v4  ;;  %v5222_v22 = vld [vmem:[%s8834_s1 + $0xb28] sm:$0xf0] }
  0xd7   :  { %v5787_v23 = vld [vmem:[%s8834_s1 + $0x4cc] sm:$0xf]  ;;  %2763 = vmatpush.bf16.msra.mxu0 %v5257_v16  ;;  %v5225_v30 = vor.u32 %v5987_v20, %v5222_v22 }
  0xd8   :  { %v4422_v24 = vld [vmem:[%s8834_s1 + $0x4e8] sm:$0xf0] }
  0xd9   :  { %2737 = vmatpush.bf16.msra.mxu3 %v4745_v12  ;;  %v5851_v28 = vld [vmem:[%s8834_s1 + $0x6cc] sm:$0xf]  ;;  %v4425_v31 = vor.u32 %v5787_v23, %v4422_v24 }
  0xda   :  { %2750 = vmatpush.bf16.msra.mxu2 %v5001_v13  ;;  %v4678_v29 = vld [vmem:[%s8834_s1 + $0x6e8] sm:$0xf0]  ;;  %2725 = vmatpush.bf16.msrb.mxu1 %v4457_v17  ;;  %v2473_v21 = vpop.f32.mrf.mxu3 }
  0xdb   :  { %v5915_v33 = vld [vmem:[%s8834_s1 + $0x8cc] sm:$0xf]  ;;  %v4681_v43 = vor.u32 %v5851_v28, %v4678_v29  ;;  %2764 = vmatpush.bf16.msra.mxu0 %v5225_v30  ;;  %v4044_v29 = vld [vmem:[%s8834_s1 + $0x1d0] sm:$0xf] }
  0xdc   :  { %v4934_v35 = vld [vmem:[%s8834_s1 + $0x8e8] sm:$0xf0]  ;;  %v5696_v30 = vld [vmem:[%s8834_s1 + $0x1ec] sm:$0xf0] }
  0xdd   :  { %v5979_v36 = vld [vmem:[%s8834_s1 + $0xacc] sm:$0xf]  ;;  %2738 = vmatpush.bf16.msra.mxu3 %v4713_v26  ;;  %v4937_v44 = vor.u32 %v5915_v33, %v4934_v35  ;;  %v4556_v33 = vld [vmem:[%s8834_s1 + $0x5d0] sm:$0xf]  ;;  %v4045_v42 = vor.u32 %v5696_v30, %v4044_v29 }
  0xde   :  { %v5190_v38 = vld [vmem:[%s8834_s1 + $0xae8] sm:$0xf0]  ;;  %2751 = vmatpush.bf16.msra.mxu2 %v4969_v27  ;;  %2726 = vmatpush.bf16.msrb.mxu1 %v4425_v31  ;;  %v4300_v31 = vld [vmem:[%s8834_s1 + $0x3d0] sm:$0xf] }
  0xdf   :  { %v5779_v40 = vld [vmem:[%s8834_s1 + $0x48c] sm:$0xf]  ;;  %v5193_v50 = vor.u32 %v5979_v36, %v5190_v38  ;;  %v5824_v36 = vld [vmem:[%s8834_s1 + $0x5ec] sm:$0xf0] }
  0xe0   :  { %v4390_v41 = vld [vmem:[%s8834_s1 + $0x4a8] sm:$0xf0]  ;;  %v5888_v38 = vld [vmem:[%s8834_s1 + $0x7ec] sm:$0xf0]  ;;  %v4557_v46 = vor.u32 %v5824_v36, %v4556_v33 }
  0xe1   :  { %v5843_v47 = vld [vmem:[%s8834_s1 + $0x68c] sm:$0xf]  ;;  %v4393_v51 = vor.u32 %v5779_v40, %v4390_v41  ;;  %2739 = vmatpush.bf16.msra.mxu3 %v4681_v43  ;;  %2765 = vmatpush.bf16.msra.mxu0 %v5193_v50  ;;  %v4301_v43 = vor.u32 %v5760_v32, %v4300_v31  ;;  %v5752_v50 = vld [vmem:[%s8834_s1 + $0x3ac] sm:$0xf0] }
  0xe2   :  { %v4646_v49 = vld [vmem:[%s8834_s1 + $0x6a8] sm:$0xf0]  ;;  %2752 = vmatpush.bf16.msra.mxu2 %v4937_v44  ;;  %v4012_v44 = vld [vmem:[%s8834_s1 + $0x190] sm:$0xf] }
  0xe3   :  { %v5907_v52 = vld [vmem:[%s8834_s1 + $0x88c] sm:$0xf]  ;;  %v4649_v0 = vor.u32 %v5843_v47, %v4646_v49  ;;  %2727 = vmatpush.bf16.msrb.mxu1 %v4393_v51  ;;  %v4813_v47 = vor.u32 %v5888_v38, %v4812_v37  ;;  %v4268_v49 = vld [vmem:[%s8834_s1 + $0x390] sm:$0xf]  ;;  %v420_v37 = vperm.slane %v7211_v61, 1 }
  0xe4   :  { %v4902_v54 = vld [vmem:[%s8834_s1 + $0x8a8] sm:$0xf0]  ;;  %v4524_v51 = vld [vmem:[%s8834_s1 + $0x590] sm:$0xf]  ;;  %v2484_v10 = vpop.f32.mrf.mxu0 }
  0xe5   :  { %v5971_v55 = vld [vmem:[%s8834_s1 + $0xa8c] sm:$0xf]  ;;  %v4905_v1 = vor.u32 %v5907_v52, %v4902_v54  ;;  %2740 = vmatpush.bf16.msra.mxu3 %v4649_v0  ;;  %v2510_v52 = vpop.f32.mrf.mxu2  ;;  %v5816_v54 = vld [vmem:[%s8834_s1 + $0x5ac] sm:$0xf0] }
  0xe6   :  { %v5158_v59 = vld [vmem:[%s8834_s1 + $0xaa8] sm:$0xf0]  ;;  %v5680_v0 = vld [vmem:[%s8834_s1 + $0x16c] sm:$0xf0] }
  0xe7   :  { %v5771_v62 = vld [vmem:[%s8834_s1 + $0x44c] sm:$0xf]  ;;  %v5161_v4 = vor.u32 %v5971_v55, %v5158_v59  ;;  %2753 = vmatpush.bf16.msra.mxu2 %v4905_v1  ;;  %v4780_v55 = vld [vmem:[%s8834_s1 + $0x790] sm:$0xf]  ;;  %v4013_v59 = vor.u32 %v5688_v45, %v4012_v44  ;;  %v4525_v1 = vor.u32 %v5816_v54, %v4524_v51 }
  0xe8   :  { %v4358_v63 = vld [vmem:[%s8834_s1 + $0x468] sm:$0xf0]  ;;  %v4460_v21 = vld [vmem:[%s8834_s1 + $0x510] sm:$0xf] }
  0xe9   :  { %v5835_v2 = vld [vmem:[%s8834_s1 + $0x64c] sm:$0xf]  ;;  %v4361_v5 = vor.u32 %v5771_v62, %v4358_v63  ;;  %2766 = vmatpush.bf16.msra.mxu0 %v5161_v4  ;;  %v4269_v62 = vor.u32 %v5752_v50, %v4268_v49  ;;  %v3980_v63 = vld [vmem:[%s8834_s1 + $0x150] sm:$0xf] }
  0xea   :  { %v4614_v3 = vld [vmem:[%s8834_s1 + $0x668] sm:$0xf0]  ;;  %v5744_v4 = vld [vmem:[%s8834_s1 + $0x36c] sm:$0xf0] }
  0xeb   :  { %v5899_v6 = vld [vmem:[%s8834_s1 + $0x84c] sm:$0xf]  ;;  %v4617_v17 = vor.u32 %v5835_v2, %v4614_v3  ;;  %2728 = vmatpush.bf16.msrb.mxu1 %v4361_v5  ;;  %v4781_v2 = vor.u32 %v5880_v56, %v4780_v55  ;;  %v4236_v3 = vld [vmem:[%s8834_s1 + $0x350] sm:$0xf] }
  0xec   :  { %v4870_v7 = vld [vmem:[%s8834_s1 + $0x868] sm:$0xf0]  ;;  %v4492_v5 = vld [vmem:[%s8834_s1 + $0x550] sm:$0xf] }
  0xed   :  { %v5963_v8 = vld [vmem:[%s8834_s1 + $0xa4c] sm:$0xf]  ;;  %v4873_v18 = vor.u32 %v5899_v6, %v4870_v7  ;;  %2741 = vmatpush.bf16.msra.mxu3 %v4617_v17  ;;  %v5808_v6 = vld [vmem:[%s8834_s1 + $0x56c] sm:$0xf0] }
  0xee   :  { %v5126_v11 = vld [vmem:[%s8834_s1 + $0xa68] sm:$0xf0]  ;;  %v4748_v7 = vld [vmem:[%s8834_s1 + $0x750] sm:$0xf] }
  0xef   :  { %v5763_v12 = vld [vmem:[%s8834_s1 + $0x40c] sm:$0xf]  ;;  %v5129_v22 = vor.u32 %v5963_v8, %v5126_v11  ;;  %2754 = vmatpush.bf16.msra.mxu2 %v4873_v18  ;;  %v5872_v8 = vld [vmem:[%s8834_s1 + $0x76c] sm:$0xf0]  ;;  %v3981_v11 = vor.u32 %v5680_v0, %v3980_v63  ;;  %v2497_v18 = vpop.f32.mrf.mxu1 }
  0xf0   :  { %v4326_v13 = vld [vmem:[%s8834_s1 + $0x428] sm:$0xf0]  ;;  %v4749_v17 = vor.u32 %v5872_v8, %v4748_v7  ;;  %v5664_v29 = vld [vmem:[%s8834_s1 + $0xec] sm:$0xf0] }
  0xf1   :  { %v6019_v15 = vld [vmem:[%s8834_s1 + $0xc0c] sm:$0xf]  ;;  %v4329_v23 = vor.u32 %v5763_v12, %v4326_v13  ;;  %2767 = vmatpush.bf16.msra.mxu0 %v5129_v22  ;;  %v4237_v12 = vor.u32 %v5744_v4, %v4236_v3  ;;  %v3948_v13 = vld [vmem:[%s8834_s1 + $0x110] sm:$0xf]  ;;  %v2512_v22 = vpop.f32.mrf.mxu2 }
  0xf2   :  { %v5350_v16 = vld [vmem:[%s8834_s1 + $0xc28] sm:$0xf0]  ;;  %v4172_v30 = vld [vmem:[%s8834_s1 + $0x2d0] sm:$0xf] }
  0xf3   :  { %v5827_v19 = vld [vmem:[%s8834_s1 + $0x60c] sm:$0xf]  ;;  %v5353_v28 = vor.u32 %v6019_v15, %v5350_v16  ;;  %2729 = vmatpush.bf16.msrb.mxu1 %v4329_v23  ;;  %v2485_v15 = vadd.f32 %v2484_v10, %v7304_v58  ;;  %v4493_v16 = vor.u32 %v5808_v6, %v4492_v5  ;;  %v5800_v58 = vld [vmem:[%s8834_s1 + $0x52c] sm:$0xf0] }
  0xf4   :  { %v4582_v20 = vld [vmem:[%s8834_s1 + $0x628] sm:$0xf0]  ;;  %v4716_v23 = vld [vmem:[%s8834_s1 + $0x710] sm:$0xf]  ;;  %v4461_v32 = vor.u32 %v5800_v58, %v4460_v21 }
  0xf5   :  { %v5891_v24 = vld [vmem:[%s8834_s1 + $0x80c] sm:$0xf]  ;;  %v4585_v35 = vor.u32 %v5827_v19, %v4582_v20  ;;  %v4204_v19 = vld [vmem:[%s8834_s1 + $0x310] sm:$0xf] }
  0xf6   :  { %v4838_v25 = vld [vmem:[%s8834_s1 + $0x828] sm:$0xf0]  ;;  %2730 = vmatmul.bf16.vlgmr.msrb.gmra.mxu1 %v6364_v53  ;;  %v5736_v20 = vld [vmem:[%s8834_s1 + $0x32c] sm:$0xf0] }
  0xf7   :  { %v5955_v26 = vld [vmem:[%s8834_s1 + $0xa0c] sm:$0xf]  ;;  %v4841_v40 = vor.u32 %v5891_v24, %v4838_v25  ;;  %2781 = vmatpush.bf16.msra.mxu1 %v5353_v28  ;;  %2742 = vmatpush.bf16.msra.mxu3 %v4585_v35  ;;  %v5864_v24 = vld [vmem:[%s8834_s1 + $0x72c] sm:$0xf0]  ;;  %v2498_v25 = vadd.f32 %v2497_v18, %v2485_v15  ;;  %v2499_v56 = vpop.f32.mrf.mxu1 }
  0xf8   :  { %v5094_v27 = vld [vmem:[%s8834_s1 + $0xa28] sm:$0xf0]  ;;  %v3916_v28 = vld [vmem:[%s8834_s1 + $0xd0] sm:$0xf]  ;;  %v4717_v33 = vor.u32 %v5864_v24, %v4716_v23 }
  0xf9   :  { %v5097_v41 = vor.u32 %v5955_v26, %v5094_v27  ;;  %2755 = vmatpush.bf16.msra.mxu2 %v4841_v40  ;;  %v3949_v26 = vor.u32 %v5672_v14, %v3948_v13  ;;  %v4205_v27 = vor.u32 %v5736_v20, %v4204_v19  ;;  %v7473_v31 = vadd.f32 %v2510_v52, %v2498_v25  ;;  %v5728_v35 = vld [vmem:[%s8834_s1 + $0x2ec] sm:$0xf0]  ;;  %v2536_v0 = vpop.f32.mrf.mxu2 }
  0xfa   :  { %2743 = vmatmul.bf16.vlgmr.msra.gmra.mxu3 %v6377_v60  ;;  %v4428_v36 = vld [vmem:[%s8834_s1 + $0x4d0] sm:$0xf] }
  0xfb   :  { %2768 = vmatpush.bf16.msra.mxu0 %v5097_v41  ;;  %2787 = vmatpush.bf16.msrb.mxu3 %v4045_v42  ;;  %v5792_v38 = vld [vmem:[%s8834_s1 + $0x4ec] sm:$0xf0]  ;;  %v3917_v42 = vor.u32 %v5664_v29, %v3916_v28 }
  0xfc   :  { %2800 = vmatpush.bf16.msrb.mxu1 %v4301_v43  ;;  %2756 = vmatmul.bf16.vlgmr.msra.gmra.mxu2 %v6572_v34  ;;  %v4684_v40 = vld [vmem:[%s8834_s1 + $0x6d0] sm:$0xf]  ;;  %v4173_v43 = vor.u32 %v5728_v35, %v4172_v30  ;;  %v4429_v49 = vor.u32 %v5792_v38, %v4428_v36  ;;  %v5692_v36 = vld [vmem:[%s8834_s1 + $0x1d4] sm:$0xf] }
  0xfd   :  { %2813 = vmatpush.bf16.msrb.mxu2 %v4557_v46  ;;  %v5856_v41 = vld [vmem:[%s8834_s1 + $0x6ec] sm:$0xf0]  ;;  %v2523_v46 = vpop.f32.mrf.mxu3 }
  0xfe   :  { %2769 = vmatmul.bf16.vlgmr.msra.gmra.mxu0 %v6583_v39  ;;  %v3884_v44 = vld [vmem:[%s8834_s1 + $0x90] sm:$0xf]  ;;  %v4685_v50 = vor.u32 %v5856_v41, %v4684_v40  ;;  %v2524_v55 = vadd.f32 %v2523_v46, %v420_v37  ;;  %v4046_v37 = vld [vmem:[%s8834_s1 + $0x1f0] sm:$0xf0] }
  0xff   :  { %2826 = vmatpush.bf16.msrb.mxu0 %v4813_v47  ;;  %2788 = vmatpush.bf16.msrb.mxu3 %v4013_v59  ;;  %v5656_v45 = vld [vmem:[%s8834_s1 + $0xac] sm:$0xf0]  ;;  %v2486_v47 = vpop.f32.mrf.mxu0  ;;  %v4302_v46 = vld [vmem:[%s8834_s1 + $0x3f0] sm:$0xf0] }
 0x100   :  { %2801 = vmatpush.bf16.msrb.mxu1 %v4269_v62  ;;  %v4140_v51 = vld [vmem:[%s8834_s1 + $0x290] sm:$0xf]  ;;  %v4049_v47 = vor.u32 %v5692_v36, %v4046_v37  ;;  %v5660_v37 = vld [vmem:[%s8834_s1 + $0xd4] sm:$0xf] }
 0x101   :  { %2814 = vmatpush.bf16.msrb.mxu2 %v4525_v1  ;;  %v5720_v52 = vld [vmem:[%s8834_s1 + $0x2ac] sm:$0xf0]  ;;  %v7517_v1 = vadd.f32 %v2536_v0, %v2524_v55  ;;  %v2538_v28 = vpop.f32.mrf.mxu2  ;;  %v4014_v55 = vld [vmem:[%s8834_s1 + $0x1b0] sm:$0xf0] }
 0x102   :  { %v4396_v54 = vld [vmem:[%s8834_s1 + $0x490] sm:$0xf]  ;;  %v4141_v3 = vor.u32 %v5720_v52, %v4140_v51  ;;  %v4270_v0 = vld [vmem:[%s8834_s1 + $0x3b0] sm:$0xf0] }
 0x103   :  { %2827 = vmatpush.bf16.msrb.mxu0 %v4781_v2  ;;  %2789 = vmatpush.bf16.msrb.mxu3 %v3981_v11  ;;  %v5784_v59 = vld [vmem:[%s8834_s1 + $0x4ac] sm:$0xf0]  ;;  %v3885_v2 = vor.u32 %v5656_v45, %v3884_v44  ;;  %v5756_v45 = vld [vmem:[%s8834_s1 + $0x3d4] sm:$0xf] }
 0x104   :  { %2802 = vmatpush.bf16.msrb.mxu1 %v4237_v12  ;;  %v4652_v62 = vld [vmem:[%s8834_s1 + $0x690] sm:$0xf]  ;;  %v4397_v6 = vor.u32 %v5784_v59, %v4396_v54  ;;  %v5684_v54 = vld [vmem:[%s8834_s1 + $0x194] sm:$0xf]  ;;  %v4305_v59 = vor.u32 %v5756_v45, %v4302_v46 }
 0x105   :  { %2815 = vmatpush.bf16.msrb.mxu2 %v4493_v16  ;;  %v5848_v63 = vld [vmem:[%s8834_s1 + $0x6ac] sm:$0xf0]  ;;  %v2525_v20 = vpop.f32.mrf.mxu3  ;;  %v4206_v28 = vld [vmem:[%s8834_s1 + $0x330] sm:$0xf0] }
 0x106   :  { %5373 = vmatmul.msk.bf16.vlgmr.msra.gmra.mxu1 %vm2419_vm0, %v6484_v48  ;;  %v3852_v4 = vld [vmem:[%s8834_s1 + $0x50] sm:$0xf]  ;;  %v4653_v7 = vor.u32 %v5848_v63, %v4652_v62  ;;  %v5748_v63 = vld [vmem:[%s8834_s1 + $0x394] sm:$0xf] }
 0x107   :  { %2828 = vmatpush.bf16.msrb.mxu0 %v4749_v17  ;;  %2790 = vmatpush.bf16.msrb.mxu3 %v3949_v26  ;;  %v5648_v5 = vld [vmem:[%s8834_s1 + $0x6c] sm:$0xf0]  ;;  %v4174_v45 = vld [vmem:[%s8834_s1 + $0x2f0] sm:$0xf0] }
 0x108   :  { %2803 = vmatpush.bf16.msrb.mxu1 %v4205_v27  ;;  %v4108_v8 = vld [vmem:[%s8834_s1 + $0x250] sm:$0xf]  ;;  %v3853_v15 = vor.u32 %v5648_v5, %v3852_v4 }
 0x109   :  { %2816 = vmatpush.bf16.msrb.mxu2 %v4461_v32  ;;  %v5712_v10 = vld [vmem:[%s8834_s1 + $0x26c] sm:$0xf0] }
 0x10a   :  { %v4364_v11 = vld [vmem:[%s8834_s1 + $0x450] sm:$0xf]  ;;  %v4109_v16 = vor.u32 %v5712_v10, %v4108_v8  ;;  %v5676_v8 = vld [vmem:[%s8834_s1 + $0x154] sm:$0xf] }
 0x10b   :  { %2829 = vmatpush.bf16.msrb.mxu0 %v4717_v33  ;;  %2791 = vmatpush.bf16.msrb.mxu3 %v3917_v42  ;;  %v5776_v12 = vld [vmem:[%s8834_s1 + $0x46c] sm:$0xf0]  ;;  %v3982_v10 = vld [vmem:[%s8834_s1 + $0x170] sm:$0xf0] }
 0x10c   :  { %2804 = vmatpush.bf16.msrb.mxu1 %v4173_v43  ;;  %v4620_v13 = vld [vmem:[%s8834_s1 + $0x650] sm:$0xf]  ;;  %v4365_v21 = vor.u32 %v5776_v12, %v4364_v11  ;;  %v4273_v11 = vor.u32 %v5748_v63, %v4270_v0  ;;  %v2549_v12 = vpop.f32.mrf.mxu0 }
 0x10d   :  { %2817 = vmatpush.bf16.msrb.mxu2 %v4429_v49  ;;  %v5840_v14 = vld [vmem:[%s8834_s1 + $0x66c] sm:$0xf0] }
 0x10e   :  { %v3820_v17 = vld [vmem:[%s8834_s1 + $0x10] sm:$0xf]  ;;  %v4621_v22 = vor.u32 %v5840_v14, %v4620_v13  ;;  %v5740_v14 = vld [vmem:[%s8834_s1 + $0x354] sm:$0xf] }
 0x10f   :  { %2830 = vmatpush.bf16.msrb.mxu0 %v4685_v50  ;;  %2792 = vmatpush.bf16.msrb.mxu3 %v3885_v2  ;;  %v5640_v18 = vld [vmem:[%s8834_s1 + $0x2c] sm:$0xf0] }
 0x110   :  { %2805 = vmatpush.bf16.msrb.mxu1 %v4141_v3  ;;  %v4076_v19 = vld [vmem:[%s8834_s1 + $0x210] sm:$0xf]  ;;  %v3821_v33 = vor.u32 %v5640_v18, %v3820_v17  ;;  %v4017_v3 = vor.u32 %v5684_v54, %v4014_v55  ;;  %v3985_v18 = vor.u32 %v5676_v8, %v3982_v10 }
 0x111   :  { %2818 = vmatpush.bf16.msrb.mxu2 %v4397_v6  ;;  %v5704_v58 = vld [vmem:[%s8834_s1 + $0x22c] sm:$0xf0] }
 0x112   :  { %v4332_v23 = vld [vmem:[%s8834_s1 + $0x410] sm:$0xf]  ;;  %v4077_v35 = vor.u32 %v5704_v58, %v4076_v19 }
 0x113   :  { %2831 = vmatpush.bf16.msrb.mxu0 %v4653_v7  ;;  %v5768_v24 = vld [vmem:[%s8834_s1 + $0x42c] sm:$0xf0]  ;;  %2793 = vmatpush.bf16.msrb.mxu3 %v3853_v15  ;;  %v4238_v15 = vld [vmem:[%s8834_s1 + $0x370] sm:$0xf0]  ;;  %v2588_v54 = vpop.f32.mrf.mxu2 }
 0x114   :  { %v4588_v25 = vld [vmem:[%s8834_s1 + $0x610] sm:$0xf]  ;;  %2806 = vmatpush.bf16.msrb.mxu1 %v4109_v16  ;;  %v4333_v38 = vor.u32 %v5768_v24, %v4332_v23  ;;  %v2550_v16 = vadd.f32 %v2549_v12, %v7517_v1  ;;  %v5668_v1 = vld [vmem:[%s8834_s1 + $0x114] sm:$0xf]  ;;  %v2551_v46 = vpop.f32.mrf.mxu0 }
 0x115   :  { %v5832_v26 = vld [vmem:[%s8834_s1 + $0x62c] sm:$0xf0]  ;;  %2819 = vmatpush.bf16.msrb.mxu2 %v4365_v21  ;;  %v3950_v23 = vld [vmem:[%s8834_s1 + $0x130] sm:$0xf0] }
 0x116   :  { %v5068_v27 = vld [vmem:[%s8834_s1 + $0x9d0] sm:$0xf]  ;;  %v4589_v40 = vor.u32 %v5832_v26, %v4588_v25  ;;  %v4241_v25 = vor.u32 %v5740_v14, %v4238_v15  ;;  %v5644_v12 = vld [vmem:[%s8834_s1 + $0x54] sm:$0xf] }
 0x117   :  { %v5952_v29 = vld [vmem:[%s8834_s1 + $0x9ec] sm:$0xf0]  ;;  %2832 = vmatpush.bf16.msrb.mxu0 %v4621_v22  ;;  %2794 = vmatpush.bf16.msrb.mxu3 %v3821_v33  ;;  %v2562_v22 = vpop.f32.mrf.mxu1 }
 0x118   :  { %v5324_v30 = vld [vmem:[%s8834_s1 + $0xbd0] sm:$0xf]  ;;  %v5069_v42 = vor.u32 %v5952_v29, %v5068_v27  ;;  %2807 = vmatpush.bf16.msrb.mxu1 %v4077_v35  ;;  %v2563_v24 = vadd.f32 %v2562_v22, %v2550_v16  ;;  %v5732_v27 = vld [vmem:[%s8834_s1 + $0x314] sm:$0xf] }
 0x119   :  { %v6016_v32 = vld [vmem:[%s8834_s1 + $0xbec] sm:$0xf0]  ;;  %2820 = vmatpush.bf16.msrb.mxu2 %v4333_v38  ;;  %v3918_v38 = vld [vmem:[%s8834_s1 + $0xf0] sm:$0xf0] }
 0x11a   :  { %v5356_v41 = vld [vmem:[%s8834_s1 + $0xc10] sm:$0xf]  ;;  %v5325_v43 = vor.u32 %v6016_v32, %v5324_v30  ;;  %2795 = vmatmul.bf16.vlgmr.msrb.gmra.mxu3 %v6375_v57  ;;  %v3953_v30 = vor.u32 %v5668_v1, %v3950_v23  ;;  %v5636_v23 = vld [vmem:[%s8834_s1 + $0x14] sm:$0xf] }
 0x11b   :  { %v6024_v44 = vld [vmem:[%s8834_s1 + $0xc2c] sm:$0xf0]  ;;  %2833 = vmatpush.bf16.msrb.mxu0 %v4589_v40  ;;  %2839 = vmatpush.bf16.msra.mxu3 %v5069_v42  ;;  %v2575_v40 = vpop.f32.mrf.mxu3  ;;  %v4209_v42 = vor.u32 %v5732_v27, %v4206_v28  ;;  %v4558_v27 = vld [vmem:[%s8834_s1 + $0x5f0] sm:$0xf0] }
 0x11c   :  { %v5036_v49 = vld [vmem:[%s8834_s1 + $0x990] sm:$0xf]  ;;  %v5357_v56 = vor.u32 %v6024_v44, %v5356_v41  ;;  %2852 = vmatpush.bf16.msra.mxu1 %v5325_v43  ;;  %2821 = vmatmul.bf16.vlgmr.msrb.gmra.mxu2 %v6364_v53  ;;  %v2576_v41 = vadd.f32 %v2575_v40, %v2563_v24  ;;  %v5724_v44 = vld [vmem:[%s8834_s1 + $0x2d4] sm:$0xf] }
 0x11d   :  { %v5944_v50 = vld [vmem:[%s8834_s1 + $0x9ac] sm:$0xf0]  ;;  %2808 = vmatmul.bf16.vlgmr.msrb.gmra.mxu1 %v6405_v9  ;;  %v4177_v0 = vor.u32 %v5724_v44, %v4174_v45  ;;  %v3822_v24 = vld [vmem:[%s8834_s1 + $0x30] sm:$0xf0] }
 0x11e   :  { %v5292_v51 = vld [vmem:[%s8834_s1 + $0xb90] sm:$0xf]  ;;  %v5037_v62 = vor.u32 %v5944_v50, %v5036_v49  ;;  %2872 = vmatpush.bf16.msra.mxu2 %v5357_v56  ;;  %2834 = vmatmul.bf16.vlgmr.msrb.gmra.mxu0 %v6377_v60  ;;  %v3921_v49 = vor.u32 %v5660_v37, %v3918_v38  ;;  %v5652_v56 = vld [vmem:[%s8834_s1 + $0x94] sm:$0xf]  ;;  %v7716_v63 = vadd.f32 %v2588_v54, %v2576_v41 }
 0x11f   :  { %v6008_v52 = vld [vmem:[%s8834_s1 + $0xbac] sm:$0xf0]  ;;  %2878 = vmatpush.bf16.msra.mxu0 %v4049_v47  ;;  %v5884_v28 = vld [vmem:[%s8834_s1 + $0x7d4] sm:$0xf]  ;;  %v3825_v37 = vor.u32 %v5636_v23, %v3822_v24  ;;  %v421_v23 = vperm.slane %v7211_v61, 2 }
 0x120   :  { %v5293_v2 = vor.u32 %v6008_v52, %v5292_v51  ;;  %v5004_v4 = vld [vmem:[%s8834_s1 + $0x950] sm:$0xf]  ;;  %2840 = vmatpush.bf16.msra.mxu3 %v5037_v62  ;;  %v2564_v62 = vpop.f32.mrf.mxu1  ;;  %v5700_v38 = vld [vmem:[%s8834_s1 + $0x214] sm:$0xf] }
 0x121   :  { %v5936_v5 = vld [vmem:[%s8834_s1 + $0x96c] sm:$0xf0]  ;;  %v4078_v40 = vld [vmem:[%s8834_s1 + $0x230] sm:$0xf0] }
 0x122   :  { %v5260_v6 = vld [vmem:[%s8834_s1 + $0xb50] sm:$0xf]  ;;  %2891 = vmatpush.bf16.msrb.mxu2 %v4305_v59  ;;  %v5005_v13 = vor.u32 %v5936_v5, %v5004_v4  ;;  %2853 = vmatpush.bf16.msra.mxu1 %v5293_v2  ;;  %v3886_v59 = vld [vmem:[%s8834_s1 + $0xb0] sm:$0xf0]  ;;  %v4081_v54 = vor.u32 %v5700_v38, %v4078_v40 }
 0x123   :  { %v6000_v7 = vld [vmem:[%s8834_s1 + $0xb6c] sm:$0xf0]  ;;  %2879 = vmatpush.bf16.msra.mxu0 %v4017_v3  ;;  %v5716_v3 = vld [vmem:[%s8834_s1 + $0x294] sm:$0xf]  ;;  %v2577_v14 = vpop.f32.mrf.mxu3 }
 0x124   :  { %v5261_v17 = vor.u32 %v6000_v7, %v5260_v6  ;;  %v4972_v19 = vld [vmem:[%s8834_s1 + $0x910] sm:$0xf]  ;;  %2841 = vmatpush.bf16.msra.mxu3 %v5005_v13  ;;  %v4142_v4 = vld [vmem:[%s8834_s1 + $0x2b0] sm:$0xf0]  ;;  %v3889_v6 = vor.u32 %v5652_v56, %v3886_v59 }
 0x125   :  { %v5928_v20 = vld [vmem:[%s8834_s1 + $0x92c] sm:$0xf0]  ;;  %v3854_v13 = vld [vmem:[%s8834_s1 + $0x70] sm:$0xf0]  ;;  %v4145_v15 = vor.u32 %v5716_v3, %v4142_v4 }
 0x126   :  { %v5228_v21 = vld [vmem:[%s8834_s1 + $0xb10] sm:$0xf]  ;;  %2892 = vmatpush.bf16.msrb.mxu2 %v4273_v11  ;;  %v4973_v26 = vor.u32 %v5928_v20, %v4972_v19  ;;  %2854 = vmatpush.bf16.msra.mxu1 %v5261_v17  ;;  %v5708_v17 = vld [vmem:[%s8834_s1 + $0x254] sm:$0xf] }
 0x127   :  { %v5992_v58 = vld [vmem:[%s8834_s1 + $0xb2c] sm:$0xf0]  ;;  %2880 = vmatpush.bf16.msra.mxu0 %v3985_v18  ;;  %v4110_v18 = vld [vmem:[%s8834_s1 + $0x270] sm:$0xf0] }
 0x128   :  { %v5229_v29 = vor.u32 %v5992_v58, %v5228_v21  ;;  %v4940_v32 = vld [vmem:[%s8834_s1 + $0x8d0] sm:$0xf]  ;;  %2842 = vmatpush.bf16.msra.mxu3 %v4973_v26  ;;  %v3857_v21 = vor.u32 %v5644_v12, %v3854_v13  ;;  %v2590_v26 = vpop.f32.mrf.mxu2  ;;  %v5326_v44 = vld [vmem:[%s8834_s1 + $0xbf0] sm:$0xf0] }
 0x129   :  { %v5920_v33 = vld [vmem:[%s8834_s1 + $0x8ec] sm:$0xf0]  ;;  %v5812_v45 = vld [vmem:[%s8834_s1 + $0x594] sm:$0xf] }
 0x12a   :  { %v5196_v35 = vld [vmem:[%s8834_s1 + $0xad0] sm:$0xf]  ;;  %2893 = vmatpush.bf16.msrb.mxu2 %v4241_v25  ;;  %v4941_v43 = vor.u32 %v5920_v33, %v4940_v32  ;;  %2855 = vmatpush.bf16.msra.mxu1 %v5229_v29  ;;  %v5820_v25 = vld [vmem:[%s8834_s1 + $0x5d4] sm:$0xf] }
 0x12b   :  { %v5984_v36 = vld [vmem:[%s8834_s1 + $0xaec] sm:$0xf0]  ;;  %2881 = vmatpush.bf16.msra.mxu0 %v3953_v30  ;;  %v4814_v29 = vld [vmem:[%s8834_s1 + $0x7f0] sm:$0xf0]  ;;  %v4113_v30 = vor.u32 %v5708_v17, %v4110_v18  ;;  %v4561_v41 = vor.u32 %v5820_v25, %v4558_v27  ;;  %v2614_v25 = vpop.f32.mrf.mxu1 }
 0x12c   :  { %v5197_v47 = vor.u32 %v5984_v36, %v5196_v35  ;;  %v4908_v50 = vld [vmem:[%s8834_s1 + $0x890] sm:$0xf]  ;;  %2843 = vmatpush.bf16.msra.mxu3 %v4941_v43  ;;  %5374 = vmatmul.msk.bf16.vlgmr.msra.gmra.mxu2 %vm2419_vm0, %v6484_v48  ;;  %v5948_v33 = vld [vmem:[%s8834_s1 + $0x9d4] sm:$0xf] }
 0x12d   :  { %v5912_v51 = vld [vmem:[%s8834_s1 + $0x8ac] sm:$0xf0]  ;;  %v5070_v35 = vld [vmem:[%s8834_s1 + $0x9f0] sm:$0xf0] }
 0x12e   :  { %v5164_v52 = vld [vmem:[%s8834_s1 + $0xa90] sm:$0xf]  ;;  %2894 = vmatpush.bf16.msrb.mxu2 %v4209_v42  ;;  %v4909_v2 = vor.u32 %v5912_v51, %v4908_v50  ;;  %2856 = vmatpush.bf16.msra.mxu1 %v5197_v47  ;;  %v4817_v42 = vor.u32 %v5884_v28, %v4814_v29  ;;  %v6012_v43 = vld [vmem:[%s8834_s1 + $0xbd4] sm:$0xf]  ;;  %v5073_v46 = vor.u32 %v5948_v33, %v5070_v35  ;;  %v2601_v47 = vpop.f32.mrf.mxu3 }
 0x12f   :  { %v5976_v55 = vld [vmem:[%s8834_s1 + $0xaac] sm:$0xf0]  ;;  %2882 = vmatpush.bf16.msra.mxu0 %v3921_v49  ;;  %v4526_v49 = vld [vmem:[%s8834_s1 + $0x5b0] sm:$0xf0]  ;;  %v5329_v59 = vor.u32 %v6012_v43, %v5326_v44 }
 0x130   :  { %v5165_v5 = vor.u32 %v5976_v55, %v5164_v52  ;;  %v4876_v7 = vld [vmem:[%s8834_s1 + $0x850] sm:$0xf]  ;;  %2844 = vmatpush.bf16.msra.mxu3 %v4909_v2  ;;  %v5876_v50 = vld [vmem:[%s8834_s1 + $0x794] sm:$0xf]  ;;  %v7811_v52 = vadd.f32 %v2601_v47, %v7716_v63  ;;  %v4529_v62 = vor.u32 %v5812_v45, %v4526_v49 }
 0x131   :  { %v5904_v8 = vld [vmem:[%s8834_s1 + $0x86c] sm:$0xf0]  ;;  %v4782_v51 = vld [vmem:[%s8834_s1 + $0x7b0] sm:$0xf0] }
 0x132   :  { %v5132_v10 = vld [vmem:[%s8834_s1 + $0xa50] sm:$0xf]  ;;  %2895 = vmatpush.bf16.msrb.mxu2 %v4177_v0  ;;  %v4877_v16 = vor.u32 %v5904_v8, %v4876_v7  ;;  %2857 = vmatpush.bf16.msra.mxu1 %v5165_v5  ;;  %v5940_v55 = vld [vmem:[%s8834_s1 + $0x994] sm:$0xf]  ;;  %v4785_v0 = vor.u32 %v5876_v50, %v4782_v51 }
 0x133   :  { %v5968_v11 = vld [vmem:[%s8834_s1 + $0xa6c] sm:$0xf0]  ;;  %2883 = vmatpush.bf16.msra.mxu0 %v3889_v6  ;;  %v5038_v56 = vld [vmem:[%s8834_s1 + $0x9b0] sm:$0xf0] }
 0x134   :  { %v4844_v19 = vld [vmem:[%s8834_s1 + $0x810] sm:$0xf]  ;;  %v5133_v20 = vor.u32 %v5968_v11, %v5132_v10  ;;  %2845 = vmatpush.bf16.msra.mxu3 %v4877_v16  ;;  %v6004_v63 = vld [vmem:[%s8834_s1 + $0xb94] sm:$0xf]  ;;  %v5041_v4 = vor.u32 %v5940_v55, %v5038_v56  ;;  %v2640_v16 = vpop.f32.mrf.mxu0 }
 0x135   :  { %v5896_v22 = vld [vmem:[%s8834_s1 + $0x82c] sm:$0xf0]  ;;  %v5294_v2 = vld [vmem:[%s8834_s1 + $0xbb0] sm:$0xf0] }
 0x136   :  { %v5100_v58 = vld [vmem:[%s8834_s1 + $0xa10] sm:$0xf]  ;;  %2896 = vmatpush.bf16.msrb.mxu2 %v4145_v15  ;;  %v4845_v32 = vor.u32 %v5896_v22, %v4844_v19  ;;  %2858 = vmatpush.bf16.msra.mxu1 %v5133_v20  ;;  %v5804_v3 = vld [vmem:[%s8834_s1 + $0x554] sm:$0xf]  ;;  %v5297_v11 = vor.u32 %v6004_v63, %v5294_v2  ;;  %v2603_v19 = vpop.f32.mrf.mxu3  ;;  %v2616_v63 = vpop.f32.mrf.mxu1 }
 0x137   :  { %v5960_v1 = vld [vmem:[%s8834_s1 + $0xa2c] sm:$0xf0]  ;;  %2884 = vmatpush.bf16.msra.mxu0 %v3857_v21  ;;  %v4494_v5 = vld [vmem:[%s8834_s1 + $0x570] sm:$0xf0]  ;;  %v4276_v63 = vld [vmem:[%s8834_s1 + $0x398] sm:$0xf] }
 0x138   :  { %v5101_v36 = vor.u32 %v5960_v1, %v5100_v58  ;;  %2846 = vmatpush.bf16.msra.mxu3 %v4845_v32  ;;  %v5868_v6 = vld [vmem:[%s8834_s1 + $0x754] sm:$0xf]  ;;  %v4497_v12 = vor.u32 %v5804_v3, %v4494_v5 }
 0x139   :  { %v4750_v7 = vld [vmem:[%s8834_s1 + $0x770] sm:$0xf0] }
 0x13a   :  { %2897 = vmatpush.bf16.msrb.mxu2 %v4113_v30  ;;  %2859 = vmatpush.bf16.msra.mxu1 %v5101_v36  ;;  %v5932_v8 = vld [vmem:[%s8834_s1 + $0x954] sm:$0xf]  ;;  %v4753_v13 = vor.u32 %v5868_v6, %v4750_v7  ;;  %v2615_v36 = vadd.f32 %v2614_v25, %v421_v23 }
 0x13b   :  { %2885 = vmatpush.bf16.msra.mxu0 %v3825_v37  ;;  %2847 = vmatmul.bf16.vlgmr.msra.gmra.mxu3 %v6572_v34  ;;  %v5006_v10 = vld [vmem:[%s8834_s1 + $0x970] sm:$0xf0] }
 0x13c   :  { %2904 = vmatpush.bf16.msrb.mxu3 %v4561_v41  ;;  %v5996_v14 = vld [vmem:[%s8834_s1 + $0xb54] sm:$0xf]  ;;  %v5009_v18 = vor.u32 %v5932_v8, %v5006_v10  ;;  %v2642_v45 = vpop.f32.mrf.mxu0 }
 0x13d   :  { %2860 = vmatmul.bf16.vlgmr.msra.gmra.mxu1 %v6583_v39  ;;  %v5262_v15 = vld [vmem:[%s8834_s1 + $0xb70] sm:$0xf0]  ;;  %v5761_v45 = vld [vmem:[%s8834_s1 + $0x3f4] sm:$0xf0] }
 0x13e   :  { %2917 = vmatpush.bf16.msrb.mxu1 %v4817_v42  ;;  %2898 = vmatpush.bf16.msrb.mxu2 %v4081_v54  ;;  %v5796_v17 = vld [vmem:[%s8834_s1 + $0x514] sm:$0xf]  ;;  %v5265_v24 = vor.u32 %v5996_v14, %v5262_v15  ;;  %v2627_v49 = vpop.f32.mrf.mxu3 }
 0x13f   :  { %2930 = vmatpush.bf16.msrb.mxu0 %v5073_v46  ;;  %v4462_v20 = vld [vmem:[%s8834_s1 + $0x530] sm:$0xf0]  ;;  %v2628_v55 = vadd.f32 %v2627_v49, %v2615_v36 }
 0x140   :  { %2886 = vmatmul.bf16.vlgmr.msra.gmra.mxu0 %v6375_v57  ;;  %2905 = vmatpush.bf16.msrb.mxu3 %v4529_v62  ;;  %v5860_v21 = vld [vmem:[%s8834_s1 + $0x714] sm:$0xf]  ;;  %v4465_v26 = vor.u32 %v5796_v17, %v4462_v20  ;;  %v2653_v62 = vpop.f32.mrf.mxu2 }
 0x141   :  { %v4718_v22 = vld [vmem:[%s8834_s1 + $0x730] sm:$0xf0]  ;;  %2899 = vmatmul.bf16.vlgmr.msrb.gmra.mxu2 %v6405_v9 }
 0x142   :  { %2943 = vmatpush.bf16.msra.mxu2 %v5329_v59  ;;  %2918 = vmatpush.bf16.msrb.mxu1 %v4785_v0  ;;  %v5924_v58 = vld [vmem:[%s8834_s1 + $0x914] sm:$0xf]  ;;  %v4721_v27 = vor.u32 %v5860_v21, %v4718_v22 }
 0x143   :  { %2931 = vmatpush.bf16.msrb.mxu0 %v5041_v4  ;;  %v4974_v1 = vld [vmem:[%s8834_s1 + $0x930] sm:$0xf0]  ;;  %v2641_v4 = vadd.f32 %v2640_v16, %v2628_v55 }
 0x144   :  { %2906 = vmatpush.bf16.msrb.mxu3 %v4497_v12  ;;  %v5988_v28 = vld [vmem:[%s8834_s1 + $0xb14] sm:$0xf]  ;;  %v4977_v61 = vor.u32 %v5924_v58, %v4974_v1  ;;  %v7961_v1 = vpop.f32.mrf.mxu0 }
 0x145   :  { %v5230_v29 = vld [vmem:[%s8834_s1 + $0xb30] sm:$0xf0] }
 0x146   :  { %2944 = vmatpush.bf16.msra.mxu2 %v5297_v11  ;;  %2919 = vmatpush.bf16.msrb.mxu1 %v4753_v13  ;;  %v5788_v30 = vld [vmem:[%s8834_s1 + $0x4d4] sm:$0xf]  ;;  %v5233_v40 = vor.u32 %v5988_v28, %v5230_v29  ;;  %v7938_v13 = vadd.f32 %v2653_v62, %v2641_v4  ;;  %v4052_v28 = vld [vmem:[%s8834_s1 + $0x1d8] sm:$0xf] }
 0x147   :  { %2932 = vmatpush.bf16.msrb.mxu0 %v5009_v18  ;;  %v4430_v32 = vld [vmem:[%s8834_s1 + $0x4f0] sm:$0xf0]  ;;  %v5697_v29 = vld [vmem:[%s8834_s1 + $0x1f4] sm:$0xf0] }
 0x148   :  { %v5852_v33 = vld [vmem:[%s8834_s1 + $0x6d4] sm:$0xf]  ;;  %2907 = vmatpush.bf16.msrb.mxu3 %v4465_v26  ;;  %v4433_v41 = vor.u32 %v5788_v30, %v4430_v32  ;;  %v4564_v30 = vld [vmem:[%s8834_s1 + $0x5d8] sm:$0xf] }
 0x149   :  { %v4686_v35 = vld [vmem:[%s8834_s1 + $0x6f0] sm:$0xf0]  ;;  %v5753_v4 = vld [vmem:[%s8834_s1 + $0x3b4] sm:$0xf0] }
 0x14a   :  { %v5916_v37 = vld [vmem:[%s8834_s1 + $0x8d4] sm:$0xf]  ;;  %2945 = vmatpush.bf16.msra.mxu2 %v5265_v24  ;;  %2920 = vmatpush.bf16.msrb.mxu1 %v4721_v27  ;;  %v4689_v42 = vor.u32 %v5852_v33, %v4686_v35  ;;  %v2629_v27 = vpop.f32.mrf.mxu3  ;;  %v5825_v33 = vld [vmem:[%s8834_s1 + $0x5f4] sm:$0xf0] }
 0x14b   :  { %v4942_v38 = vld [vmem:[%s8834_s1 + $0x8f0] sm:$0xf0]  ;;  %2933 = vmatpush.bf16.msrb.mxu0 %v4977_v61  ;;  %v2655_v61 = vpop.f32.mrf.mxu2  ;;  %v4565_v49 = vor.u32 %v5825_v33, %v4564_v30  ;;  %v5737_v30 = vld [vmem:[%s8834_s1 + $0x334] sm:$0xf0] }
 0x14c   :  { %v5980_v43 = vld [vmem:[%s8834_s1 + $0xad4] sm:$0xf]  ;;  %v4945_v47 = vor.u32 %v5916_v37, %v4942_v38  ;;  %2908 = vmatpush.bf16.msrb.mxu3 %v4433_v41  ;;  %v4724_v61 = vld [vmem:[%s8834_s1 + $0x718] sm:$0xf] }
 0x14d   :  { %v5198_v44 = vld [vmem:[%s8834_s1 + $0xaf0] sm:$0xf0] }
 0x14e   :  { %v5780_v46 = vld [vmem:[%s8834_s1 + $0x494] sm:$0xf]  ;;  %2946 = vmatpush.bf16.msra.mxu2 %v5233_v40  ;;  %v5201_v0 = vor.u32 %v5980_v43, %v5198_v44  ;;  %2921 = vmatpush.bf16.msrb.mxu1 %v4689_v42  ;;  %v4308_v42 = vld [vmem:[%s8834_s1 + $0x3d8] sm:$0xf]  ;;  %v4053_v44 = vor.u32 %v5697_v29, %v4052_v28 }
 0x14f   :  { %v4398_v50 = vld [vmem:[%s8834_s1 + $0x4b0] sm:$0xf0]  ;;  %2934 = vmatpush.bf16.msrb.mxu0 %v4945_v47  ;;  %v5889_v47 = vld [vmem:[%s8834_s1 + $0x7f4] sm:$0xf0]  ;;  %v4309_v62 = vor.u32 %v5761_v45, %v4308_v42  ;;  %v8106_v45 = vld [vmem:[%s8836_s2] sm:$0xff] }
 0x150   :  { %v5844_v51 = vld [vmem:[%s8834_s1 + $0x694] sm:$0xf]  ;;  %v4401_v2 = vor.u32 %v5780_v46, %v4398_v50  ;;  %v4820_v46 = vld [vmem:[%s8834_s1 + $0x7d8] sm:$0xf] }
 0x151   :  { %v4654_v54 = vld [vmem:[%s8834_s1 + $0x6b0] sm:$0xf0]  ;;  %v4212_v28 = vld [vmem:[%s8834_s1 + $0x318] sm:$0xf] }
 0x152   :  { %v5908_v56 = vld [vmem:[%s8834_s1 + $0x894] sm:$0xf]  ;;  %v4657_v3 = vor.u32 %v5844_v51, %v4654_v54  ;;  %2947 = vmatpush.bf16.msra.mxu2 %v5201_v0  ;;  %2909 = vmatpush.bf16.msrb.mxu3 %v4401_v2  ;;  %v4020_v51 = vld [vmem:[%s8834_s1 + $0x198] sm:$0xf]  ;;  %v4821_v0 = vor.u32 %v5889_v47, %v4820_v46  ;;  %v2694_v2 = vpop.f32.mrf.mxu0  ;;  %v422_v46 = vperm.slane %v8106_v45, 3 }
 0x153   :  { %v4910_v59 = vld [vmem:[%s8834_s1 + $0x8b0] sm:$0xf0]  ;;  %v5689_v54 = vld [vmem:[%s8834_s1 + $0x1b4] sm:$0xf0] }
 0x154   :  { %v5972_v5 = vld [vmem:[%s8834_s1 + $0xa94] sm:$0xf]  ;;  %v4913_v8 = vor.u32 %v5908_v56, %v4910_v59  ;;  %2922 = vmatpush.bf16.msrb.mxu1 %v4657_v3  ;;  %v4532_v56 = vld [vmem:[%s8834_s1 + $0x598] sm:$0xf]  ;;  %v4021_v3 = vor.u32 %v5689_v54, %v4020_v51  ;;  %v2705_v2 = vpop.f32.mrf.mxu2 }
 0x155   :  { %v5166_v6 = vld [vmem:[%s8834_s1 + $0xab0] sm:$0xf0]  ;;  %v5817_v59 = vld [vmem:[%s8834_s1 + $0x5b4] sm:$0xf0] }
 0x156   :  { %v5772_v7 = vld [vmem:[%s8834_s1 + $0x454] sm:$0xf]  ;;  %v5169_v16 = vor.u32 %v5972_v5, %v5166_v6  ;;  %2935 = vmatpush.bf16.msrb.mxu0 %v4913_v8  ;;  %v4788_v5 = vld [vmem:[%s8834_s1 + $0x798] sm:$0xf] }
 0x157   :  { %v4366_v10 = vld [vmem:[%s8834_s1 + $0x470] sm:$0xf0]  ;;  %v5881_v6 = vld [vmem:[%s8834_s1 + $0x7b4] sm:$0xf0] }
 0x158   :  { %v5836_v11 = vld [vmem:[%s8834_s1 + $0x654] sm:$0xf]  ;;  %v4369_v19 = vor.u32 %v5772_v7, %v4366_v10  ;;  %2948 = vmatpush.bf16.msra.mxu2 %v5169_v16  ;;  %v4533_v7 = vor.u32 %v5817_v59, %v4532_v56  ;;  %v3988_v8 = vld [vmem:[%s8834_s1 + $0x158] sm:$0xf]  ;;  %v2679_v59 = vpop.f32.mrf.mxu3 }
 0x159   :  { %v4622_v12 = vld [vmem:[%s8834_s1 + $0x670] sm:$0xf0]  ;;  %v5681_v10 = vld [vmem:[%s8834_s1 + $0x174] sm:$0xf0] }
 0x15a   :  { %v5900_v14 = vld [vmem:[%s8834_s1 + $0x854] sm:$0xf]  ;;  %v4625_v20 = vor.u32 %v5836_v11, %v4622_v12  ;;  %2910 = vmatpush.bf16.msrb.mxu3 %v4369_v19  ;;  %v4500_v11 = vld [vmem:[%s8834_s1 + $0x558] sm:$0xf] }
 0x15b   :  { %v4878_v15 = vld [vmem:[%s8834_s1 + $0x870] sm:$0xf0]  ;;  %v5809_v12 = vld [vmem:[%s8834_s1 + $0x574] sm:$0xf0] }
 0x15c   :  { %v5964_v17 = vld [vmem:[%s8834_s1 + $0xa54] sm:$0xf]  ;;  %v4881_v23 = vor.u32 %v5900_v14, %v4878_v15  ;;  %2923 = vmatpush.bf16.msrb.mxu1 %v4625_v20  ;;  %v4277_v14 = vor.u32 %v5753_v4, %v4276_v63  ;;  %v4789_v15 = vor.u32 %v5881_v6, %v4788_v5  ;;  %v4244_v16 = vld [vmem:[%s8834_s1 + $0x358] sm:$0xf]  ;;  %v2706_v6 = vadd.f32 %v2705_v2, %v422_v46 }
 0x15d   :  { %v5134_v18 = vld [vmem:[%s8834_s1 + $0xa70] sm:$0xf0]  ;;  %v5745_v19 = vld [vmem:[%s8834_s1 + $0x374] sm:$0xf0] }
 0x15e   :  { %v5764_v21 = vld [vmem:[%s8834_s1 + $0x414] sm:$0xf]  ;;  %v5137_v32 = vor.u32 %v5964_v17, %v5134_v18  ;;  %2936 = vmatpush.bf16.msrb.mxu0 %v4881_v23  ;;  %v2666_v17 = vpop.f32.mrf.mxu1  ;;  %v3989_v18 = vor.u32 %v5681_v10, %v3988_v8  ;;  %v4756_v20 = vld [vmem:[%s8834_s1 + $0x758] sm:$0xf] }
 0x15f   :  { %v4334_v22 = vld [vmem:[%s8834_s1 + $0x430] sm:$0xf0]  ;;  %v3956_v23 = vld [vmem:[%s8834_s1 + $0x118] sm:$0xf] }
 0x160   :  { %v5828_v58 = vld [vmem:[%s8834_s1 + $0x614] sm:$0xf]  ;;  %v4337_v37 = vor.u32 %v5764_v21, %v4334_v22  ;;  %2949 = vmatpush.bf16.msra.mxu2 %v5137_v32  ;;  %v5873_v21 = vld [vmem:[%s8834_s1 + $0x774] sm:$0xf0]  ;;  %v2667_v22 = vadd.f32 %v2666_v17, %v7938_v13 }
 0x161   :  { %v4590_v24 = vld [vmem:[%s8834_s1 + $0x630] sm:$0xf0]  ;;  %v5801_v13 = vld [vmem:[%s8834_s1 + $0x534] sm:$0xf0]  ;;  %v4757_v27 = vor.u32 %v5873_v21, %v4756_v20 }
 0x162   :  { %v5892_v25 = vld [vmem:[%s8834_s1 + $0x814] sm:$0xf]  ;;  %v4593_v38 = vor.u32 %v5828_v58, %v4590_v24  ;;  %2911 = vmatpush.bf16.msrb.mxu3 %v4337_v37  ;;  %v4501_v58 = vor.u32 %v5809_v12, %v4500_v11  ;;  %v5673_v24 = vld [vmem:[%s8834_s1 + $0x134] sm:$0xf0]  ;;  %v2718_v37 = vpop.f32.mrf.mxu0 }
 0x163   :  { %v4846_v26 = vld [vmem:[%s8834_s1 + $0x830] sm:$0xf0]  ;;  %v3957_v29 = vor.u32 %v5673_v24, %v3956_v23  ;;  %v5865_v32 = vld [vmem:[%s8834_s1 + $0x734] sm:$0xf0]  ;;  %v8148_v17 = vadd.f32 %v2718_v37, %v2706_v6 }
 0x164   :  { %v6020_v35 = vld [vmem:[%s8834_s1 + $0xc14] sm:$0xf]  ;;  %v4849_v43 = vor.u32 %v5892_v25, %v4846_v26  ;;  %2924 = vmatpush.bf16.msrb.mxu1 %v4593_v38  ;;  %v4468_v25 = vld [vmem:[%s8834_s1 + $0x518] sm:$0xf]  ;;  %v4245_v26 = vor.u32 %v5745_v19, %v4244_v16  ;;  %v4725_v42 = vor.u32 %v5865_v32, %v4724_v61  ;;  %v2681_v32 = vpop.f32.mrf.mxu3 }
 0x165   :  { %v5358_v36 = vld [vmem:[%s8834_s1 + $0xc30] sm:$0xf0]  ;;  %2912 = vmatmul.bf16.vlgmr.msrb.gmra.mxu3 %v6364_v53  ;;  %v4469_v33 = vor.u32 %v5801_v13, %v4468_v25  ;;  %v4436_v38 = vld [vmem:[%s8834_s1 + $0x4d8] sm:$0xf] }
 0x166   :  { %v5956_v40 = vld [vmem:[%s8834_s1 + $0xa14] sm:$0xf]  ;;  %v5361_v50 = vor.u32 %v6020_v35, %v5358_v36  ;;  %2937 = vmatpush.bf16.msrb.mxu0 %v4849_v43  ;;  %v3924_v35 = vld [vmem:[%s8834_s1 + $0xd8] sm:$0xf]  ;;  %v2668_v51 = vpop.f32.mrf.mxu1 }
 0x167   :  { %v5102_v41 = vld [vmem:[%s8834_s1 + $0xa30] sm:$0xf0]  ;;  %2925 = vmatmul.bf16.vlgmr.msrb.gmra.mxu1 %v6377_v60  ;;  %v5665_v36 = vld [vmem:[%s8834_s1 + $0xf4] sm:$0xf0]  ;;  %v5693_v51 = vld [vmem:[%s8834_s1 + $0x1dc] sm:$0xf] }
 0x168   :  { %v5105_v55 = vor.u32 %v5956_v40, %v5102_v41  ;;  %2969 = vmatpush.bf16.msra.mxu1 %v4053_v44  ;;  %2963 = vmatpush.bf16.msra.mxu3 %v5361_v50  ;;  %v5793_v40 = vld [vmem:[%s8834_s1 + $0x4f4] sm:$0xf0]  ;;  %v4213_v41 = vor.u32 %v5737_v30, %v4212_v28  ;;  %v3925_v47 = vor.u32 %v5665_v36, %v3924_v35 }
 0x169   :  { %2938 = vmatmul.bf16.vlgmr.msrb.gmra.mxu0 %v6572_v34  ;;  %v4180_v43 = vld [vmem:[%s8834_s1 + $0x2d8] sm:$0xf]  ;;  %v4437_v54 = vor.u32 %v5793_v40, %v4436_v38 }
 0x16a   :  { %2995 = vmatpush.bf16.msra.mxu0 %v4565_v49  ;;  %2950 = vmatpush.bf16.msra.mxu2 %v5105_v55  ;;  %v5729_v44 = vld [vmem:[%s8834_s1 + $0x2f4] sm:$0xf0] }
 0x16b   :  { %v4692_v49 = vld [vmem:[%s8834_s1 + $0x6d8] sm:$0xf] }
 0x16c   :  { %2982 = vmatpush.bf16.msrb.mxu3 %v4309_v62  ;;  %2970 = vmatpush.bf16.msra.mxu1 %v4021_v3  ;;  %v5857_v50 = vld [vmem:[%s8834_s1 + $0x6f4] sm:$0xf0]  ;;  %v4181_v62 = vor.u32 %v5729_v44, %v4180_v43  ;;  %v2680_v3 = vadd.f32 %v2679_v59, %v2667_v22  ;;  %v4310_v59 = vld [vmem:[%s8834_s1 + $0x3f8] sm:$0xf0] }
 0x16d   :  { %2951 = vmatmul.bf16.vlgmr.msra.gmra.mxu2 %v6583_v39  ;;  %v3892_v55 = vld [vmem:[%s8834_s1 + $0x98] sm:$0xf]  ;;  %v4693_v4 = vor.u32 %v5857_v50, %v4692_v49 }
 0x16e   :  { %3008 = vmatpush.bf16.msrb.mxu2 %v4821_v0  ;;  %2996 = vmatpush.bf16.msra.mxu0 %v4533_v7  ;;  %v5657_v56 = vld [vmem:[%s8834_s1 + $0xb4] sm:$0xf0]  ;;  %v8140_v12 = vadd.f32 %v7961_v1, %v2680_v3 }
 0x16f   :  { %v4404_v0 = vld [vmem:[%s8834_s1 + $0x498] sm:$0xf]  ;;  %v3893_v7 = vor.u32 %v5657_v56, %v3892_v55  ;;  %v4054_v55 = vld [vmem:[%s8834_s1 + $0x1f8] sm:$0xf0] }
 0x170   :  { %2983 = vmatpush.bf16.msrb.mxu3 %v4277_v14  ;;  %2971 = vmatpush.bf16.msra.mxu1 %v3989_v18  ;;  %v5785_v63 = vld [vmem:[%s8834_s1 + $0x4b4] sm:$0xf0]  ;;  %v2720_v18 = vpop.f32.mrf.mxu0  ;;  %v5757_v56 = vld [vmem:[%s8834_s1 + $0x3dc] sm:$0xf] }
 0x171   :  { %v4148_v5 = vld [vmem:[%s8834_s1 + $0x298] sm:$0xf]  ;;  %v4405_v14 = vor.u32 %v5785_v63, %v4404_v0 }
 0x172   :  { %3009 = vmatpush.bf16.msrb.mxu2 %v4789_v15  ;;  %2997 = vmatpush.bf16.msra.mxu0 %v4501_v58  ;;  %v5721_v8 = vld [vmem:[%s8834_s1 + $0x2b4] sm:$0xf0] }
 0x173   :  { %v4660_v10 = vld [vmem:[%s8834_s1 + $0x698] sm:$0xf]  ;;  %v4149_v20 = vor.u32 %v5721_v8, %v4148_v5  ;;  %v4313_v5 = vor.u32 %v5757_v56, %v4310_v59  ;;  %v5685_v8 = vld [vmem:[%s8834_s1 + $0x19c] sm:$0xf] }
 0x174   :  { %2984 = vmatpush.bf16.msrb.mxu3 %v4245_v26  ;;  %2972 = vmatpush.bf16.msra.mxu1 %v3957_v29  ;;  %v5849_v11 = vld [vmem:[%s8834_s1 + $0x6b4] sm:$0xf0]  ;;  %v3926_v56 = vld [vmem:[%s8834_s1 + $0xf8] sm:$0xf0] }
 0x175   :  { %v3860_v15 = vld [vmem:[%s8834_s1 + $0x58] sm:$0xf]  ;;  %5375 = vmatmul.msk.bf16.vlgmr.msra.gmra.mxu3 %vm2419_vm0, %v6484_v48  ;;  %v4661_v21 = vor.u32 %v5849_v11, %v4660_v10  ;;  %v4022_v11 = vld [vmem:[%s8834_s1 + $0x1b8] sm:$0xf0] }
 0x176   :  { %3010 = vmatpush.bf16.msrb.mxu2 %v4757_v27  ;;  %2998 = vmatpush.bf16.msra.mxu0 %v4469_v33  ;;  %v5649_v16 = vld [vmem:[%s8834_s1 + $0x74] sm:$0xf0]  ;;  %v2707_v33 = vpop.f32.mrf.mxu2  ;;  %v5725_v59 = vld [vmem:[%s8834_s1 + $0x2dc] sm:$0xf] }
 0x177   :  { %v4372_v1 = vld [vmem:[%s8834_s1 + $0x458] sm:$0xf]  ;;  %v3861_v58 = vor.u32 %v5649_v16, %v3860_v15  ;;  %v4278_v15 = vld [vmem:[%s8834_s1 + $0x3b8] sm:$0xf0] }
 0x178   :  { %2985 = vmatpush.bf16.msrb.mxu3 %v4213_v41  ;;  %2973 = vmatpush.bf16.msra.mxu1 %v3925_v47  ;;  %v5777_v19 = vld [vmem:[%s8834_s1 + $0x474] sm:$0xf0] }
 0x179   :  { %v4116_v22 = vld [vmem:[%s8834_s1 + $0x258] sm:$0xf]  ;;  %v4373_v13 = vor.u32 %v5777_v19, %v4372_v1  ;;  %v4025_v19 = vor.u32 %v5685_v8, %v4022_v11  ;;  %v5653_v11 = vld [vmem:[%s8834_s1 + $0x9c] sm:$0xf] }
 0x17a   :  { %3011 = vmatpush.bf16.msrb.mxu2 %v4725_v42  ;;  %2999 = vmatpush.bf16.msra.mxu0 %v4437_v54  ;;  %v5713_v23 = vld [vmem:[%s8834_s1 + $0x274] sm:$0xf0] }
 0x17b   :  { %v4628_v24 = vld [vmem:[%s8834_s1 + $0x658] sm:$0xf]  ;;  %v4117_v35 = vor.u32 %v5713_v23, %v4116_v22  ;;  %v2731_v23 = vpop.f32.mrf.mxu1 }
 0x17c   :  { %2986 = vmatpush.bf16.msrb.mxu3 %v4181_v62  ;;  %2974 = vmatpush.bf16.msra.mxu1 %v3893_v7  ;;  %v5841_v25 = vld [vmem:[%s8834_s1 + $0x674] sm:$0xf0] }
 0x17d   :  { %v3828_v26 = vld [vmem:[%s8834_s1 + $0x18] sm:$0xf]  ;;  %v4629_v36 = vor.u32 %v5841_v25, %v4628_v24  ;;  %v3990_v25 = vld [vmem:[%s8834_s1 + $0x178] sm:$0xf0] }
 0x17e   :  { %3012 = vmatpush.bf16.msrb.mxu2 %v4693_v4  ;;  %3000 = vmatpush.bf16.msra.mxu0 %v4405_v14  ;;  %v5641_v27 = vld [vmem:[%s8834_s1 + $0x34] sm:$0xf0]  ;;  %v4057_v4 = vor.u32 %v5693_v51, %v4054_v55  ;;  %v5749_v14 = vld [vmem:[%s8834_s1 + $0x39c] sm:$0xf] }
 0x17f   :  { %v4340_v28 = vld [vmem:[%s8834_s1 + $0x418] sm:$0xf]  ;;  %v3829_v41 = vor.u32 %v5641_v27, %v3828_v26  ;;  %v4246_v26 = vld [vmem:[%s8834_s1 + $0x378] sm:$0xf0]  ;;  %v2732_v27 = vadd.f32 %v2731_v23, %v8148_v17 }
 0x180   :  { %v5769_v29 = vld [vmem:[%s8834_s1 + $0x434] sm:$0xf0]  ;;  %2987 = vmatpush.bf16.msrb.mxu3 %v4149_v20  ;;  %2975 = vmatpush.bf16.msra.mxu1 %v3861_v58  ;;  %v4281_v20 = vor.u32 %v5749_v14, %v4278_v15  ;;  %v5677_v58 = vld [vmem:[%s8834_s1 + $0x15c] sm:$0xf] }
 0x181   :  { %v5076_v30 = vld [vmem:[%s8834_s1 + $0x9d8] sm:$0xf]  ;;  %v4341_v46 = vor.u32 %v5769_v29, %v4340_v28  ;;  %v5661_v51 = vld [vmem:[%s8834_s1 + $0xdc] sm:$0xf] }
 0x182   :  { %v5953_v61 = vld [vmem:[%s8834_s1 + $0x9f4] sm:$0xf0]  ;;  %3013 = vmatpush.bf16.msrb.mxu2 %v4661_v21  ;;  %3001 = vmatpush.bf16.msra.mxu0 %v4373_v13  ;;  %v5741_v13 = vld [vmem:[%s8834_s1 + $0x35c] sm:$0xf] }
 0x183   :  { %v4084_v37 = vld [vmem:[%s8834_s1 + $0x218] sm:$0xf]  ;;  %v5077_v47 = vor.u32 %v5953_v61, %v5076_v30  ;;  %v3993_v61 = vor.u32 %v5677_v58, %v3990_v25  ;;  %v4249_v32 = vor.u32 %v5741_v13, %v4246_v26  ;;  %v3894_v15 = vld [vmem:[%s8834_s1 + $0xb8] sm:$0xf0] }
 0x184   :  { %v5364_v38 = vld [vmem:[%s8834_s1 + $0xc18] sm:$0xf]  ;;  %2988 = vmatpush.bf16.msrb.mxu3 %v4117_v35  ;;  %2976 = vmatpush.bf16.msra.mxu1 %v3829_v41  ;;  %v5669_v35 = vld [vmem:[%s8834_s1 + $0x11c] sm:$0xf]  ;;  %v3897_v23 = vor.u32 %v5653_v11, %v3894_v15 }
 0x185   :  { %v6025_v40 = vld [vmem:[%s8834_s1 + $0xc34] sm:$0xf0]  ;;  %v5645_v26 = vld [vmem:[%s8834_s1 + $0x5c] sm:$0xf] }
 0x186   :  { %v5705_v42 = vld [vmem:[%s8834_s1 + $0x234] sm:$0xf0]  ;;  %v5365_v54 = vor.u32 %v6025_v40, %v5364_v38  ;;  %3014 = vmatpush.bf16.msrb.mxu2 %v4629_v36  ;;  %3002 = vmatpush.bf16.msra.mxu0 %v4341_v46  ;;  %v5733_v38 = vld [vmem:[%s8834_s1 + $0x31c] sm:$0xf] }
 0x187   :  { %v4596_v43 = vld [vmem:[%s8834_s1 + $0x618] sm:$0xf]  ;;  %v4085_v62 = vor.u32 %v5705_v42, %v4084_v37  ;;  %2977 = vmatmul.bf16.vlgmr.msra.gmra.mxu1 %v6375_v57  ;;  %v3958_v37 = vld [vmem:[%s8834_s1 + $0x138] sm:$0xf0] }
 0x188   :  { %v5833_v44 = vld [vmem:[%s8834_s1 + $0x634] sm:$0xf0]  ;;  %3021 = vmatpush.bf16.msrb.mxu1 %v5077_v47  ;;  %v4214_v40 = vld [vmem:[%s8834_s1 + $0x338] sm:$0xf0]  ;;  %v3961_v46 = vor.u32 %v5669_v35, %v3958_v37 }
 0x189   :  { %v5332_v49 = vld [vmem:[%s8834_s1 + $0xbd8] sm:$0xf]  ;;  %v4597_v0 = vor.u32 %v5833_v44, %v4596_v43  ;;  %2989 = vmatpush.bf16.msrb.mxu3 %v4085_v62  ;;  %3003 = vmatmul.bf16.vlgmr.msra.gmra.mxu0 %v6364_v53  ;;  %v2770_v43 = vpop.f32.mrf.mxu0  ;;  %v4217_v47 = vor.u32 %v5733_v38, %v4214_v40  ;;  %v4182_v62 = vld [vmem:[%s8834_s1 + $0x2f8] sm:$0xf0] }
 0x18a   :  { %v6017_v50 = vld [vmem:[%s8834_s1 + $0xbf4] sm:$0xf0]  ;;  %3054 = vmatpush.bf16.msrb.mxu0 %v5365_v54  ;;  %v2733_v54 = vpop.f32.mrf.mxu1  ;;  %v4566_v37 = vld [vmem:[%s8834_s1 + $0x5f8] sm:$0xf0] }
 0x18b   :  { %v5044_v63 = vld [vmem:[%s8834_s1 + $0x998] sm:$0xf]  ;;  %v5333_v3 = vor.u32 %v6017_v50, %v5332_v49  ;;  %3015 = vmatpush.bf16.msrb.mxu2 %v4597_v0  ;;  %v4790_v15 = vld [vmem:[%s8834_s1 + $0x7b8] sm:$0xf0] }
 0x18c   :  { %v5945_v2 = vld [vmem:[%s8834_s1 + $0x9b4] sm:$0xf0]  ;;  %2990 = vmatmul.bf16.vlgmr.msrb.gmra.mxu3 %v6405_v9 }
 0x18d   :  { %v5300_v6 = vld [vmem:[%s8834_s1 + $0xb98] sm:$0xf]  ;;  %v5045_v10 = vor.u32 %v5945_v2, %v5044_v63  ;;  %3034 = vmatpush.bf16.msra.mxu3 %v5333_v3  ;;  %v2744_v2 = vpop.f32.mrf.mxu3  ;;  %v2757_v3 = vpop.f32.mrf.mxu2 }
 0x18e   :  { %v6009_v7 = vld [vmem:[%s8834_s1 + $0xbb4] sm:$0xf0]  ;;  %3073 = vmatpush.bf16.msra.mxu0 %v4313_v5  ;;  %3016 = vmatmul.bf16.vlgmr.msrb.gmra.mxu2 %v6377_v60  ;;  %v2745_v5 = vadd.f32 %v2744_v2, %v2732_v27  ;;  %v5334_v2 = vld [vmem:[%s8834_s1 + $0xbf8] sm:$0xf0] }
 0x18f   :  { %v5012_v16 = vld [vmem:[%s8834_s1 + $0x958] sm:$0xf]  ;;  %v5301_v1 = vor.u32 %v6009_v7, %v5300_v6  ;;  %3060 = vmatpush.bf16.msra.mxu2 %v4057_v4  ;;  %3022 = vmatpush.bf16.msrb.mxu1 %v5045_v10  ;;  %v3929_v6 = vor.u32 %v5661_v51, %v3926_v56  ;;  %v4185_v7 = vor.u32 %v5725_v59, %v4182_v62  ;;  %v4086_v51 = vld [vmem:[%s8834_s1 + $0x238] sm:$0xf0] }
 0x190   :  { %v5937_v18 = vld [vmem:[%s8834_s1 + $0x974] sm:$0xf0]  ;;  %v4822_v56 = vld [vmem:[%s8834_s1 + $0x7f8] sm:$0xf0] }
 0x191   :  { %v5268_v21 = vld [vmem:[%s8834_s1 + $0xb58] sm:$0xf]  ;;  %v5013_v24 = vor.u32 %v5937_v18, %v5012_v16  ;;  %3035 = vmatpush.bf16.msra.mxu3 %v5301_v1  ;;  %v5717_v16 = vld [vmem:[%s8834_s1 + $0x29c] sm:$0xf]  ;;  %v2758_v1 = vadd.f32 %v2757_v3, %v2745_v5 }
 0x192   :  { %v6001_v22 = vld [vmem:[%s8834_s1 + $0xb74] sm:$0xf0]  ;;  %3074 = vmatpush.bf16.msra.mxu0 %v4281_v20  ;;  %v4150_v18 = vld [vmem:[%s8834_s1 + $0x2b8] sm:$0xf0]  ;;  %v2783_v27 = vpop.f32.mrf.mxu1 }
 0x193   :  { %v4980_v28 = vld [vmem:[%s8834_s1 + $0x918] sm:$0xf]  ;;  %v5269_v30 = vor.u32 %v6001_v22, %v5268_v21  ;;  %3061 = vmatpush.bf16.msra.mxu2 %v4025_v19  ;;  %3023 = vmatpush.bf16.msrb.mxu1 %v5013_v24  ;;  %v2772_v21 = vpop.f32.mrf.mxu0  ;;  %v2771_v58 = vadd.f32 %v2770_v43, %v2758_v1  ;;  %v4153_v24 = vor.u32 %v5717_v16, %v4150_v18  ;;  %v5949_v59 = vld [vmem:[%s8834_s1 + $0x9dc] sm:$0xf] }
 0x194   :  { %v5929_v29 = vld [vmem:[%s8834_s1 + $0x934] sm:$0xf0]  ;;  %v4534_v5 = vld [vmem:[%s8834_s1 + $0x5b8] sm:$0xf0] }
 0x195   :  { %v5236_v17 = vld [vmem:[%s8834_s1 + $0xb18] sm:$0xf]  ;;  %v4981_v36 = vor.u32 %v5929_v29, %v4980_v28  ;;  %3036 = vmatpush.bf16.msra.mxu3 %v5269_v30  ;;  %v3862_v29 = vld [vmem:[%s8834_s1 + $0x78] sm:$0xf0]  ;;  %v2759_v38 = vpop.f32.mrf.mxu2  ;;  %v2746_v40 = vpop.f32.mrf.mxu3 }
 0x196   :  { %v5993_v33 = vld [vmem:[%s8834_s1 + $0xb34] sm:$0xf0]  ;;  %3075 = vmatpush.bf16.msra.mxu0 %v4249_v32  ;;  %v5709_v30 = vld [vmem:[%s8834_s1 + $0x25c] sm:$0xf]  ;;  %v8375_v32 = vadd.f32 %v2783_v27, %v2771_v58 }
 0x197   :  { %v4948_v41 = vld [vmem:[%s8834_s1 + $0x8d8] sm:$0xf]  ;;  %v5237_v44 = vor.u32 %v5993_v33, %v5236_v17  ;;  %3062 = vmatpush.bf16.msra.mxu2 %v3993_v61  ;;  %3024 = vmatpush.bf16.msrb.mxu1 %v4981_v36  ;;  %v4118_v61 = vld [vmem:[%s8834_s1 + $0x278] sm:$0xf0] }
 0x198   :  { %v5921_v42 = vld [vmem:[%s8834_s1 + $0x8f4] sm:$0xf0]  ;;  %v5821_v36 = vld [vmem:[%s8834_s1 + $0x5dc] sm:$0xf] }
 0x199   :  { %v5204_v49 = vld [vmem:[%s8834_s1 + $0xad8] sm:$0xf]  ;;  %v4949_v55 = vor.u32 %v5921_v42, %v4948_v41  ;;  %3037 = vmatpush.bf16.msra.mxu3 %v5237_v44  ;;  %5376 = vmatmul.msk.bf16.vlgmr.msrb.gmra.mxu0 %vm2419_vm0, %v6484_v48  ;;  %v3865_v41 = vor.u32 %v5645_v26, %v3862_v29  ;;  %v4121_v42 = vor.u32 %v5709_v30, %v4118_v61  ;;  %v5941_v16 = vld [vmem:[%s8834_s1 + $0x99c] sm:$0xf] }
 0x19a   :  { %v5985_v50 = vld [vmem:[%s8834_s1 + $0xaf4] sm:$0xf0]  ;;  %3076 = vmatpush.bf16.msra.mxu0 %v4217_v47  ;;  %v4569_v54 = vor.u32 %v5821_v36, %v4566_v37  ;;  %v5046_v1 = vld [vmem:[%s8834_s1 + $0x9b8] sm:$0xf0] }
 0x19b   :  { %v4916_v0 = vld [vmem:[%s8834_s1 + $0x898] sm:$0xf]  ;;  %v5205_v4 = vor.u32 %v5985_v50, %v5204_v49  ;;  %3063 = vmatpush.bf16.msra.mxu2 %v3961_v46  ;;  %3025 = vmatpush.bf16.msrb.mxu1 %v4949_v55  ;;  %v5637_v46 = vld [vmem:[%s8834_s1 + $0x1c] sm:$0xf] }
 0x19c   :  { %v5913_v63 = vld [vmem:[%s8834_s1 + $0x8b4] sm:$0xf0]  ;;  %v3830_v49 = vld [vmem:[%s8834_s1 + $0x38] sm:$0xf0] }
 0x19d   :  { %v5172_v8 = vld [vmem:[%s8834_s1 + $0xa98] sm:$0xf]  ;;  %v4917_v14 = vor.u32 %v5913_v63, %v4916_v0  ;;  %3038 = vmatpush.bf16.msra.mxu3 %v5205_v4  ;;  %v5701_v50 = vld [vmem:[%s8834_s1 + $0x21c] sm:$0xf]  ;;  %v3833_v3 = vor.u32 %v5637_v46, %v3830_v49 }
 0x19e   :  { %v5977_v10 = vld [vmem:[%s8834_s1 + $0xab4] sm:$0xf0]  ;;  %3077 = vmatpush.bf16.msra.mxu0 %v4185_v7  ;;  %v5885_v55 = vld [vmem:[%s8834_s1 + $0x7dc] sm:$0xf] }
 0x19f   :  { %v4884_v19 = vld [vmem:[%s8834_s1 + $0x858] sm:$0xf]  ;;  %v5173_v22 = vor.u32 %v5977_v10, %v5172_v8  ;;  %3064 = vmatpush.bf16.msra.mxu2 %v3929_v6  ;;  %3026 = vmatpush.bf16.msrb.mxu1 %v4917_v14  ;;  %v5078_v0 = vld [vmem:[%s8834_s1 + $0x9f8] sm:$0xf0]  ;;  %v4089_v6 = vor.u32 %v5701_v50, %v4086_v51  ;;  %v4825_v7 = vor.u32 %v5885_v55, %v4822_v56  ;;  %v2785_v8 = vpop.f32.mrf.mxu1  ;;  %v423_v50 = vperm.slane %v8106_v45, 4 }
 0x1a0   :  { %v5905_v20 = vld [vmem:[%s8834_s1 + $0x874] sm:$0xf0]  ;;  %v6013_v63 = vld [vmem:[%s8834_s1 + $0xbdc] sm:$0xf]  ;;  %v5081_v10 = vor.u32 %v5949_v59, %v5078_v0 }
 0x1a1   :  { %v5140_v25 = vld [vmem:[%s8834_s1 + $0xa58] sm:$0xf]  ;;  %v4885_v28 = vor.u32 %v5905_v20, %v4884_v19  ;;  %3039 = vmatpush.bf16.msra.mxu3 %v5173_v22  ;;  %v5813_v4 = vld [vmem:[%s8834_s1 + $0x59c] sm:$0xf]  ;;  %v5337_v11 = vor.u32 %v6013_v63, %v5334_v2 }
 0x1a2   :  { %v5969_v13 = vld [vmem:[%s8834_s1 + $0xa74] sm:$0xf0]  ;;  %3078 = vmatpush.bf16.msra.mxu0 %v4153_v24  ;;  %v5877_v14 = vld [vmem:[%s8834_s1 + $0x79c] sm:$0xf]  ;;  %v4537_v18 = vor.u32 %v5813_v4, %v4534_v5 }
 0x1a3   :  { %v4852_v17 = vld [vmem:[%s8834_s1 + $0x818] sm:$0xf]  ;;  %v5141_v35 = vor.u32 %v5969_v13, %v5140_v25  ;;  %3065 = vmatpush.bf16.msra.mxu2 %v3897_v23  ;;  %3027 = vmatpush.bf16.msrb.mxu1 %v4885_v28  ;;  %v6005_v19 = vld [vmem:[%s8834_s1 + $0xb9c] sm:$0xf]  ;;  %v4793_v58 = vor.u32 %v5877_v14, %v4790_v15  ;;  %v5049_v23 = vor.u32 %v5941_v16, %v5046_v1 }
 0x1a4   :  { %v5897_v33 = vld [vmem:[%s8834_s1 + $0x834] sm:$0xf0]  ;;  %v5302_v20 = vld [vmem:[%s8834_s1 + $0xbb8] sm:$0xf0] }
 0x1a5   :  { %v5108_v43 = vld [vmem:[%s8834_s1 + $0xa18] sm:$0xf]  ;;  %v4853_v47 = vor.u32 %v5897_v33, %v4852_v17  ;;  %3040 = vmatpush.bf16.msra.mxu3 %v5141_v35  ;;  %v5805_v21 = vld [vmem:[%s8834_s1 + $0x55c] sm:$0xf]  ;;  %v5305_v24 = vor.u32 %v6005_v19, %v5302_v20 }
 0x1a6   :  { %v5961_v44 = vld [vmem:[%s8834_s1 + $0xa34] sm:$0xf0]  ;;  %3079 = vmatpush.bf16.msra.mxu0 %v4121_v42  ;;  %v4502_v22 = vld [vmem:[%s8834_s1 + $0x578] sm:$0xf0] }
 0x1a7   :  { %v5109_v62 = vor.u32 %v5961_v44, %v5108_v43  ;;  %3066 = vmatpush.bf16.msra.mxu2 %v3865_v41  ;;  %3028 = vmatpush.bf16.msrb.mxu1 %v4853_v47  ;;  %v5869_v25 = vld [vmem:[%s8834_s1 + $0x75c] sm:$0xf]  ;;  %v4505_v27 = vor.u32 %v5805_v21, %v4502_v22  ;;  %v2809_v43 = vpop.f32.mrf.mxu1  ;;  %v2835_v47 = vpop.f32.mrf.mxu0 }
 0x1a8   :  { %v4758_v13 = vld [vmem:[%s8834_s1 + $0x778] sm:$0xf0] }
 0x1a9   :  { %3041 = vmatpush.bf16.msra.mxu3 %v5109_v62  ;;  %v5933_v26 = vld [vmem:[%s8834_s1 + $0x95c] sm:$0xf]  ;;  %v4761_v33 = vor.u32 %v5869_v25, %v4758_v13 }
 0x1aa   :  { %3029 = vmatmul.bf16.vlgmr.msrb.gmra.mxu1 %v6572_v34  ;;  %3080 = vmatpush.bf16.msra.mxu0 %v4089_v6  ;;  %v5014_v28 = vld [vmem:[%s8834_s1 + $0x978] sm:$0xf0] }
 0x1ab   :  { %3086 = vmatpush.bf16.msra.mxu1 %v4569_v54  ;;  %3067 = vmatpush.bf16.msra.mxu2 %v3833_v3  ;;  %v5997_v29 = vld [vmem:[%s8834_s1 + $0xb5c] sm:$0xf]  ;;  %v5017_v35 = vor.u32 %v5933_v26, %v5014_v28  ;;  %v2796_v3 = vpop.f32.mrf.mxu3 }
 0x1ac   :  { %3042 = vmatmul.bf16.vlgmr.msra.gmra.mxu3 %v6583_v39  ;;  %v5270_v30 = vld [vmem:[%s8834_s1 + $0xb78] sm:$0xf0]  ;;  %v2797_v6 = vadd.f32 %v2796_v3, %v423_v50 }
 0x1ad   :  { %3099 = vmatpush.bf16.msrb.mxu3 %v4825_v7  ;;  %v5797_v61 = vld [vmem:[%s8834_s1 + $0x51c] sm:$0xf]  ;;  %3081 = vmatmul.bf16.vlgmr.msra.gmra.mxu0 %v6405_v9  ;;  %v5273_v36 = vor.u32 %v5997_v29, %v5270_v30  ;;  %v2822_v7 = vpop.f32.mrf.mxu2 }
 0x1ae   :  { %3125 = vmatpush.bf16.msrb.mxu0 %v5337_v11  ;;  %v4470_v17 = vld [vmem:[%s8834_s1 + $0x538] sm:$0xf0]  ;;  %3068 = vmatmul.bf16.vlgmr.msra.gmra.mxu2 %v6375_v57 }
 0x1af   :  { %3112 = vmatpush.bf16.msrb.mxu2 %v5081_v10  ;;  %3087 = vmatpush.bf16.msra.mxu1 %v4537_v18  ;;  %v5861_v37 = vld [vmem:[%s8834_s1 + $0x71c] sm:$0xf]  ;;  %v4473_v9 = vor.u32 %v5797_v61, %v4470_v17  ;;  %v2810_v18 = vadd.f32 %v2809_v43, %v2797_v6  ;;  %v2811_v22 = vpop.f32.mrf.mxu1  ;;  %v6032_v6 = vld [vmem:[%s8837_s3 + $0x30] sm:$0xff] }
 0x1b0   :  { %v4726_v38 = vld [vmem:[%s8834_s1 + $0x738] sm:$0xf0] }
 0x1b1   :  { %3100 = vmatpush.bf16.msrb.mxu3 %v4793_v58  ;;  %v5925_v57 = vld [vmem:[%s8834_s1 + $0x91c] sm:$0xf]  ;;  %v4729_v49 = vor.u32 %v5861_v37, %v4726_v38  ;;  %v2823_v25 = vadd.f32 %v2822_v7, %v2810_v18  ;;  %v6040_v7 = vld [vmem:[%s8837_s3 + $0x70] sm:$0xff]  ;;  %v6038_v18 = vld [vmem:[%s8837_s3 + $0x60] sm:$0xff] }
 0x1b2   :  { %3126 = vmatpush.bf16.msrb.mxu0 %v5305_v24  ;;  %v4982_v40 = vld [vmem:[%s8834_s1 + $0x938] sm:$0xf0]  ;;  %v2837_v24 = vpop.f32.mrf.mxu0 }
 0x1b3   :  { %3113 = vmatpush.bf16.msrb.mxu2 %v5049_v23  ;;  %3088 = vmatpush.bf16.msra.mxu1 %v4505_v27  ;;  %v5989_v41 = vld [vmem:[%s8834_s1 + $0xb1c] sm:$0xf]  ;;  %v4985_v51 = vor.u32 %v5925_v57, %v4982_v40  ;;  %v8565_v61 = vadd.f32 %v2835_v47, %v2823_v25  ;;  %v2798_v57 = vpop.f32.mrf.mxu3 }
 0x1b4   :  { %v5238_v42 = vld [vmem:[%s8834_s1 + $0xb38] sm:$0xf0]  ;;  %v6034_v57 = vld [vmem:[%s8837_s3 + $0x40] sm:$0xff] }
 0x1b5   :  { %v5789_v44 = vld [vmem:[%s8834_s1 + $0x4dc] sm:$0xf]  ;;  %3101 = vmatpush.bf16.msrb.mxu3 %v4761_v33  ;;  %v5241_v54 = vor.u32 %v5989_v41, %v5238_v42 }
 0x1b6   :  { %v4438_v46 = vld [vmem:[%s8834_s1 + $0x4f8] sm:$0xf0]  ;;  %3127 = vmatpush.bf16.msrb.mxu0 %v5273_v36 }
 0x1b7   :  { %3114 = vmatpush.bf16.msrb.mxu2 %v5017_v35  ;;  %v5853_v55 = vld [vmem:[%s8834_s1 + $0x6dc] sm:$0xf]  ;;  %3089 = vmatpush.bf16.msra.mxu1 %v4473_v9  ;;  %v4441_v62 = vor.u32 %v5789_v44, %v4438_v46  ;;  %v2824_v9 = vpop.f32.mrf.mxu2 }
 0x1b8   :  { %v4694_v56 = vld [vmem:[%s8834_s1 + $0x6f8] sm:$0xf0]  ;;  %v6042_v9 = vld [vmem:[%s8837_s3 + $0x80] sm:$0xff] }
 0x1b9   :  { %v5917_v59 = vld [vmem:[%s8834_s1 + $0x8dc] sm:$0xf]  ;;  %3102 = vmatpush.bf16.msrb.mxu3 %v4729_v49  ;;  %v4697_v8 = vor.u32 %v5853_v55, %v4694_v56 }
 0x1ba   :  { %v4950_v0 = vld [vmem:[%s8834_s1 + $0x8f8] sm:$0xf0]  ;;  %3128 = vmatpush.bf16.msrb.mxu0 %v5241_v54 }
 0x1bb   :  { %v5981_v63 = vld [vmem:[%s8834_s1 + $0xadc] sm:$0xf]  ;;  %3115 = vmatpush.bf16.msrb.mxu2 %v4985_v51  ;;  %v4953_v10 = vor.u32 %v5917_v59, %v4950_v0  ;;  %3090 = vmatpush.bf16.msra.mxu1 %v4441_v62 }
 0x1bc   :  { %v5206_v2 = vld [vmem:[%s8834_s1 + $0xaf8] sm:$0xf0] }
 0x1bd   :  { %v5781_v4 = vld [vmem:[%s8834_s1 + $0x49c] sm:$0xf]  ;;  %v5209_v11 = vor.u32 %v5981_v63, %v5206_v2  ;;  %3103 = vmatpush.bf16.msrb.mxu3 %v4697_v8  ;;  %v6048_v8 = vld [vmem:[%s8837_s3 + $0xb0] sm:$0xff] }
 0x1be   :  { %v4406_v5 = vld [vmem:[%s8834_s1 + $0x4b8] sm:$0xf0] }
 0x1bf   :  { %v5845_v14 = vld [vmem:[%s8834_s1 + $0x69c] sm:$0xf]  ;;  %v4409_v1 = vor.u32 %v5781_v4, %v4406_v5  ;;  %3116 = vmatpush.bf16.msrb.mxu2 %v4953_v10  ;;  %3129 = vmatpush.bf16.msrb.mxu0 %v5209_v11  ;;  %v8618_v5 = vpop.f32.mrf.mxu2  ;;  %v6031_v10 = vld [vmem:[%s8837_s3 + $0x28] sm:$0xff] }
 0x1c0   :  { %v4662_v15 = vld [vmem:[%s8834_s1 + $0x6b8] sm:$0xf0]  ;;  %v6039_v11 = vld [vmem:[%s8837_s3 + $0x68] sm:$0xff] }
 0x1c1   :  { %v5909_v16 = vld [vmem:[%s8834_s1 + $0x89c] sm:$0xf]  ;;  %v4665_v13 = vor.u32 %v5845_v14, %v4662_v15  ;;  %3091 = vmatpush.bf16.msra.mxu1 %v4409_v1  ;;  %v8650_v15 = vpop.f32.mrf.mxu0  ;;  %v6046_v1 = vld [vmem:[%s8837_s3 + $0xa0] sm:$0xff] }
 0x1c2   :  { %v4918_v19 = vld [vmem:[%s8834_s1 + $0x8b8] sm:$0xf0] }
 0x1c3   :  { %v5973_v20 = vld [vmem:[%s8834_s1 + $0xa9c] sm:$0xf]  ;;  %v4921_v26 = vor.u32 %v5909_v16, %v4918_v19  ;;  %3104 = vmatpush.bf16.msrb.mxu3 %v4665_v13  ;;  %v6030_v16 = vld [vmem:[%s8837_s3 + $0x20] sm:$0xff] }
 0x1c4   :  { %v5174_v21 = vld [vmem:[%s8834_s1 + $0xab8] sm:$0xf0]  ;;  %v6054_v19 = vld [vmem:[%s8837_s3 + $0xe0] sm:$0xff] }
 0x1c5   :  { %v5773_v58 = vld [vmem:[%s8834_s1 + $0x45c] sm:$0xf]  ;;  %v5177_v27 = vor.u32 %v5973_v20, %v5174_v21  ;;  %3117 = vmatpush.bf16.msrb.mxu2 %v4921_v26  ;;  %v8664_v20 = vpop.f32.mrf.mxu3  ;;  %v6028_v26 = vld [vmem:[%s8837_s3 + $0x10] sm:$0xff] }
 0x1c6   :  { %v4374_v23 = vld [vmem:[%s8834_s1 + $0x478] sm:$0xf0] }
 0x1c7   :  { %v5837_v28 = vld [vmem:[%s8834_s1 + $0x65c] sm:$0xf]  ;;  %v4377_v17 = vor.u32 %v5773_v58, %v4374_v23  ;;  %3130 = vmatpush.bf16.msrb.mxu0 %v5177_v27  ;;  %v2876_v14 = vpop.f32.mrf.mxu2  ;;  %v6036_v27 = vld [vmem:[%s8837_s3 + $0x50] sm:$0xff] }
 0x1c8   :  { %v4630_v29 = vld [vmem:[%s8834_s1 + $0x678] sm:$0xf0]  ;;  %v6080_v14 = vld [vmem:[%s8837_s3 + $0x1b0] sm:$0xff] }
 0x1c9   :  { %v5901_v30 = vld [vmem:[%s8834_s1 + $0x85c] sm:$0xf]  ;;  %v4633_v40 = vor.u32 %v5837_v28, %v4630_v29  ;;  %3092 = vmatpush.bf16.msra.mxu1 %v4377_v17  ;;  %v2889_v13 = vpop.f32.mrf.mxu0  ;;  %v6044_v28 = vld [vmem:[%s8837_s3 + $0x90] sm:$0xff]  ;;  %v6035_v17 = vld [vmem:[%s8837_s3 + $0x48] sm:$0xff] }
 0x1ca   :  { %v4886_v33 = vld [vmem:[%s8834_s1 + $0x878] sm:$0xf0] }
 0x1cb   :  { %v5965_v35 = vld [vmem:[%s8834_s1 + $0xa5c] sm:$0xf]  ;;  %v4889_v43 = vor.u32 %v5901_v30, %v4886_v33  ;;  %3105 = vmatpush.bf16.msrb.mxu3 %v4633_v40  ;;  %v6027_v30 = vld [vmem:[%s8837_s3 + $0x8] sm:$0xff]  ;;  %v3152_v40 = vmax.f32 %v7811_v52, 0.0 }
 0x1cc   :  { %v5142_v36 = vld [vmem:[%s8834_s1 + $0xa78] sm:$0xf0]  ;;  %v6043_v33 = vld [vmem:[%s8837_s3 + $0x88] sm:$0xff] }
 0x1cd   :  { %v5765_v37 = vld [vmem:[%s8834_s1 + $0x41c] sm:$0xf]  ;;  %v5145_v44 = vor.u32 %v5965_v35, %v5142_v36  ;;  %3118 = vmatpush.bf16.msrb.mxu2 %v4889_v43  ;;  %v2850_v29 = vpop.f32.mrf.mxu3  ;;  %v6051_v35 = vld [vmem:[%s8837_s3 + $0xc8] sm:$0xff]  ;;  %v3154_v43 = vmax.f32 %v8375_v32, 0.0  ;;  %v3160_v52 = vpack.c.bf16 %v3152_v40, %v3152_v40  ;;  %v6072_v32 = vld [vmem:[%s8837_s3 + $0x170] sm:$0xff] }
 0x1ce   :  { %v4342_v38 = vld [vmem:[%s8834_s1 + $0x438] sm:$0xf0] }
 0x1cf   :  { %v6021_v41 = vld [vmem:[%s8834_s1 + $0xc1c] sm:$0xf]  ;;  %v4345_v49 = vor.u32 %v5765_v37, %v4342_v38  ;;  %3131 = vmatpush.bf16.msrb.mxu0 %v5145_v44  ;;  %v8680_v25 = vpop.f32.mrf.mxu2  ;;  %v6026_v37 = vld [vmem:[%s8837_s3] sm:$0xff]  ;;  %v3151_v38 = vmax.f32 %v7473_v31, 0.0 }
 0x1d0   :  { %v5366_v42 = vld [vmem:[%s8834_s1 + $0xc38] sm:$0xf0] }
 0x1d1   :  { %v5829_v46 = vld [vmem:[%s8834_s1 + $0x61c] sm:$0xf]  ;;  %v5369_v56 = vor.u32 %v6021_v41, %v5366_v42  ;;  %3093 = vmatpush.bf16.msra.mxu1 %v4345_v49  ;;  %v3153_v41 = vmax.f32 %v8140_v12, 0.0  ;;  %v6050_v42 = vld [vmem:[%s8837_s3 + $0xc0] sm:$0xff]  ;;  %v3162_v49 = vpack.c.bf16 %v3154_v43, %v3154_v43 }
 0x1d2   :  { %v4598_v47 = vld [vmem:[%s8834_s1 + $0x638] sm:$0xf0]  ;;  %v6096_v43 = vld [vmem:[%s8836_s2] sm:$0xff] }
 0x1d3   :  { %v5893_v50 = vld [vmem:[%s8834_s1 + $0x81c] sm:$0xf]  ;;  %v4601_v59 = vor.u32 %v5829_v46, %v4598_v47  ;;  %v3159_v46 = vpack.c.bf16 %v3151_v38, %v3151_v38  ;;  %v3161_v12 = vpack.c.bf16 %v3153_v41, %v3153_v41  ;;  %v6064_v47 = vld [vmem:[%s8837_s3 + $0x130] sm:$0xff] }
 0x1d4   :  { %v4854_v51 = vld [vmem:[%s8834_s1 + $0x838] sm:$0xf0]  ;;  %3094 = vmatmul.bf16.vlgmr.msra.gmra.mxu1 %v6364_v53  ;;  %v6056_v53 = vld [vmem:[%s8837_s3 + $0xf0] sm:$0xff] }
 0x1d5   :  { %v5957_v54 = vld [vmem:[%s8834_s1 + $0xa1c] sm:$0xf]  ;;  %v4857_v62 = vor.u32 %v5893_v50, %v4854_v51  ;;  %3145 = vmatpush.bf16.msrb.mxu1 %v5369_v56  ;;  %3106 = vmatpush.bf16.msrb.mxu3 %v4601_v59  ;;  %v424_v50 = vperm.slane %v8106_v45, 5  ;;  %v6063_v51 = vld [vmem:[%s8837_s3 + $0x128] sm:$0xff]  ;;  %v6062_v59 = vld [vmem:[%s8837_s3 + $0x120] sm:$0xff] }
 0x1d6   :  { %v5110_v55 = vld [vmem:[%s8834_s1 + $0xa38] sm:$0xf0] }
 0x1d7   :  { %v5113_v0 = vor.u32 %v5957_v54, %v5110_v55  ;;  %v6033_v63 = vld [vmem:[%s8837_s3 + $0x38] sm:$0xff]  ;;  %3119 = vmatpush.bf16.msrb.mxu2 %v4857_v62  ;;  %v2902_v36 = vpop.f32.mrf.mxu2  ;;  %v6071_v54 = vld [vmem:[%s8837_s3 + $0x168] sm:$0xff]  ;;  %v2888_v55 = vadd.f32 %v8650_v15, %v424_v50  ;;  %v6070_v62 = vld [vmem:[%s8837_s3 + $0x160] sm:$0xff] }
 0x1d8   :  { %v6041_v2 = vld [vmem:[%s8837_s3 + $0x78] sm:$0xff]  ;;  %3107 = vmatmul.bf16.vlgmr.msrb.gmra.mxu3 %v6377_v60  ;;  %v6047_v60 = vld [vmem:[%s8837_s3 + $0xa8] sm:$0xff] }
 0x1d9   :  { %v6049_v3 = vld [vmem:[%s8837_s3 + $0xb8] sm:$0xff]  ;;  %3132 = vmatpush.bf16.msrb.mxu0 %v5113_v0  ;;  %3683 = vmatpush.bf16.msra.mxu3 %v6033_v63  ;;  %v2901_v0 = vadd.f32 %v8680_v25, %v2888_v55 }
 0x1da   :  { %v6057_v4 = vld [vmem:[%s8837_s3 + $0xf8] sm:$0xff]  ;;  %3696 = vmatpush.bf16.msra.mxu1 %v6041_v2  ;;  %3120 = vmatmul.bf16.vlgmr.msrb.gmra.mxu2 %v6572_v34  ;;  %v6055_v34 = vld [vmem:[%s8837_s3 + $0xe8] sm:$0xff] }
 0x1db   :  { %3709 = vmatpush.bf16.msra.mxu2 %v6049_v3  ;;  %v6029_v21 = vld [vmem:[%s8837_s3 + $0x18] sm:$0xff]  ;;  %v2849_v3 = vadd.f32 %v8664_v20, %v8565_v61  ;;  %v6068_v61 = vld [vmem:[%s8837_s3 + $0x150] sm:$0xff]  ;;  %v6079_v20 = vld [vmem:[%s8837_s3 + $0x1a8] sm:$0xff] }
 0x1dc   :  { %3133 = vmatmul.bf16.vlgmr.msrb.gmra.mxu0 %v6583_v39  ;;  %v8648_v39 = vpop.f32.mrf.mxu1  ;;  %v6037_v22 = vld [vmem:[%s8837_s3 + $0x58] sm:$0xff] }
 0x1dd   :  { %3722 = vmatpush.bf16.msra.mxu0 %v6057_v4  ;;  %3684 = vmatpush.bf16.msra.mxu3 %v6032_v6  ;;  %v6045_v58 = vld [vmem:[%s8837_s3 + $0x98] sm:$0xff] }
 0x1de   :  { %3697 = vmatpush.bf16.msra.mxu1 %v6040_v7  ;;  %v6053_v23 = vld [vmem:[%s8837_s3 + $0xd8] sm:$0xff] }
 0x1df   :  { %3710 = vmatpush.bf16.msra.mxu2 %v6048_v8  ;;  %v6065_v31 = vld [vmem:[%s8837_s3 + $0x138] sm:$0xff] }
 0x1e0   :  { %v6073_v44 = vld [vmem:[%s8837_s3 + $0x178] sm:$0xff] }
 0x1e1   :  { %3723 = vmatpush.bf16.msra.mxu0 %v6056_v53  ;;  %3685 = vmatpush.bf16.msra.mxu3 %v6031_v10  ;;  %v6061_v2 = vld [vmem:[%s8837_s3 + $0x118] sm:$0xff]  ;;  %v6060_v53 = vld [vmem:[%s8837_s3 + $0x110] sm:$0xff] }
 0x1e2   :  { %3698 = vmatpush.bf16.msra.mxu1 %v6039_v11  ;;  %v6069_v4 = vld [vmem:[%s8837_s3 + $0x158] sm:$0xff]  ;;  %v2862_v11 = vadd.f32 %v8648_v39, %v2849_v3 }
 0x1e3   :  { %3711 = vmatpush.bf16.msra.mxu2 %v6047_v60  ;;  %v6081_v10 = vld [vmem:[%s8837_s3 + $0x1b8] sm:$0xff] }
 0x1e4   :  { %v2863_v24 = vpop.f32.mrf.mxu1  ;;  %5377 = vmatmul.msk.bf16.vlgmr.msrb.gmra.mxu1 %vm2419_vm0, %v6484_v48  ;;  %v6052_v48 = vld [vmem:[%s8837_s3 + $0xd0] sm:$0xff]  ;;  %v2875_v39 = vadd.f32 %v8618_v5, %v2862_v11  ;;  %v6066_v5 = vld [vmem:[%s8837_s3 + $0x140] sm:$0xff]  ;;  %v6085_v55 = vld [vmem:[%s8837_s3 + $0x1d8] sm:$0xff]  ;;  %v426_v11 = vperm.slane %v6096_v43, 7 }
 0x1e5   :  { %3724 = vmatpush.bf16.msra.mxu0 %v6055_v34  ;;  %3686 = vmatpush.bf16.msra.mxu3 %v6030_v16  ;;  %v6059_v16 = vld [vmem:[%s8837_s3 + $0x108] sm:$0xff] }
 0x1e6   :  { %3699 = vmatpush.bf16.msra.mxu1 %v6038_v18  ;;  %v2939_v56 = vpop.f32.mrf.mxu0  ;;  %v6067_v18 = vld [vmem:[%s8837_s3 + $0x148] sm:$0xff] }
 0x1e7   :  { %3712 = vmatpush.bf16.msra.mxu2 %v6046_v1 }
 0x1e8   :  { %v2913_v63 = vpop.f32.mrf.mxu3 }
 0x1e9   :  { %3725 = vmatpush.bf16.msra.mxu0 %v6054_v19  ;;  %3687 = vmatpush.bf16.msra.mxu3 %v6029_v21  ;;  %v2914_v6 = vadd.f32 %v2913_v63, %v2901_v0  ;;  %v6058_v21 = vld [vmem:[%s8837_s3 + $0x100] sm:$0xff]  ;;  %v6084_v63 = vld [vmem:[%s8837_s3 + $0x1d0] sm:$0xff] }
 0x1ea   :  { %3700 = vmatpush.bf16.msra.mxu1 %v6037_v22  ;;  %v3155_v22 = vmax.f32 %v2875_v39, 0.0 }
 0x1eb   :  { %3713 = vmatpush.bf16.msra.mxu2 %v6045_v58 }
 0x1ec   :  { %v2926_v45 = vpop.f32.mrf.mxu1  ;;  %v3163_v13 = vpack.c.bf16 %v3155_v22, %v3155_v22 }
 0x1ed   :  { %3726 = vmatpush.bf16.msra.mxu0 %v6053_v23  ;;  %3688 = vmatpush.bf16.msra.mxu3 %v6028_v26  ;;  %v2927_v34 = vadd.f32 %v2926_v45, %v2914_v6  ;;  %v6078_v23 = vld [vmem:[%s8837_s3 + $0x1a0] sm:$0xff]  ;;  %v6083_v6 = vld [vmem:[%s8837_s3 + $0x1c8] sm:$0xff] }
 0x1ee   :  { %3701 = vmatpush.bf16.msra.mxu1 %v6036_v27  ;;  %v2941_v8 = vpop.f32.mrf.mxu0 }
 0x1ef   :  { %3714 = vmatpush.bf16.msra.mxu2 %v6044_v28  ;;  %v2940_v1 = vadd.f32 %v2939_v56, %v2927_v34  ;;  %v6077_v28 = vld [vmem:[%s8837_s3 + $0x198] sm:$0xff] }
 0x1f0   :  { %v2952_v7 = vpop.f32.mrf.mxu2  ;;  %v2915_v15 = vpop.f32.mrf.mxu3 }
 0x1f1   :  { %3727 = vmatpush.bf16.msra.mxu0 %v6052_v48  ;;  %3689 = vmatpush.bf16.msra.mxu3 %v6027_v30  ;;  %v2953_v58 = vadd.f32 %v2952_v7, %v2940_v1  ;;  %v6076_v30 = vld [vmem:[%s8837_s3 + $0x190] sm:$0xff] }
 0x1f2   :  { %3702 = vmatpush.bf16.msra.mxu1 %v6035_v17 }
 0x1f3   :  { %3715 = vmatpush.bf16.msra.mxu2 %v6043_v33 }
 0x1f4   :  { %v2928_v60 = vpop.f32.mrf.mxu1 }
 0x1f5   :  { %3728 = vmatpush.bf16.msra.mxu0 %v6051_v35  ;;  %3690 = vmatpush.bf16.msra.mxu3 %v6026_v37  ;;  %v6075_v37 = vld [vmem:[%s8837_s3 + $0x188] sm:$0xff] }
 0x1f6   :  { %3703 = vmatpush.bf16.msra.mxu1 %v6034_v57  ;;  %v6074_v57 = vld [vmem:[%s8837_s3 + $0x180] sm:$0xff] }
 0x1f7   :  { %3716 = vmatpush.bf16.msra.mxu2 %v6042_v9  ;;  %v6089_v9 = vld [vmem:[%s8837_s3 + $0x1f8] sm:$0xff] }
 0x1f8   :  { %3691 = vmatmul.bf16.vlgmr.msra.gmra.mxu3 %v3159_v46  ;;  %v2954_v19 = vpop.f32.mrf.mxu2  ;;  %v2965_v24 = vpop.f32.mrf.mxu3 }
 0x1f9   :  { %3729 = vmatpush.bf16.msra.mxu0 %v6050_v42  ;;  %3735 = vmatpush.bf16.msrb.mxu3 %v6065_v31  ;;  %v2966_v25 = vadd.f32 %v2965_v24, %v2953_v58  ;;  %v6088_v31 = vld [vmem:[%s8837_s3 + $0x1f0] sm:$0xff] }
 0x1fa   :  { %3748 = vmatpush.bf16.msrb.mxu1 %v6073_v44  ;;  %3717 = vmatmul.bf16.vlgmr.msra.gmra.mxu2 %v3161_v12  ;;  %v425_v44 = vperm.slane %v6096_v43, 6 }
 0x1fb   :  { %3704 = vmatmul.bf16.vlgmr.msra.gmra.mxu1 %v3160_v52  ;;  %3761 = vmatpush.bf16.msrb.mxu2 %v6081_v10  ;;  %v3156_v26 = vmax.f32 %v2966_v25, 0.0  ;;  %v6082_v10 = vld [vmem:[%s8837_s3 + $0x1c0] sm:$0xff] }
 0x1fc   :  { %3730 = vmatmul.bf16.vlgmr.msra.gmra.mxu0 %v3162_v49 }
 0x1fd   :  { %3736 = vmatpush.bf16.msrb.mxu3 %v6064_v47  ;;  %v3164_v27 = vpack.c.bf16 %v3156_v26, %v3156_v26  ;;  %3774 = vmatpush.bf16.msrb.mxu0 %v6089_v9  ;;  %v6087_v47 = vld [vmem:[%s8837_s3 + $0x1e8] sm:$0xff] }
 0x1fe   :  { %3749 = vmatpush.bf16.msrb.mxu1 %v6072_v32  ;;  %v6086_v32 = vld [vmem:[%s8837_s3 + $0x1e0] sm:$0xff] }
 0x1ff   :  { %3762 = vmatpush.bf16.msrb.mxu2 %v6080_v14 }
 0x200   :  { %v2967_v48 = vpop.f32.mrf.mxu3 }
 0x201   :  { %3737 = vmatpush.bf16.msrb.mxu3 %v6063_v51  ;;  %3775 = vmatpush.bf16.msrb.mxu0 %v6088_v31 }
 0x202   :  { %3750 = vmatpush.bf16.msrb.mxu1 %v6071_v54 }
 0x203   :  { %3763 = vmatpush.bf16.msrb.mxu2 %v6079_v20 }
 0x204   :  { %v2978_v17 = vpop.f32.mrf.mxu1 }
 0x205   :  { %3738 = vmatpush.bf16.msrb.mxu3 %v6062_v59  ;;  %v2979_v46 = vadd.f32 %v2978_v17, %v425_v44  ;;  %3776 = vmatpush.bf16.msrb.mxu0 %v6087_v47 }
 0x206   :  { %3751 = vmatpush.bf16.msrb.mxu1 %v6070_v62  ;;  %v3004_v29 = vpop.f32.mrf.mxu0 }
 0x207   :  { %3764 = vmatpush.bf16.msrb.mxu2 %v6078_v23 }
 0x209   :  { %3739 = vmatpush.bf16.msrb.mxu3 %v6061_v2  ;;  %3777 = vmatpush.bf16.msrb.mxu0 %v6086_v32 }
 0x20a   :  { %3752 = vmatpush.bf16.msrb.mxu1 %v6069_v4 }
 0x20b   :  { %3765 = vmatpush.bf16.msrb.mxu2 %v6077_v28  ;;  %v6090_v28 = vld [vmem:[%s8838_s4] ss:$0 sm:$0xff] }
 0x20c   :  { %v2980_v38 = vpop.f32.mrf.mxu1 }
 0x20d   :  { %3740 = vmatpush.bf16.msrb.mxu3 %v6060_v53  ;;  %3778 = vmatpush.bf16.msrb.mxu0 %v6085_v55 }
 0x20e   :  { %3753 = vmatpush.bf16.msrb.mxu1 %v6068_v61  ;;  %v3006_v35 = vpop.f32.mrf.mxu0 }
 0x20f   :  { %3766 = vmatpush.bf16.msrb.mxu2 %v6076_v30  ;;  %v2991_v33 = vpop.f32.mrf.mxu3 }
 0x210   :  { %v2992_v12 = vadd.f32 %v2991_v33, %v2979_v46 }
 0x211   :  { %3741 = vmatpush.bf16.msrb.mxu3 %v6059_v16  ;;  %v3017_v36 = vpop.f32.mrf.mxu2  ;;  %3779 = vmatpush.bf16.msrb.mxu0 %v6084_v63 }
 0x212   :  { %3754 = vmatpush.bf16.msrb.mxu1 %v6067_v18  ;;  %v3005_v50 = vadd.f32 %v3004_v29, %v2992_v12 }
 0x213   :  { %3767 = vmatpush.bf16.msrb.mxu2 %v6075_v37 }
 0x214   :  { %v3018_v54 = vadd.f32 %v3017_v36, %v3005_v50 }
 0x215   :  { %3742 = vmatpush.bf16.msrb.mxu3 %v6058_v21  ;;  %3780 = vmatpush.bf16.msrb.mxu0 %v6083_v6 }
 0x216   :  { %3755 = vmatpush.bf16.msrb.mxu1 %v6066_v5  ;;  %v3056_v41 = vpop.f32.mrf.mxu0 }
 0x217   :  { %3768 = vmatpush.bf16.msrb.mxu2 %v6074_v57  ;;  %v2993_v40 = vpop.f32.mrf.mxu3 }
 0x218   :  { %3743 = vmatmul.bf16.vlgmr.msrb.gmra.mxu3 %v3163_v13 }
 0x219   :  { %3756 = vmatmul.bf16.vlgmr.msrb.gmra.mxu1 %v3164_v27  ;;  %v3019_v42 = vpop.f32.mrf.mxu2  ;;  %3781 = vmatpush.bf16.msrb.mxu0 %v6082_v10 }
 0x21e   :  { %v3058_v52 = vpop.f32.mrf.mxu0 }
 0x227   :  { %v3030_v49 = vpop.f32.mrf.mxu1 }
 0x228   :  { %v3031_v56 = vadd.f32 %v3030_v49, %v3018_v54 }
 0x22a   :  { %v3082_v51 = vpop.f32.mrf.mxu0 }
 0x22f   :  { %v3032_v59 = vpop.f32.mrf.mxu1  ;;  %v3043_v45 = vpop.f32.mrf.mxu3 }
 0x230   :  { %v3044_v62 = vadd.f32 %v3043_v45, %v3031_v56 }
 0x231   :  { %v3069_v0 = vpop.f32.mrf.mxu2 }
 0x232   :  { %v3057_v2 = vadd.f32 %v3056_v41, %v3044_v62  ;;  %v3084_v3 = vpop.f32.mrf.mxu0  ;;  %v3070_v61 = vadd.f32 %v3069_v0, %v426_v11 }
 0x234   :  { %v3157_v4 = vmax.f32 %v3057_v2, 0.0  ;;  %v3083_v34 = vadd.f32 %v3082_v51, %v3070_v61 }
 0x236   :  { %v3165_v7 = vpack.c.bf16 %v3157_v4, %v3157_v4 }
 0x237   :  { %v3045_v8 = vpop.f32.mrf.mxu3 }
 0x238   :  { %3769 = vmatmul.bf16.vlgmr.msrb.gmra.mxu2 %v3165_v7 }
 0x239   :  { %v3071_v53 = vpop.f32.mrf.mxu2 }
 0x251   :  { %v3095_v60 = vpop.f32.mrf.mxu1 }
 0x252   :  { %v3096_v15 = vadd.f32 %v3095_v60, %v3083_v34 }
 0x259   :  { %v3134_v14 = vpop.f32.mrf.mxu0  ;;  %v3097_v16 = vpop.f32.mrf.mxu1 }
 0x25b   :  { %v3108_v39 = vpop.f32.mrf.mxu3 }
 0x25c   :  { %v3109_v18 = vadd.f32 %v3108_v39, %v3096_v15 }
 0x25d   :  { %v3121_v1 = vpop.f32.mrf.mxu2 }
 0x25e   :  { %v3122_v19 = vadd.f32 %v3121_v1, %v3109_v18 }
 0x260   :  { %v3135_v21 = vadd.f32 %v3134_v14, %v3122_v19 }
 0x261   :  { %v3136_v20 = vpop.f32.mrf.mxu0  ;;  %v3147_v22 = vpop.f32.mrf.mxu1 }
 0x262   :  { %v3148_v5 = vadd.f32 %v3147_v22, %v3135_v21 }
 0x263   :  { %v3110_v58 = vpop.f32.mrf.mxu3 }
 0x264   :  { %v3158_v24 = vmax.f32 %v3148_v5, 0.0 }
 0x265   :  { %v3123_v23 = vpop.f32.mrf.mxu2 }
 0x266   :  { %v3166_v25 = vpack.c.bf16 %v3158_v24, %v3158_v24 }
 0x268   :  { %3782 = vmatmul.bf16.vlgmr.msrb.gmra.mxu0 %v3166_v25 }
 0x269   :  { %v3149_v13 = vpop.f32.mrf.mxu1 }
 0x278   :  { %v3705_v26 = vpop.f32.mrf.mxu1 }
 0x279   :  { %v3731_v27 = vpop.f32.mrf.mxu0 }
 0x27b   :  { %v3692_v48 = vpop.f32.mrf.mxu3 }
 0x27c   :  { %v3693_v29 = vadd.f32 %v6090_v28, %v3692_v48 }
 0x27d   :  { %v3718_v30 = vpop.f32.mrf.mxu2 }
 0x27e   :  { %v3706_v17 = vadd.f32 %v3705_v26, %v3693_v29 }
 0x280   :  { %v3707_v33 = vpop.f32.mrf.mxu1  ;;  %v3719_v36 = vadd.f32 %v3718_v30, %v3706_v17 }
 0x281   :  { %v3733_v35 = vpop.f32.mrf.mxu0 }
 0x282   :  { %v3732_v37 = vadd.f32 %v3731_v27, %v3719_v36 }
 0x283   :  { %v3694_v38 = vpop.f32.mrf.mxu3 }
 0x285   :  { %v3720_v57 = vpop.f32.mrf.mxu2 }
 0x296   :  { %v3757_v9 = vpop.f32.mrf.mxu1 }
 0x29b   :  { %v3744_v40 = vpop.f32.mrf.mxu3 }
 0x29c   :  { %v3745_v41 = vadd.f32 %v3744_v40, %v3732_v37 }
 0x29e   :  { %v3758_v42 = vadd.f32 %v3757_v9, %v3745_v41  ;;  %v3759_v31 = vpop.f32.mrf.mxu1 }
 0x2a3   :  { %v3746_v43 = vpop.f32.mrf.mxu3 }
 0x2bb   :  { %v3770_v44 = vpop.f32.mrf.mxu2 }
 0x2bc   :  { %v3771_v52 = vadd.f32 %v3770_v44, %v3758_v42 }
 0x2c3   :  { %v3772_v46 = vpop.f32.mrf.mxu2 }
 0x2e5   :  { %v3783_v12 = vpop.f32.mrf.mxu0 }
 0x2e6   :  { %v3784_v47 = vadd.f32 %v3783_v12, %v3771_v52 }
 0x2e8   :  { %3787 = vmax.xlane.f32.xlu0 %v3784_v47 }
 0x2ed   :  { %v3785_v49 = vpop.f32.mrf.mxu0 }
 0x35b   :  { %v3788_v32 = vpop.xlane.xlu0 %3787 }
 0x35c   :  { %v3789_v50 = vsub.f32 %v3784_v47, %v3788_v32 }
 0x35e   :  { %v3790_v51 = vmul.f32 1.442695, %v3789_v50 }
 0x360   :  { %6091 = vpow2.f32 %v3790_v51 }
 0x366   :  { %v6092_v54 = vpop.eup %6091 }
 0x367   :  { %3792 = vadd.xlane.f32.xlu0 %v6092_v54 }
 0x3da   :  { %v3793_v55 = vpop.xlane.xlu0 %3792 }
 0x3db   :  { %6093 = vlog2.f32 %v3793_v55 }
 0x3e1   :  { %v6094_v56 = vpop.eup %6093 }
 0x3e2   :  { %v3795_v59 = vmul.f32 0.6931472, %v6094_v56 }
 0x3e4   :  { %v3796_v45 = vsub.f32 %v3789_v50, %v3795_v59 }
 0x3e6   :  { %3797 = vst [vmem:[%s8839_s5] sm:$0xff] %v3796_v45 }

</bundles_post_ra>
